<compile_context>
chip_gen: v7x
topology: tpu7x:2x2x1
jax: 0.10.0
libtpu: 0.0.40
codegen_flags: <defaults>
</compile_context>

<pallas_src>
import math
from functools import partial

import jax
import jax.numpy as jnp
from jax.experimental import pallas as pl
from jax.experimental.pallas import tpu as pltpu


# ---------------------------------------------------------------------------
# small helpers
# ---------------------------------------------------------------------------
def _round_up(a, b):
    return -(-a // b) * b


def _vmem_limit_bytes():
    """Per-generation VMEM limit: ~3/4 of physical, capped at 96 MiB."""
    phys = 64 * 1024 * 1024          # conservative default (v7x per-TC VMEM)
    try:
        info = pltpu.get_tpu_info()
        cap = getattr(info, "vmem_capacity_bytes", None)
        if cap:
            phys = int(cap)
    except Exception:
        pass
    return min(phys * 3 // 4, 96 * 1024 * 1024)


def _pick_cout_tile(cout, max_tc=256):
    """Full Cout if small; else the largest multiple-of-128 divisor <= max_tc."""
    if cout <= max_tc:
        return cout
    for tc in range(max_tc, 127, -1):
        if cout % tc == 0 and tc % 128 == 0:
            return tc
    return cout


def _pick_row_tile(ho, wo, k, tc, budget_bytes, max_rows=4096):
    """Largest TH dividing Ho with TH*Wo 8-aligned (when possible) whose
    per-step working set (bf16 patch + f32 acc + double-buffered y) fits."""
    def cost(th):
        rows = th * wo
        return rows * (2 * k          # bf16 patch temporary
                       + 4 * tc       # f32 MXU accumulator
                       + 2 * 2 * tc)  # double-buffered bf16 y block

    for aligned in (True, False):
        best = None
        for th in range(1, ho + 1):
            if ho % th:
                continue
            if aligned and (th * wo) % 8:
                continue
            if th * wo > max_rows:
                continue
            if cost(th) <= budget_bytes:
                best = th
        if best is not None:
            return best
    return None


def _pick_gemm_tile(m, max_rows=1024):
    """Largest divisor of m <= max_rows, preferring multiples of 8."""
    for align in (8, 1):
        best = None
        for d in range(1, min(m, max_rows) + 1):
            if m % d == 0 and d % align == 0:
                best = d
        if best is not None:
            return best
    return m


def _pick_bn_tile(hw, cout, budget_bytes):
    """TB divides Ho*Wo and is a multiple of 128 (lane-dense transposed store);
    falls back to the full per-image spatial extent."""
    def cost(tb):
        return tb * cout * (2 * 2 + 4 * 2 + 4 + 4)
    best = None
    tb = 128
    while tb <= hw:
        if hw % tb == 0 and cost(tb) <= budget_bytes:
            best = tb
        tb += 128
    return best if best is not None else hw


# ---------------------------------------------------------------------------
# Kernel A (hot path): fused in-kernel im2col conv GEMM (single K=kh*kw*Cin dot)
# + per-image BN partial statistics.  grid = (batch, cout_tiles, row_tiles).
# The padded image is built once per image into a VMEM scratch (no HBM pad pass).
# ---------------------------------------------------------------------------
def _fused_conv_stats_kernel(x_ref, w_ref, y_ref, sum_ref, sq_ref, xpad_ref, *,
                             kh, kw, th, wo, pad):
    # x_ref   : (H, W, Cin)        un-padded image of batch element n (bf16)
    # w_ref   : (kh*kw*Cin, TC)    weights (bf16)
    # y_ref   : (th*wo, TC)        conv output rows for this tile (bf16)
    # sum/sq  : (1, TC)            per-image channel sum / sum-of-squares (f32)
    # xpad_ref: (Hp, Wp, Cin)      zero-padded image scratch (bf16)
    t = pl.program_id(2)
    h, w, cin = x_ref.shape

    @pl.when(t == 0)
    def _():
        xpad_ref[...] = jnp.zeros_like(xpad_ref)
        xpad_ref[pl.ds(pad, h), pl.ds(pad, w), :] = x_ref[...]
        sum_ref[...] = jnp.zeros_like(sum_ref)
        sq_ref[...] = jnp.zeros_like(sq_ref)

    r0 = t * th
    taps = [xpad_ref[pl.ds(r0 + i, th), pl.ds(j, wo), :]
            for i in range(kh) for j in range(kw)]
    patch = taps[0] if len(taps) == 1 else jnp.concatenate(taps, axis=-1)
    patch = patch.reshape(th * wo, kh * kw * cin)

    # One big MXU dot (K = kh*kw*Cin) with f32 accumulation.
    acc = jnp.dot(patch, w_ref[...], preferred_element_type=jnp.float32)
    y_ref[...] = acc.astype(y_ref.dtype)

    sum_ref[...] += jnp.sum(acc, axis=0, keepdims=True)
    sq_ref[...] += jnp.sum(acc * acc, axis=0, keepdims=True)


# ---------------------------------------------------------------------------
# Kernel A' (fallback: stride != 1 or image too large to keep resident in VMEM):
# tiled GEMM on XLA-side im2col patches with fused per-tile BN partial sums.
# ---------------------------------------------------------------------------
def _gemm_stats_kernel(p_ref, w_ref, y_ref, sum_ref, sq_ref):
    acc = jnp.dot(p_ref[...], w_ref[...], preferred_element_type=jnp.float32)
    y_ref[...] = acc.astype(y_ref.dtype)
    sum_ref[...] = jnp.sum(acc, axis=0, keepdims=True)
    sq_ref[...] = jnp.sum(acc * acc, axis=0, keepdims=True)


# ---------------------------------------------------------------------------
# Kernel B: BN affine (+ optional mixup blend, + optional leaky ReLU) with the
# NHWC->NCHW transpose fused in (writes (Cout, TB) blocks of (N, Cout, Ho*Wo)).
# ---------------------------------------------------------------------------
def _bn_act_kernel(y_ref, scale_ref, shift_ref, o_ref, *, relu, leaky, slope):
    y = y_ref[...].astype(jnp.float32) * scale_ref[...] + shift_ref[...]
    if relu:
        y = jnp.where(y >= 0, y, slope * y) if leaky else jnp.maximum(y, 0.0)
    o_ref[...] = jnp.transpose(y).astype(o_ref.dtype)


def _bn_mix_act_kernel(perm_ref, y_ref, yp_ref, sa_ref, sb_ref, shift_ref,
                       o_ref, *, relu, leaky, slope):
    # perm_ref is consumed by the index_maps (scalar prefetch); unused here.
    del perm_ref
    y = (y_ref[...].astype(jnp.float32) * sa_ref[...]
         + yp_ref[...].astype(jnp.float32) * sb_ref[...] + shift_ref[...])
    if relu:
        y = jnp.where(y >= 0, y, slope * y) if leaky else jnp.maximum(y, 0.0)
    o_ref[...] = jnp.transpose(y).astype(o_ref.dtype)


# ---------------------------------------------------------------------------
# Wrapper
# ---------------------------------------------------------------------------
def conv_bn_2d(x_nchw, weight_oihw, gamma, beta, *, stride=1, padding=1,
               groups=1, out_relu=False, leaky=True, eps=1e-5,
               lbda=None, perm=None, negative_slope=0.1):
    """ConvBN2d forward (PyTorch layouts: NCHW input, OIHW weight, NCHW output).
    BatchNorm uses train-mode batch statistics, matching the reference module's
    forward; running-stat buffers are not updated here.  The module's leaky-ReLU
    slope is 0.1 (explicit in the PyTorch code)."""
    N, Cin, H, W = x_nchw.shape
    Cout, Cin_w, kh, kw = weight_oihw.shape
    assert groups == 1 and Cin_w == Cin  # TODO(synk): grouped conv not implemented
    Ho = (H + 2 * padding - kh) // stride + 1
    Wo = (W + 2 * padding - kw) // stride + 1
    Hp, Wp = H + 2 * padding, W + 2 * padding
    M = N * Ho * Wo
    K = kh * kw * Cin

    vmem_cap = _vmem_limit_bytes()

    def cparams(sem):
        return pltpu.CompilerParams(dimension_semantics=sem,
                                    vmem_limit_bytes=vmem_cap)

    # glue: NCHW -> NHWC bf16 (XLA fuses the cast into the transpose).  Padding
    # is applied inside the kernel, not as a separate HBM pass.
    x = jnp.transpose(x_nchw.astype(jnp.bfloat16), (0, 2, 3, 1))
    # weight OIHW -> (kh*kw*Cin, Cout), matching the in-kernel patch layout.
    w_mat = jnp.transpose(weight_oihw.astype(jnp.bfloat16),
                          (2, 3, 1, 0)).reshape(K, Cout)

    TC = _pick_cout_tile(Cout)
    CT = Cout // TC

    # Can a whole padded image stay resident in VMEM (tile-padded estimate)?
    xpad_bytes = Hp * _round_up(Wp, 16) * _round_up(Cin, 128) * 2
    xin_bytes = 2 * H * _round_up(W, 16) * _round_up(Cin, 128) * 2
    w_bytes = 2 * _round_up(K, 16) * _round_up(TC, 128) * 2
    budget = vmem_cap // 2 - (xpad_bytes + xin_bytes + w_bytes)

    TH = _pick_row_tile(Ho, Wo, K, TC, budget) if (stride == 1 and budget > 0) else None

    if TH is not None:
        T = Ho // TH
        y, psum, psq = pl.pallas_call(
            partial(_fused_conv_stats_kernel, kh=kh, kw=kw, th=TH, wo=Wo,
                    pad=padding),
            out_shape=(jax.ShapeDtypeStruct((M, Cout), jnp.bfloat16),
                       jax.ShapeDtypeStruct((N, 1, Cout), jnp.float32),
                       jax.ShapeDtypeStruct((N, 1, Cout), jnp.float32)),
            grid=(N, CT, T),
            in_specs=[pl.BlockSpec((None, H, W, Cin), lambda n, c, t: (n, 0, 0, 0)),
                      pl.BlockSpec((K, TC), lambda n, c, t: (0, c))],
            out_specs=(pl.BlockSpec((TH * Wo, TC), lambda n, c, t: (n * T + t, c)),
                       pl.BlockSpec((None, 1, TC), lambda n, c, t: (n, 0, c)),
                       pl.BlockSpec((None, 1, TC), lambda n, c, t: (n, 0, c))),
            scratch_shapes=[pltpu.VMEM((Hp, Wp, Cin), jnp.bfloat16)],
            compiler_params=cparams(("parallel", "parallel", "arbitrary")),
        )(x, w_mat)
        ch_sum = jnp.sum(psum, axis=0)          # (1, Cout)
        ch_sq = jnp.sum(psq, axis=0)
    else:
        # TODO(synk): extend the fused path to stride>1 via strided ref slices and
        # to very large feature maps via haloed row-tile DMA (make_async_copy).
        xp = jnp.pad(x, ((0, 0), (padding, padding), (padding, padding), (0, 0)))
        cols = [xp[:, i:i + stride * Ho:stride, j:j + stride * Wo:stride, :]
                for i in range(kh) for j in range(kw)]
        patches = jnp.concatenate(cols, axis=-1).reshape(M, K)
        TM = _pick_gemm_tile(M)
        G = M // TM
        y, psum, psq = pl.pallas_call(
            _gemm_stats_kernel,
            out_shape=(jax.ShapeDtypeStruct((M, Cout), jnp.bfloat16),
                       jax.ShapeDtypeStruct((G, 1, Cout), jnp.float32),
                       jax.ShapeDtypeStruct((G, 1, Cout), jnp.float32)),
            grid=(G,),
            in_specs=[pl.BlockSpec((TM, K), lambda g: (g, 0)),
                      pl.BlockSpec((K, Cout), lambda g: (0, 0))],
            out_specs=(pl.BlockSpec((TM, Cout), lambda g: (g, 0)),
                       pl.BlockSpec((None, 1, Cout), lambda g: (g, 0, 0)),
                       pl.BlockSpec((None, 1, Cout), lambda g: (g, 0, 0))),
            compiler_params=cparams(("parallel",)),
        )(patches, w_mat)
        ch_sum = jnp.sum(psum, axis=0)
        ch_sq = jnp.sum(psq, axis=0)

    # glue: fold train-mode batch statistics into per-channel scale / shift.
    # (stats come from the f32 MXU accumulator; kernel B applies them to the
    #  bf16-rounded y — the difference is bf16 rounding noise.)
    mean = ch_sum / M
    var = jnp.maximum(ch_sq / M - mean * mean, 0.0)
    g = gamma.reshape(1, Cout).astype(jnp.float32)
    b = beta.reshape(1, Cout).astype(jnp.float32)
    scale = g / jnp.sqrt(var + eps)
    shift = b - mean * scale

    HW = Ho * Wo
    TB = _pick_bn_tile(HW, Cout, vmem_cap // 2)
    Tb = HW // TB
    out_shape = jax.ShapeDtypeStruct((N, Cout, HW), jnp.float32)

    if lbda is None:
        out = pl.pallas_call(
            partial(_bn_act_kernel, relu=out_relu, leaky=leaky,
                    slope=negative_slope),
            out_shape=out_shape,
            grid=(N, Tb),
            in_specs=[pl.BlockSpec((TB, Cout), lambda n, t: (n * Tb + t, 0)),
                      pl.BlockSpec((1, Cout), lambda n, t: (0, 0)),
                      pl.BlockSpec((1, Cout), lambda n, t: (0, 0))],
            out_specs=pl.BlockSpec((None, Cout, TB), lambda n, t: (n, 0, t)),
            compiler_params=cparams(("parallel", "parallel")),
        )(y, scale, shift)
    else:
        # mixup fused into kernel B: lbda*bn(y) + (1-lbda)*bn(y[perm]) ==
        # (lbda*scale)*y + ((1-lbda)*scale)*y[perm] + shift (BN affine is linear).
        perm_i32 = jnp.asarray(perm, jnp.int32)
        lb = jnp.float32(lbda)
        out = pl.pallas_call(
            partial(_bn_mix_act_kernel, relu=out_relu, leaky=leaky,
                    slope=negative_slope),
            out_shape=out_shape,
            grid_spec=pltpu.PrefetchScalarGridSpec(
                num_scalar_prefetch=1,
                grid=(N, Tb),
                in_specs=[
                    pl.BlockSpec((TB, Cout), lambda n, t, p: (n * Tb + t, 0)),
                    pl.BlockSpec((TB, Cout), lambda n, t, p: (p[n] * Tb + t, 0)),
                    pl.BlockSpec((1, Cout), lambda n, t, p: (0, 0)),
                    pl.BlockSpec((1, Cout), lambda n, t, p: (0, 0)),
                    pl.BlockSpec((1, Cout), lambda n, t, p: (0, 0)),
                ],
                out_specs=pl.BlockSpec((None, Cout, TB), lambda n, t, p: (n, 0, t)),
            ),
            compiler_params=cparams(("parallel", "parallel")),
        )(perm_i32, y, y, lb * scale, (1.0 - lb) * scale, shift)

    return out.reshape(N, Cout, Ho, Wo)


if __name__ == "__main__":
    key = jax.random.PRNGKey(0)
    kx, kw_ = jax.random.split(key)

    # Small shapes consistent with the module: x is NCHW.
    N, Cin, H, W = 2, 4, 16, 16
    Cout, ksize = 8, 3

    x = jax.random.normal(kx, (N, Cin, H, W), jnp.float32)

    # kaiming_normal_(mode='fan_out', nonlinearity='leaky_relu'):
    std = math.sqrt(2.0) / math.sqrt(Cout * ksize * ksize)
    weight = std * jax.random.normal(kw_, (Cout, Cin, ksize, ksize), jnp.float32)
    gamma = jnp.ones((Cout,), jnp.float32)   # nn.init.constant_(bn.weight, 1)
    beta = jnp.zeros((Cout,), jnp.float32)   # nn.init.constant_(bn.bias, 0)

    perm = jnp.array([1, 0], jnp.int32)
    lbda = 0.7

    y = conv_bn_2d(x, weight, gamma, beta)                                 # bn only
    y_relu = conv_bn_2d(x, weight, gamma, beta, out_relu=True, leaky=True)  # +leaky relu
    y_mix = conv_bn_2d(x, weight, gamma, beta, out_relu=True, leaky=True,
                       lbda=lbda, perm=perm)                                # mixup path
    jax.block_until_ready((y, y_relu, y_mix))

    # Reference (bf16-cast operands to mirror the kernel's MXU input precision).
    xr = x.astype(jnp.bfloat16).astype(jnp.float32)
    wr = weight.astype(jnp.bfloat16).astype(jnp.float32)
    conv = jax.lax.conv_general_dilated(
        xr, wr, (1, 1), ((1, 1), (1, 1)),
        dimension_numbers=("NCHW", "OIHW", "NCHW"),
        precision=jax.lax.Precision.HIGHEST)
    m = conv.mean(axis=(0, 2, 3), keepdims=True)
    v = conv.var(axis=(0, 2, 3), keepdims=True)
    ref = (conv - m) / jnp.sqrt(v + 1e-5)
    ref_relu = jnp.where(ref >= 0, ref, 0.1 * ref)
    ref_mix = lbda * ref + (1.0 - lbda) * ref[jnp.array([1, 0])]
    ref_mix = jnp.where(ref_mix >= 0, ref_mix, 0.1 * ref_mix)

    assert y.shape == (N, Cout, H, W) and y.dtype == jnp.float32
    assert jnp.allclose(y, ref, atol=2e-2, rtol=2e-2), \
        float(jnp.max(jnp.abs(y - ref)))
    assert jnp.allclose(y_relu, ref_relu, atol=2e-2, rtol=2e-2), \
        float(jnp.max(jnp.abs(y_relu - ref_relu)))
    assert jnp.allclose(y_mix, ref_mix, atol=2e-2, rtol=2e-2), \
        float(jnp.max(jnp.abs(y_mix - ref_mix)))

    print("KERNEL_OK")
</pallas_src>

<mosaic_0001>
module attributes {stable_mosaic.version = 11 : i64} {
  func.func @_fused_conv_stats_kernel(%arg0: i32, %arg1: i32, %arg2: i32, %arg3: memref<1x16x16x4xbf16, #tpu.memory_space<vmem>>, %arg4: memref<36x8xbf16, #tpu.memory_space<vmem>>, %arg5: memref<256x8xbf16, #tpu.memory_space<vmem>>, %arg6: memref<1x1x8xf32, #tpu.memory_space<vmem>>, %arg7: memref<1x1x8xf32, #tpu.memory_space<vmem>>, %arg8: memref<18x18x4xbf16, #tpu.memory_space<vmem>>) attributes {dimension_semantics = [#tpu.dimension_semantics<parallel>, #tpu.dimension_semantics<parallel>, #tpu.dimension_semantics<arbitrary>], iteration_bounds = array<i64: 2, 1, 1>, scalar_prefetch = 0 : i64, scratch_operands = 1 : i64, tpu.core_type = #tpu.core_type<tc>, window_params = [{transform_indices = @transform_0, window_bounds = array<i64: 1, 16, 16, 4>}, {transform_indices = @transform_1, window_bounds = array<i64: 36, 8>}, {transform_indices = @transform_2, window_bounds = array<i64: 256, 8>}, {transform_indices = @transform_3, window_bounds = array<i64: 1, 1, 8>}, {transform_indices = @transform_4, window_bounds = array<i64: 1, 1, 8>}]} {
    %c0_i32 = arith.constant 0 : i32
    %0 = arith.cmpi eq, %arg2, %c0_i32 : i32
    %1 = arith.extui %0 : i1 to i32
    %c0_i32_0 = arith.constant 0 : i32
    %2 = arith.cmpi ne, %1, %c0_i32_0 : i32
    scf.if %2 {
      %cst_41 = arith.constant 0.000000e+00 : bf16
      %54 = vector.broadcast %cst_41 : bf16 to vector<18x18x4xbf16>
      %c0_42 = arith.constant 0 : index
      %c0_43 = arith.constant 0 : index
      %c0_44 = arith.constant 0 : index
      %55 = vector.load %arg8[%c0_42, %c0_43, %c0_44] : memref<18x18x4xbf16, #tpu.memory_space<vmem>>, vector<18x18x4xbf16>
      tpu.vector_store %arg8[%c0_42, %c0_43, %c0_44], %54 {strides = array<i32>} : memref<18x18x4xbf16, #tpu.memory_space<vmem>>, vector<18x18x4xbf16>,
      %c0_45 = arith.constant 0 : index
      %c0_46 = arith.constant 0 : index
      %c0_47 = arith.constant 0 : index
      %c0_48 = arith.constant 0 : index
      %56 = vector.load %arg3[%c0_45, %c0_46, %c0_47, %c0_48] : memref<1x16x16x4xbf16, #tpu.memory_space<vmem>>, vector<1x16x16x4xbf16>
      %57 = vector.shape_cast %56 : vector<1x16x16x4xbf16> to vector<16x16x4xbf16>
      %c1_49 = arith.constant 1 : index
      %c1_50 = arith.constant 1 : index
      %c0_51 = arith.constant 0 : index
      %58 = vector.load %arg8[%c1_49, %c1_50, %c0_51] : memref<18x18x4xbf16, #tpu.memory_space<vmem>>, vector<16x16x4xbf16>
      tpu.vector_store %arg8[%c1_49, %c1_50, %c0_51], %57 {strides = array<i32>} : memref<18x18x4xbf16, #tpu.memory_space<vmem>>, vector<16x16x4xbf16>,
      %cst_52 = arith.constant 0.000000e+00 : f32
      %59 = vector.broadcast %cst_52 : f32 to vector<1x8xf32>
      %c0_53 = arith.constant 0 : index
      %c0_54 = arith.constant 0 : index
      %c0_55 = arith.constant 0 : index
      %60 = vector.load %arg6[%c0_53, %c0_54, %c0_55] : memref<1x1x8xf32, #tpu.memory_space<vmem>>, vector<1x1x8xf32>
      %61 = vector.shape_cast %60 : vector<1x1x8xf32> to vector<1x8xf32>
      %62 = vector.shape_cast %59 : vector<1x8xf32> to vector<1x1x8xf32>
      tpu.vector_store %arg6[%c0_53, %c0_54, %c0_55], %62 {strides = array<i32>} : memref<1x1x8xf32, #tpu.memory_space<vmem>>, vector<1x1x8xf32>,
      %cst_56 = arith.constant 0.000000e+00 : f32
      %63 = vector.broadcast %cst_56 : f32 to vector<1x8xf32>
      %c0_57 = arith.constant 0 : index
      %c0_58 = arith.constant 0 : index
      %c0_59 = arith.constant 0 : index
      %64 = vector.load %arg7[%c0_57, %c0_58, %c0_59] : memref<1x1x8xf32, #tpu.memory_space<vmem>>, vector<1x1x8xf32>
      %65 = vector.shape_cast %64 : vector<1x1x8xf32> to vector<1x8xf32>
      %66 = vector.shape_cast %63 : vector<1x8xf32> to vector<1x1x8xf32>
      tpu.vector_store %arg7[%c0_57, %c0_58, %c0_59], %66 {strides = array<i32>} : memref<1x1x8xf32, #tpu.memory_space<vmem>>, vector<1x1x8xf32>,
    } else {
    }
    %c16_i32 = arith.constant 16 : i32
    %3 = arith.muli %arg2, %c16_i32 : i32
    %c0_i32_1 = arith.constant 0 : i32
    %4 = arith.addi %3, %c0_i32_1 : i32
    %5 = arith.index_cast %4 : i32 to index
    %c0 = arith.constant 0 : index
    %c0_2 = arith.constant 0 : index
    %6 = vector.load %arg8[%5, %c0, %c0_2] : memref<18x18x4xbf16, #tpu.memory_space<vmem>>, vector<16x16x4xbf16>
    %c0_i32_3 = arith.constant 0 : i32
    %7 = arith.addi %3, %c0_i32_3 : i32
    %8 = arith.index_cast %7 : i32 to index
    %c1 = arith.constant 1 : index
    %c0_4 = arith.constant 0 : index
    %9 = vector.load %arg8[%8, %c1, %c0_4] : memref<18x18x4xbf16, #tpu.memory_space<vmem>>, vector<16x16x4xbf16>
    %c0_i32_5 = arith.constant 0 : i32
    %10 = arith.addi %3, %c0_i32_5 : i32
    %11 = arith.index_cast %10 : i32 to index
    %c2 = arith.constant 2 : index
    %c0_6 = arith.constant 0 : index
    %12 = vector.load %arg8[%11, %c2, %c0_6] : memref<18x18x4xbf16, #tpu.memory_space<vmem>>, vector<16x16x4xbf16>
    %c1_i32 = arith.constant 1 : i32
    %13 = arith.addi %3, %c1_i32 : i32
    %14 = arith.index_cast %13 : i32 to index
    %c0_7 = arith.constant 0 : index
    %c0_8 = arith.constant 0 : index
    %15 = vector.load %arg8[%14, %c0_7, %c0_8] : memref<18x18x4xbf16, #tpu.memory_space<vmem>>, vector<16x16x4xbf16>
    %c1_i32_9 = arith.constant 1 : i32
    %16 = arith.addi %3, %c1_i32_9 : i32
    %17 = arith.index_cast %16 : i32 to index
    %c1_10 = arith.constant 1 : index
    %c0_11 = arith.constant 0 : index
    %18 = vector.load %arg8[%17, %c1_10, %c0_11] : memref<18x18x4xbf16, #tpu.memory_space<vmem>>, vector<16x16x4xbf16>
    %c1_i32_12 = arith.constant 1 : i32
    %19 = arith.addi %3, %c1_i32_12 : i32
    %20 = arith.index_cast %19 : i32 to index
    %c2_13 = arith.constant 2 : index
    %c0_14 = arith.constant 0 : index
    %21 = vector.load %arg8[%20, %c2_13, %c0_14] : memref<18x18x4xbf16, #tpu.memory_space<vmem>>, vector<16x16x4xbf16>
    %c2_i32 = arith.constant 2 : i32
    %22 = arith.addi %3, %c2_i32 : i32
    %23 = arith.index_cast %22 : i32 to index
    %c0_15 = arith.constant 0 : index
    %c0_16 = arith.constant 0 : index
    %24 = vector.load %arg8[%23, %c0_15, %c0_16] : memref<18x18x4xbf16, #tpu.memory_space<vmem>>, vector<16x16x4xbf16>
    %c2_i32_17 = arith.constant 2 : i32
    %25 = arith.addi %3, %c2_i32_17 : i32
    %26 = arith.index_cast %25 : i32 to index
    %c1_18 = arith.constant 1 : index
    %c0_19 = arith.constant 0 : index
    %27 = vector.load %arg8[%26, %c1_18, %c0_19] : memref<18x18x4xbf16, #tpu.memory_space<vmem>>, vector<16x16x4xbf16>
    %c2_i32_20 = arith.constant 2 : i32
    %28 = arith.addi %3, %c2_i32_20 : i32
    %29 = arith.index_cast %28 : i32 to index
    %c2_21 = arith.constant 2 : index
    %c0_22 = arith.constant 0 : index
    %30 = vector.load %arg8[%29, %c2_21, %c0_22] : memref<18x18x4xbf16, #tpu.memory_space<vmem>>, vector<16x16x4xbf16>
    %31 = tpu.concatenate %6, %9, %12, %15, %18, %21, %24, %27, %30 in 2 : vector<16x16x4xbf16>, vector<16x16x4xbf16>, vector<16x16x4xbf16>, vector<16x16x4xbf16>, vector<16x16x4xbf16>, vector<16x16x4xbf16>, vector<16x16x4xbf16>, vector<16x16x4xbf16>, vector<16x16x4xbf16> -> vector<16x16x36xbf16>
    %32 = vector.shape_cast %31 : vector<16x16x36xbf16> to vector<256x36xbf16>
    %c0_23 = arith.constant 0 : index
    %c0_24 = arith.constant 0 : index
    %33 = vector.load %arg4[%c0_23, %c0_24] : memref<36x8xbf16, #tpu.memory_space<vmem>>, vector<36x8xbf16>
    %cst = arith.constant dense<0.000000e+00> : vector<256x8xf32>
    %34 = tpu.matmul %32, %33, %cst {dimension_numbers = #tpu.dot_dimension_numbers<[1], [0], [0], [1], [0, 0, 1, 1], [], []>} : vector<256x36xbf16>, vector<36x8xbf16>, vector<256x8xf32> -> vector<256x8xf32>
    %35 = arith.truncf %34 : vector<256x8xf32> to vector<256x8xbf16>
    %c0_25 = arith.constant 0 : index
    %c0_26 = arith.constant 0 : index
    %36 = vector.load %arg5[%c0_25, %c0_26] : memref<256x8xbf16, #tpu.memory_space<vmem>>, vector<256x8xbf16>
    tpu.vector_store %arg5[%c0_25, %c0_26], %35 {strides = array<i32>} : memref<256x8xbf16, #tpu.memory_space<vmem>>, vector<256x8xbf16>,
    %c0_27 = arith.constant 0 : index
    %c0_28 = arith.constant 0 : index
    %c0_29 = arith.constant 0 : index
    %37 = vector.load %arg6[%c0_27, %c0_28, %c0_29] : memref<1x1x8xf32, #tpu.memory_space<vmem>>, vector<1x1x8xf32>
    %38 = vector.shape_cast %37 : vector<1x1x8xf32> to vector<1x8xf32>
    %cst_30 = arith.constant dense<0.000000e+00> : vector<8xf32>
    %39 = vector.multi_reduction <add>, %34, %cst_30 [0] : vector<256x8xf32> to vector<8xf32>
    %40 = vector.shape_cast %39 : vector<8xf32> to vector<1x8xf32>
    %41 = arith.addf %38, %40 : vector<1x8xf32>
    %c0_31 = arith.constant 0 : index
    %c0_32 = arith.constant 0 : index
    %c0_33 = arith.constant 0 : index
    %42 = vector.load %arg6[%c0_31, %c0_32, %c0_33] : memref<1x1x8xf32, #tpu.memory_space<vmem>>, vector<1x1x8xf32>
    %43 = vector.shape_cast %42 : vector<1x1x8xf32> to vector<1x8xf32>
    %44 = vector.shape_cast %41 : vector<1x8xf32> to vector<1x1x8xf32>
    tpu.vector_store %arg6[%c0_31, %c0_32, %c0_33], %44 {strides = array<i32>} : memref<1x1x8xf32, #tpu.memory_space<vmem>>, vector<1x1x8xf32>,
    %c0_34 = arith.constant 0 : index
    %c0_35 = arith.constant 0 : index
    %c0_36 = arith.constant 0 : index
    %45 = vector.load %arg7[%c0_34, %c0_35, %c0_36] : memref<1x1x8xf32, #tpu.memory_space<vmem>>, vector<1x1x8xf32>
    %46 = vector.shape_cast %45 : vector<1x1x8xf32> to vector<1x8xf32>
    %47 = arith.mulf %34, %34 : vector<256x8xf32>
    %cst_37 = arith.constant dense<0.000000e+00> : vector<8xf32>
    %48 = vector.multi_reduction <add>, %47, %cst_37 [0] : vector<256x8xf32> to vector<8xf32>
    %49 = vector.shape_cast %48 : vector<8xf32> to vector<1x8xf32>
    %50 = arith.addf %46, %49 : vector<1x8xf32>
    %c0_38 = arith.constant 0 : index
    %c0_39 = arith.constant 0 : index
    %c0_40 = arith.constant 0 : index
    %51 = vector.load %arg7[%c0_38, %c0_39, %c0_40] : memref<1x1x8xf32, #tpu.memory_space<vmem>>, vector<1x1x8xf32>
    %52 = vector.shape_cast %51 : vector<1x1x8xf32> to vector<1x8xf32>
    %53 = vector.shape_cast %50 : vector<1x8xf32> to vector<1x1x8xf32>
    tpu.vector_store %arg7[%c0_38, %c0_39, %c0_40], %53 {strides = array<i32>} : memref<1x1x8xf32, #tpu.memory_space<vmem>>, vector<1x1x8xf32>,
    return
  }
  func.func @transform_0(%arg0: i32, %arg1: i32, %arg2: i32) -> (i32, i32, i32, i32) {
    %c0_i32 = arith.constant 0 : i32
    %c0_i32_0 = arith.constant 0 : i32
    %c0_i32_1 = arith.constant 0 : i32
    %c0_i32_2 = arith.constant 0 : i32
    return %arg0, %c0_i32, %c0_i32_0, %c0_i32_1 : i32, i32, i32, i32
  }
  func.func @transform_1(%arg0: i32, %arg1: i32, %arg2: i32) -> (i32, i32) {
    %c0_i32 = arith.constant 0 : i32
    %c0_i32_0 = arith.constant 0 : i32
    return %c0_i32, %arg1 : i32, i32
  }
  func.func @transform_2(%arg0: i32, %arg1: i32, %arg2: i32) -> (i32, i32) {
    %c1_i32 = arith.constant 1 : i32
    %0 = arith.muli %arg0, %c1_i32 : i32
    %1 = arith.addi %0, %arg2 : i32
    %c0_i32 = arith.constant 0 : i32
    return %1, %arg1 : i32, i32
  }
  func.func @transform_3(%arg0: i32, %arg1: i32, %arg2: i32) -> (i32, i32, i32) {
    %c0_i32 = arith.constant 0 : i32
    %c0_i32_0 = arith.constant 0 : i32
    return %arg0, %c0_i32, %arg1 : i32, i32, i32
  }
  func.func @transform_4(%arg0: i32, %arg1: i32, %arg2: i32) -> (i32, i32, i32) {
    %c0_i32 = arith.constant 0 : i32
    %c0_i32_0 = arith.constant 0 : i32
    return %arg0, %c0_i32, %arg1 : i32, i32, i32
  }
}

</mosaic_0001>

<bundles_post_ra>
// kernel: tpu_custom_call.1
= control target key start
LH: loop header
LB: loop body
LE: loop exit
PB: predicated region body
PF: predicated region fallthrough
CT: control target
= control target key end

     0   :  { %10 = vsyncpa [#allocation4], 0  ;;  %s5919_s0 = inlined_call_operand.vmem [shape: bf16[2,16,16,4], index: 0, kind: input, shape index: {}]   ;;  %s5920_s1 = inlined_call_operand.vmem [shape: bf16[36,8], index: 1, kind: input, shape index: {}]   ;;  %s5921_s2 = inlined_call_operand.vmem [shape: bf16[512,8], index: 2, kind: output, shape index: {0}]   ;;  %s5922_s3 = inlined_call_operand.hbm [shape: f32[2,1,8], index: 3, kind: output, shape index: {1}]   ;;  %s5923_s4 = inlined_call_operand.hbm [shape: f32[2,1,8], index: 4, kind: output, shape index: {2}]  }
   0x1   :  { %12 = vsyncpa [#allocation4 + $0x1], 0 }
   0x2   :  { %13 = vsyncpa [#allocation6], 0 }
   0x3   :  { %15 = vsyncpa [#allocation6 + $0x1], 0  ;;  %s4338_s15 = smov 0   ;;  %s4340_s16 = smov 0  }
   0x4   :  { %s4342_s17 = smov 0   ;;  %s4344_s18 = smov 0  }
   0x5   :  { %s4346_s19 = smov 0   ;;  %s4348_s20 = smov 0  }
   0x6 LB: > { %s3538_s21 = sadd.s32 4294967295, %s4299_s20   ;;  %s3539_s22 = sadd.s32 4294967294, %s4299_s20   ;;  %s4299_s20 = sphi %s4348_s20, %s21_s20   ;;  %s4295_s19 = sphi %s4346_s19, %s5936_s19   ;;  %s4291_s18 = sphi %s4344_s18, %s5935_s18   ;;  %s4287_s17 = sphi %s4342_s17, %s5934_s17   ;;  %s4283_s16 = sphi %s4340_s16, %s5933_s16   ;;  %s4279_s15 = sphi %s4338_s15, %s5932_s15  }
   0x7   : > { %s40_s23 = sadd.s32 1, %s4295_s19  ;;  %s131_s24 = sadd.s32 1, %s4287_s17 }
   0x8   : > { %p42_p0 = scmp.ge.s32.totalorder %s40_s23, 2  ;;  %p141_p1 = scmp.ne.s32.totalorder %s4287_s17, %s4283_s16 }
   0x9   : > { %p142_p2 = scmp.eq.s32.totalorder %s3538_s21, 1  ;;  %p147_p3 = scmp.ne.s32.totalorder %s4283_s16, %s4279_s15 }
   0xa   : > { %s5938_s23 = smov (%p42_p0, %s40_s23), 0  ;;  %p148_p5 = scmp.eq.s32.totalorder %s3539_s22, 1 }
   0xb   : > { %p4378_p4 = por %p142_p2, %p141_p1  ;;  %s126_s26 = ssub.s32 %s4295_s19, %s5938_s23 }
   0xc   : > { %p3543_p6 = scmp.ge.s32.totalorder %s4299_s20, 1  ;;  %p129_p7 = scmp.eq.s32.totalorder %s126_s26, 0 }
   0xd   : > { %p4385_p8 = por %p148_p5, %p147_p3  ;;  %p209_p9 = scmp.lt.s32.totalorder %s4299_s20, 3 }
   0xe   : > { %s4391_s28 = scalar_select %p129_p7, %s4287_s17, %s131_s24  }
   0xf   : > { %p210_p10 = pnand %p3543_p6, %p209_p9 }
  0x10   : > { %vm276_vm0 = vcmask (!%p210_p10), 27648   ;;  %vm279_vm1 = vcmask (!%p210_p10), 24576   ;;  %v4301_v0 = vmov (!%p210_p10), 0   ;;  %p251_p11 = scmp.lt.s32.totalorder (!%p210_p10), %s4291_s18, 1  ;;  %vm1413_vm2 = vcmask (!%p210_p10), 1046528   ;;  %s4302_s8 = smov (!%p210_p10), 8  }
  0x11   : > { %213 = sbr.rel (%p210_p10) target bundleno = 699 (0x2bb), region = 28  ;;  %277 = vst.msk [vmem:[#allocation2] sm:$0xf] (!%p210_p10), %vm276_vm0, %v4301_v0  ;;  %278 = vst.msk [vmem:[#allocation2 + $0x4] sm:$0xf] (!%p210_p10), %vm276_vm0, %v4301_v0  ;;  %s4303_s9 = smov (!%p210_p10), 4  }
  0x12   : > { %280 = vst.msk [vmem:[#allocation2 + $0x8] sm:$0x1] (!%p210_p10), %vm279_vm1, %v4301_v0  ;;  %283 = vst.msk [vmem:[#allocation2 + $0x14] sm:$0x1] (!%p210_p10), %vm279_vm1, %v4301_v0  ;;  %vm364_vm3 = vsmask.f32 (!%p210_p10), 256 }
  0x13   : > { %281 = vst.msk [vmem:[#allocation2 + $0xc] sm:$0xf] (!%p210_p10), %vm276_vm0, %v4301_v0  ;;  %282 = vst.msk [vmem:[#allocation2 + $0x10] sm:$0xf] (!%p210_p10), %vm276_vm0, %v4301_v0  ;;  %vm365_vm4 = vsmask.f32 (!%p210_p10), 4368 }
  0x14   : > { %284 = vst.msk [vmem:[#allocation2 + $0x18] sm:$0xf] (!%p210_p10), %vm276_vm0, %v4301_v0  ;;  %285 = vst.msk [vmem:[#allocation2 + $0x1c] sm:$0xf] (!%p210_p10), %vm276_vm0, %v4301_v0  ;;  %vm689_vm5 = vsmask.f32 (!%p210_p10), 7938 }
  0x15   : > { %286 = vst.msk [vmem:[#allocation2 + $0x20] sm:$0x1] (!%p210_p10), %vm279_vm1, %v4301_v0  ;;  %289 = vst.msk [vmem:[#allocation2 + $0x2c] sm:$0x1] (!%p210_p10), %vm279_vm1, %v4301_v0  ;;  %vm1140_vm6 = vsmask.f32 (!%p210_p10), 7424 }
  0x16   : > { %287 = vst.msk [vmem:[#allocation2 + $0x24] sm:$0xf] (!%p210_p10), %vm276_vm0, %v4301_v0  ;;  %288 = vst.msk [vmem:[#allocation2 + $0x28] sm:$0xf] (!%p210_p10), %vm276_vm0, %v4301_v0  ;;  %s4304_s10 = smov (!%p210_p10), 12   ;;  %s4305_s11 = smov (!%p210_p10), 24  }
  0x17   : > { %290 = vst.msk [vmem:[#allocation2 + $0x30] sm:$0xf] (!%p210_p10), %vm276_vm0, %v4301_v0  ;;  %291 = vst.msk [vmem:[#allocation2 + $0x34] sm:$0xf] (!%p210_p10), %vm276_vm0, %v4301_v0  ;;  %s4306_s22 = smov (!%p210_p10), 20   ;;  %s4307_s24 = smov (!%p210_p10), 32  }
  0x18   : > { %292 = vst.msk [vmem:[#allocation2 + $0x38] sm:$0x1] %vm279_vm1, %v4301_v0  ;;  %295 = vst.msk [vmem:[#allocation2 + $0x44] sm:$0x1] %vm279_vm1, %v4301_v0  ;;  %s252_s29 = scalar_select %p251_p11, %s4291_s18, 1  ;;  %vm2835_vm10 = vcmask 1041408  }
  0x19   : > { %293 = vst.msk [vmem:[#allocation2 + $0x3c] sm:$0xf] %vm276_vm0, %v4301_v0  ;;  %294 = vst.msk [vmem:[#allocation2 + $0x40] sm:$0xf] %vm276_vm0, %v4301_v0  ;;  %v813_v4 = vld [vmem:[#allocation2 + $0x4] sm:$0xf] }
  0x1a   : > { %296 = vst.msk [vmem:[#allocation2 + $0x48] sm:$0xf] %vm276_vm0, %v4301_v0  ;;  %297 = vst.msk [vmem:[#allocation2 + $0x4c] sm:$0xf] %vm276_vm0, %v4301_v0  ;;  %s3875_s30 = sshll.u32 %s252_s29, 7  ;;  %s4308_s26 = smov 16  }
  0x1b   : > { %298 = vst.msk [vmem:[#allocation2 + $0x50] sm:$0x1] %vm279_vm1, %v4301_v0  ;;  %301 = vst.msk [vmem:[#allocation2 + $0x5c] sm:$0x1] %vm279_vm1, %v4301_v0  ;;  %s4452_s7 = scalar_lea.vmem %s5919_s0, %s3875_s30  ;;  %v860_v5 = vld [vmem:[#allocation2] sm:$0xe] }
  0x1c   : > { %299 = vst.msk [vmem:[#allocation2 + $0x54] sm:$0xf] %vm276_vm0, %v4301_v0  ;;  %300 = vst.msk [vmem:[#allocation2 + $0x58] sm:$0xf] %vm276_vm0, %v4301_v0  ;;  %v334_v1 = vld [vmem:[%s4452_s7 + $0x8] sm:$0xf]  ;;  %v3708_v7 = vcombine.low %v860_v5, %v813_v4 }
  0x1d   : > { %302 = vst.msk [vmem:[#allocation2 + $0x60] sm:$0xf] %vm276_vm0, %v4301_v0  ;;  %303 = vst.msk [vmem:[#allocation2 + $0x64] sm:$0xf] %vm276_vm0, %v4301_v0  ;;  %v335_v2 = vld [vmem:[%s4452_s7 + $0xc] sm:$0xf] }
  0x1e   : > { %304 = vst.msk [vmem:[#allocation2 + $0x68] sm:$0x1] %vm279_vm1, %v4301_v0  ;;  %307 = vst.msk [vmem:[#allocation2 + $0x74] sm:$0x1] %vm279_vm1, %v4301_v0  ;;  %v332_v3 = vld [vmem:[%s4452_s7] sm:$0xf] }
  0x1f   : > { %305 = vst.msk [vmem:[#allocation2 + $0x6c] sm:$0xf] %vm276_vm0, %v4301_v0  ;;  %306 = vst.msk [vmem:[#allocation2 + $0x70] sm:$0xf] %vm276_vm0, %v4301_v0  ;;  %v812_v8 = vld [vmem:[#allocation2] sm:$0xf] }
  0x20   : > { %308 = vst.msk [vmem:[#allocation2 + $0x78] sm:$0xf] %vm276_vm0, %v4301_v0  ;;  %309 = vst.msk [vmem:[#allocation2 + $0x7c] sm:$0xf] %vm276_vm0, %v4301_v0  ;;  %v385_v9 = vshrl.u32 %v334_v1, 16  ;;  %v4457_v10 = vcombine.low %v812_v8, %v813_v4  ;;  %v388_v11 = vshll.u32 %v334_v1, 16 }
  0x21   : > { %310 = vst.msk [vmem:[#allocation2 + $0x80] sm:$0x1] %vm279_vm1, %v4301_v0  ;;  %313 = vst.msk [vmem:[#allocation2 + $0x8c] sm:$0x1] %vm279_vm1, %v4301_v0  ;;  %v393_v12 = vshrl.u32 %v335_v2, 16  ;;  %v396_v13 = vshll.u32 %v335_v2, 16 }
  0x22   : > { %311 = vst.msk [vmem:[#allocation2 + $0x84] sm:$0xf] %vm276_vm0, %v4301_v0  ;;  %312 = vst.msk [vmem:[#allocation2 + $0x88] sm:$0xf] %vm276_vm0, %v4301_v0  ;;  %v1414_v14 = vrot.slane %v3708_v7, 1  ;;  %v387_v17 = vrot.slane %v385_v9, 7 }
  0x23   : > { %314 = vst.msk [vmem:[#allocation2 + $0x90] sm:$0xf] %vm276_vm0, %v4301_v0  ;;  %315 = vst.msk [vmem:[#allocation2 + $0x94] sm:$0xf] %vm276_vm0, %v4301_v0  ;;  %v700_v18 = vld [vmem:[#allocation2 + $0x18] sm:$0xf] }
  0x24   : > { %316 = vst.msk [vmem:[#allocation2 + $0x98] sm:$0x1] %vm279_vm1, %v4301_v0  ;;  %319 = vst.msk [vmem:[#allocation2 + $0xa4] sm:$0x1] %vm279_vm1, %v4301_v0  ;;  %v1142_v19 = vshrl.u32 %v4457_v10, 16  ;;  %v1144_v20 = vshll.u32 %v4457_v10, 16  ;;  %v390_v28 = vor.u32 %v388_v11, %v387_v17 }
  0x25   : > { %317 = vst.msk [vmem:[#allocation2 + $0x9c] sm:$0xf] %vm276_vm0, %v4301_v0  ;;  %318 = vst.msk [vmem:[#allocation2 + $0xa0] sm:$0xf] %vm276_vm0, %v4301_v0  ;;  %v395_v21 = vrot.slane %v393_v12, 7  ;;  %v368_v24 = vshrl.u32 %v332_v3, 16 }
  0x26   : > { %320 = vst.msk [vmem:[#allocation2 + $0xa8] sm:$0xf] %vm276_vm0, %v4301_v0  ;;  %321 = vst.msk [vmem:[#allocation2 + $0xac] sm:$0xf] %vm276_vm0, %v4301_v0  ;;  %v333_v23 = vld [vmem:[%s4452_s7 + $0x4] sm:$0xf] }
  0x27   : > { %322 = vst.msk [vmem:[#allocation2 + $0xb0] sm:$0x1] %vm279_vm1, %v4301_v0  ;;  %325 = vst.msk [vmem:[#allocation2 + $0xbc] sm:$0x1] %vm279_vm1, %v4301_v0  ;;  %v391_v29 = vrot.slane %v387_v17, 4  ;;  %v1146_v31 = vrot.slane %v1144_v20, 1  ;;  %v398_v32 = vor.u32 %v396_v13, %v395_v21 }
  0x28   : > { %323 = vst.msk [vmem:[#allocation2 + $0xb4] sm:$0xf] %vm276_vm0, %v4301_v0  ;;  %324 = vst.msk [vmem:[#allocation2 + $0xb8] sm:$0xf] %vm276_vm0, %v4301_v0  ;;  %v336_v30 = vld [vmem:[%s4452_s7 + $0x10] sm:$0xf] }
  0x29   : > { %326 = vst.msk [vmem:[#allocation2 + $0xc0] sm:$0xf] %vm276_vm0, %v4301_v0  ;;  %327 = vst.msk [vmem:[#allocation2 + $0xc4] sm:$0xf] %vm276_vm0, %v4301_v0  ;;  %v370_v33 = vrot.slane %v368_v24, 7  ;;  %v371_v34 = vshll.u32 %v332_v3, 16  ;;  %v1147_v41 = vor.u32 %v1146_v31, %v1142_v19 }
  0x2a   : > { %328 = vst.msk [vmem:[#allocation2 + $0xc8] sm:$0x1] %vm279_vm1, %v4301_v0  ;;  %331 = vst.msk [vmem:[#allocation2 + $0xd4] sm:$0x1] %vm279_vm1, %v4301_v0  ;;  %v337_v35 = vld [vmem:[%s4452_s7 + $0x14] sm:$0xf] }
  0x2b   : > { %329 = vst.msk [vmem:[#allocation2 + $0xcc] sm:$0xf] %vm276_vm0, %v4301_v0  ;;  %330 = vst.msk [vmem:[#allocation2 + $0xd0] sm:$0xf] %vm276_vm0, %v4301_v0  ;;  %v376_v37 = vshrl.u32 %v333_v23, 16  ;;  %v379_v38 = vshll.u32 %v333_v23, 16  ;;  %v373_v43 = vor.u32 %v371_v34, %v370_v33 }
  0x2c   : > { %v4043_v6 = vld [vmem:[#allocation2 + $0x8] ss:$0 sps:$4 sm:$0x11]   ;;  %vm4463_vm7 = vmand %vm276_vm0, %vm689_vm5  ;;  %v691_v39 = vld [vmem:[#allocation2 + $0xc] sm:$0xf]  ;;  %v402_v40 = vshrl.u32 %v336_v30, 16 }
  0x2d   : > { %v1415_v15 = vrot.slane %v4043_v6, 1  ;;  %v1149_v16 = vshll.u32 %v4043_v6, 16  ;;  %vm4471_vm8 = vmor %vm364_vm3, %vm365_vm4  ;;  %v701_v36 = vsel %vm4463_vm7, %v390_v28, %v700_v18  ;;  %v374_v44 = vrot.slane %v370_v33, 4  ;;  %v704_v45 = vld [vmem:[#allocation2 + $0x20] sm:$0x1]  ;;  %s4309_s29 = smov 28  }
  0x2e   : > { %v399_v42 = vsel %vm4471_vm8, %v391_v29, %v398_v32  ;;  %702 = vst [vmem:[#allocation2 + $0x18] sm:$0xf] %v701_v36  ;;  %v378_v46 = vrot.slane %v376_v37, 7  ;;  %v404_v47 = vrot.slane %v402_v40, 7  ;;  %v405_v48 = vshll.u32 %v336_v30, 16  ;;  %vm4490_vm9 = vmand %vm279_vm1, %vm364_vm3  ;;  %s3546_s6 = sshll.u32 %s4291_s18, 5 }
  0x2f   : > { %v1416_v25 = vsel %vm1413_vm2, %v1414_v14, %v1415_v15  ;;  %v1151_v26 = vrot.slane %v1149_v16, 1  ;;  %703 = vst.msk [vmem:[#allocation2 + $0x1c] sm:$0xf] %vm276_vm0, %v399_v42  ;;  %v410_v49 = vshrl.u32 %v337_v35, 16  ;;  %v338_v50 = vld [vmem:[%s4452_s7 + $0x18] sm:$0xf]  ;;  %v692_v52 = vsel %vm4463_vm7, %v373_v43, %v691_v39 }
  0x30   : > { %1462 = vrot.lane.b32.xlu1 %v1416_v25, %s4302_s8  ;;  %v413_v53 = vshll.u32 %v337_v35, 16  ;;  %v707_v54 = vld [vmem:[#allocation2 + $0x24] sm:$0xf]  ;;  %v400_v55 = vrot.slane %v395_v21, 4  ;;  %v381_v57 = vor.u32 %v379_v38, %v378_v46  ;;  %693 = vst [vmem:[#allocation2 + $0xc] sm:$0xf] %v692_v52  ;;  %v407_v58 = vor.u32 %v405_v48, %v404_v47 }
  0x31   : > { %v1152_v51 = vsel %vm1140_vm6, %v1147_v41, %v1151_v26  ;;  %v408_v59 = vrot.slane %v404_v47, 4  ;;  %v412_v60 = vrot.slane %v410_v49, 7  ;;  %v697_v61 = vld [vmem:[#allocation2 + $0x14] sm:$0x1]  ;;  %v383_v62 = vrot.slane %v378_v46, 4  ;;  %p262_p12 = scmp.lt.s32.totalorder %s3546_s6, 63 }
  0x32   : > { %1333 = vrot.lane.b32.xlu0 %v1152_v51, %s4303_s9  ;;  %v705_v63 = vsel %vm4490_vm9, %v400_v55, %v704_v45  ;;  %v711_v0 = vld [vmem:[#allocation2 + $0x2c] sm:$0x1]  ;;  %v419_v1 = vshrl.u32 %v338_v50, 16  ;;  %v422_v2 = vshll.u32 %v338_v50, 16  ;;  %v382_v3 = vsel %vm4471_vm8, %v374_v44, %v381_v57  ;;  %v714_v9 = vld [vmem:[#allocation2 + $0x30] sm:$0xf] }
  0x33   : > { %v415_v4 = vor.u32 %v413_v53, %v412_v60  ;;  %v708_v5 = vsel %vm4463_vm7, %v407_v58, %v707_v54  ;;  %706 = vst [vmem:[#allocation2 + $0x20] sm:$0x1] %v705_v63  ;;  %v417_v6 = vrot.slane %v412_v60, 4  ;;  %694 = vst.msk [vmem:[#allocation2 + $0x10] sm:$0xf] %vm276_vm0, %v382_v3  ;;  %v698_v7 = vsel %vm4490_vm9, %v383_v62, %v697_v61  ;;  %s5940_s6 = smov (!%p262_p12, %s3546_s6), 63 }
  0x34   : > { %709 = vst [vmem:[#allocation2 + $0x24] sm:$0xf] %v708_v5  ;;  %v4503_v8 = vrot.slane %v419_v1, 7  ;;  %699 = vst [vmem:[#allocation2 + $0x14] sm:$0x1] %v698_v7  ;;  %vm2518_vm11 = vcmask 31744  }
  0x35   : > { %v3550_v11 = vld [vmem:[#allocation2 + $0x18] sm:$0xf]  ;;  %v416_v13 = vsel %vm4471_vm8, %v408_v59, %v415_v4  ;;  %v712_v15 = vsel %vm4490_vm9, %v417_v6, %v711_v0  ;;  %v4121_v4 = vld [vmem:[%s5920_s1] sm:$0xff]   ;;  %vm2551_vm12 = vcmask 64512   ;;  %vm2584_vm13 = vcmask 97280   ;;  %s3871_s14 = sshll.u32 %s4291_s18, 4 }
  0x36   : > { %v3597_v12 = vld [vmem:[#allocation2 + $0x18] sm:$0xe]  ;;  %v3551_v16 = vld [vmem:[#allocation2 + $0x1c] sm:$0xf]  ;;  %710 = vst.msk [vmem:[#allocation2 + $0x28] sm:$0xf] %vm276_vm0, %v416_v13  ;;  %v424_v18 = vor.u32 %v422_v2, %v4503_v8  ;;  %3927 = vmatprep.subr.bf16.mxu0 %v4121_v4  ;;  %3965 = vmatprep.subr.bf16.mxu1 %v4121_v4  ;;  %s5847_s5 = scalar_lea.hbm %s5923_s4, %s3871_s14 }
  0x37   : > { %v3612_v14 = vld [vmem:[#allocation2 + $0x18] sm:$0xf]  ;;  %v3613_v17 = vld [vmem:[#allocation2 + $0x1c] sm:$0xf]  ;;  %713 = vst [vmem:[#allocation2 + $0x2c] sm:$0x1] %v712_v15  ;;  %v3725_v19 = vcombine.low %v3550_v11, %v3551_v16  ;;  %v3757_v20 = vcombine.low %v3597_v12, %v3551_v16  ;;  %3928 = vmatpush3.bf16.msra.mxu0 %v4121_v4  ;;  %3968 = vmatpush3.bf16.msra.mxu1 %v4121_v4 }
  0x38   : > { %v4511_v21 = vcombine.low %v3612_v14, %v3613_v17  ;;  %v715_v23 = vsel %vm4463_vm7, %v424_v18, %v714_v9  ;;  %v3548_v24 = vld [vmem:[#allocation2 + $0xc] sm:$0xf]  ;;  %v3660_v26 = vld [vmem:[#allocation2 + $0x18] sm:$0xe]  ;;  %v4523_v40 = vld [vmem:[#allocation2 + $0x1c] sm:$0xf] }
  0x39   : > { %1576 = vrot.lane.b32.xlu1 %v3725_v19, %s4304_s10  ;;  %v3596_v25 = vld [vmem:[#allocation2 + $0xc] sm:$0xe]  ;;  %716 = vst [vmem:[#allocation2 + $0x30] sm:$0xf] %v715_v23  ;;  %v1669_v28 = vshll.u32 %v3725_v19, 16  ;;  %v1929_v38 = vrot.slane %v3757_v20, 1  ;;  %v3804_v42 = vcombine.low %v3660_v26, %v3613_v17 }
  0x3a   : > { %v2169_v29 = vshll.u32 %v4511_v21, 16  ;;  %v861_v30 = vld [vmem:[#allocation2 + $0xc] sm:$0xe]  ;;  %v3549_v31 = vld [vmem:[#allocation2 + $0x10] sm:$0xf]  ;;  %v1667_v48 = vshrl.u32 %v3725_v19, 16 }
  0x3b   : > { %v3614_v32 = vld [vmem:[#allocation2 + $0x24] sm:$0xf]  ;;  %v814_v33 = vld [vmem:[#allocation2 + $0xc] sm:$0xf]  ;;  %v4517_v34 = vcombine.low %v3548_v24, %v3549_v31  ;;  %v3756_v35 = vcombine.low %v3596_v25, %v3549_v31  ;;  %v816_v39 = vld [vmem:[#allocation2 + $0x18] sm:$0xf] }
  0x3c   : > { %v4519_v36 = vld [vmem:[#allocation2 + $0x14] ss:$0 sps:$4 sm:$0x11]   ;;  %v4521_v37 = vld [vmem:[#allocation2 + $0x20] ss:$0 sps:$4 sm:$0x11]   ;;  %v4544_v63 = vcombine.low %v816_v39, %v4523_v40 }
  0x3d   : > { %v4525_v41 = vld [vmem:[#allocation2 + $0x28] sm:$0xf]  ;;  %v815_v43 = vld [vmem:[#allocation2 + $0x10] sm:$0xf]  ;;  %1574 = vrot.lane.b32.xlu0 %v4517_v34, %s4304_s10  ;;  %v1657_v44 = vshll.u32 %v4517_v34, 16  ;;  %v1926_v46 = vrot.slane %v3756_v35, 1 }
  0x3e   : > { %v4531_v45 = vcombine.low %v3614_v32, %v4525_v41  ;;  %v4055_v47 = vld [vmem:[#allocation2 + $0x14] ss:$0 sps:$4 sm:$0x11]   ;;  %v1927_v49 = vrot.slane %v4519_v36, 1  ;;  %v3709_v50 = vcombine.low %v861_v30, %v815_v43  ;;  %v4534_v51 = vcombine.low %v814_v33, %v815_v43  ;;  %v4539_v58 = vld [vmem:[#allocation2 + $0x24] sm:$0xe] }
  0x3f   : > { %v4059_v52 = vld [vmem:[#allocation2 + $0x20] ss:$0 sps:$4 sm:$0x11]   ;;  %v1418_v54 = vrot.slane %v4055_v47, 1  ;;  %v1671_v55 = vrot.slane %v1669_v28, 1  ;;  %v1161_v57 = vshll.u32 %v4055_v47, 16  ;;  %v3805_v25 = vcombine.low %v4539_v58, %v4525_v41 }
  0x40   : > { %v2181_v53 = vshll.u32 %v4531_v45, 16  ;;  %2088 = vrot.lane.b32.xlu1 %v4531_v45, %s4305_s11  ;;  %v1417_v59 = vrot.slane %v3709_v50, 1  ;;  %v1930_v60 = vrot.slane %v4059_v52, 1  ;;  %v1674_v61 = vshll.u32 %v4059_v52, 16  ;;  %v4562_v16 = vld [vmem:[%s4452_s7 + $0x1c] sm:$0xf] }
  0x41   : > { %v4541_v62 = vld [vmem:[#allocation2 + $0x2c] ss:$0 sps:$4 sm:$0x11]   ;;  %2086 = vrot.lane.b32.xlu0 %v4511_v21, %s4305_s11  ;;  %v1928_v0 = vsel %vm1413_vm2, %v1926_v46, %v1927_v49  ;;  %v2438_v1 = vrot.slane %v3804_v42, 1  ;;  %v2439_v2 = vrot.slane %v4521_v37, 1  ;;  %v1156_v3 = vshll.u32 %v4534_v51, 16 }
  0x42   : > { %v1419_v5 = vsel %vm1413_vm2, %v1417_v59, %v1418_v54  ;;  %v1672_v6 = vor.u32 %v1671_v55, %v1667_v48  ;;  %v1154_v7 = vshrl.u32 %v4534_v51, 16  ;;  %v1163_v9 = vrot.slane %v1161_v57, 1  ;;  %v4556_v11 = vld [vmem:[#allocation2 + $0x20] ss:$0 sps:$4 sm:$0x11]   ;;  %v4126_v24 = vld [vmem:[%s5920_s1 + $0x8] sm:$0xff]  }
  0x43   : > { %v1158_v12 = vrot.slane %v1156_v3, 1  ;;  %v2179_v13 = vshrl.u32 %v4531_v45, 16  ;;  %v2183_v14 = vrot.slane %v2181_v53, 1  ;;  %v2186_v15 = vshll.u32 %v4541_v62, 16  ;;  %v818_v23 = vld [vmem:[#allocation2 + $0x24] sm:$0xf]  ;;  %3929 = vmatprep.subr.bf16.mxu0 %v4126_v24  ;;  %3966 = vmatprep.subr.bf16.mxu1 %v4126_v24 }
  0x44   : > { %1464 = vrot.lane.b32.xlu1 %v1419_v5, %s4302_s8  ;;  %v1931_v17 = vsel %vm1413_vm2, %v1929_v38, %v1930_v60  ;;  %v1676_v18 = vrot.slane %v1674_v61, 1  ;;  %v1655_v19 = vshrl.u32 %v4517_v34, 16  ;;  %v1659_v20 = vrot.slane %v1657_v44, 1  ;;  %v4575_v31 = vld [vmem:[#allocation2 + $0x28] sm:$0xf]  ;;  %3930 = vmatpush3.bf16.msra.mxu0 %v4126_v24 }
  0x45   : > { %1974 = vrot.lane.b32.xlu0 %v1928_v0, %s4306_s22  ;;  %v2440_v26 = vsel %vm1413_vm2, %v2438_v1, %v2439_v2  ;;  %v1662_v28 = vshll.u32 %v4519_v36, 16  ;;  %v1168_v30 = vshll.u32 %v4544_v63, 16  ;;  %v1159_v32 = vor.u32 %v1158_v12, %v1154_v7  ;;  %v862_v38 = vld [vmem:[#allocation2 + $0x18] sm:$0xe]  ;;  %3969 = vmatpush3.bf16.msra.mxu1 %v4126_v24  ;;  %v863_v54 = vld [vmem:[#allocation2 + $0x24] sm:$0xe] }
  0x46   : > { %v2188_v33 = vrot.slane %v2186_v15, 1  ;;  %v1166_v34 = vshrl.u32 %v4544_v63, 16  ;;  %v1173_v35 = vshll.u32 %v4556_v11, 16  ;;  %v2184_v39 = vor.u32 %v2183_v14, %v2179_v13  ;;  %v4583_v43 = vld [vmem:[#allocation2 + $0x2c] ss:$0 sps:$4 sm:$0x11]  }
  0x47   : > { %v1170_v41 = vrot.slane %v1168_v30, 1  ;;  %v2167_v36 = vshrl.u32 %v4511_v21, 16  ;;  %v2171_v42 = vrot.slane %v2169_v29, 1  ;;  %v1677_v44 = vsel %vm1140_vm6, %v1672_v6, %v1676_v18  ;;  %v718_v4 = vld [vmem:[#allocation2 + $0x38] sm:$0x1] }
  0x48   : > { %1976 = vrot.lane.b32.xlu1 %v1931_v17, %s4306_s22  ;;  %v2174_v45 = vshll.u32 %v4521_v37, 16  ;;  %v4588_v46 = vcombine.low %v818_v23, %v4575_v31  ;;  %v427_v47 = vshrl.u32 %v4562_v16, 16  ;;  %v1660_v48 = vor.u32 %v1659_v20, %v1655_v19  ;;  %v340_v5 = vld [vmem:[%s4452_s7 + $0x20] sm:$0xf]  ;;  %v4607_v12 = vld [vmem:[#allocation2 + $0x28] sm:$0xf] }
  0x49   : > { %2486 = vrot.lane.b32.xlu0 %v2440_v26, %s4307_s24  ;;  %v1664_v49 = vrot.slane %v1662_v28, 1  ;;  %v3710_v21 = vcombine.low %v862_v38, %v4523_v40  ;;  %v430_v29 = vshll.u32 %v4562_v16, 16  ;;  %v1164_v50 = vsel %vm1140_vm6, %v1159_v32, %v1163_v9  ;;  %v3552_v9 = vld [vmem:[#allocation2 + $0x24] sm:$0xf]  ;;  %v342_v23 = vld [vmem:[%s4452_s7 + $0x28] sm:$0xf] }
  0x4a   : > { %v1171_v52 = vor.u32 %v1170_v41, %v1166_v34  ;;  %v1175_v37 = vrot.slane %v1173_v35, 1  ;;  %v1180_v53 = vshll.u32 %v4588_v46, 16  ;;  %v2189_v55 = vsel %vm1140_vm6, %v2184_v39, %v2188_v33  ;;  %v341_v13 = vld [vmem:[%s4452_s7 + $0x24] sm:$0xf]  ;;  %v343_v30 = vld [vmem:[%s4452_s7 + $0x2c] sm:$0xf] }
  0x4b   : > { %v2172_v57 = vor.u32 %v2171_v42, %v2167_v36  ;;  %v1185_v58 = vshll.u32 %v4583_v43, 16  ;;  %v2441_v40 = vrot.slane %v3805_v25, 1  ;;  %v2176_v59 = vrot.slane %v2174_v45, 1  ;;  %v4612_v16 = vld [vmem:[#allocation2 + $0x2c] ss:$0 sps:$4 sm:$0x11]  }
  0x4c   : > { %1848 = vrot.lane.b32.xlu1 %v1677_v44, %s4308_s26  ;;  %v1178_v60 = vshrl.u32 %v4588_v46, 16  ;;  %v1182_v61 = vrot.slane %v1180_v53, 1  ;;  %v2442_v0 = vrot.slane %v4541_v62, 1  ;;  %v3711_v1 = vcombine.low %v863_v54, %v4575_v31  ;;  %v344_v35 = vld [vmem:[%s4452_s7 + $0x30] sm:$0xf] }
  0x4d   : > { %1335 = vrot.lane.b32.xlu0 %v1164_v50, %s4303_s9  ;;  %v425_v2 = vrot.slane %v4503_v8, 4  ;;  %v429_v3 = vrot.slane %v427_v47, 7  ;;  %v1665_v6 = vsel %vm1140_vm6, %v1660_v48, %v1664_v49  ;;  %v1176_v7 = vsel %vm1140_vm6, %v1171_v52, %v1175_v37  ;;  %v721_v47 = vld [vmem:[#allocation2 + $0x3c] sm:$0xf]  ;;  %v725_v53 = vld [vmem:[#allocation2 + $0x44] sm:$0x1] }
  0x4e   : > { %v1187_v62 = vrot.slane %v1185_v58, 1  ;;  %v1424_v14 = vrot.slane %v4583_v43, 1  ;;  %v2177_v17 = vsel %vm1140_vm6, %v2172_v57, %v2176_v59  ;;  %v1183_v18 = vor.u32 %v1182_v61, %v1178_v60  ;;  %v728_v54 = vld [vmem:[#allocation2 + $0x48] sm:$0xf]  ;;  %v3599_v60 = vld [vmem:[#allocation2 + $0x30] sm:$0xe] }
  0x4f   : > { %v432_v8 = vor.u32 %v430_v29, %v429_v3  ;;  %v434_v15 = vrot.slane %v429_v3, 4  ;;  %v2443_v19 = vsel %vm1413_vm2, %v2441_v40, %v2442_v0  ;;  %v1420_v20 = vrot.slane %v3710_v21, 1  ;;  %v3598_v61 = vld [vmem:[#allocation2 + $0x24] sm:$0xe] }
  0x50   : > { %2360 = vrot.lane.b32.xlu1 %v2189_v55, %s4309_s29  ;;  %v1423_v24 = vrot.slane %v3711_v1, 1  ;;  %v1421_v25 = vrot.slane %v4556_v11, 1  ;;  %v4626_v31 = vcombine.low %v3552_v9, %v4607_v12  ;;  %v436_v32 = vshrl.u32 %v340_v5, 16  ;;  %v3554_v55 = vld [vmem:[#allocation2 + $0x30] sm:$0xf] }
  0x51   : > { %1846 = vrot.lane.b32.xlu0 %v1665_v6, %s4308_s26  ;;  %v433_v26 = vsel %vm4471_vm8, %v425_v2, %v432_v8  ;;  %v719_v28 = vsel %vm4490_vm9, %v434_v15, %v718_v4  ;;  %v439_v33 = vshll.u32 %v340_v5, 16  ;;  %v444_v34 = vshrl.u32 %v341_v13, 16  ;;  %v3616_v6 = vld [vmem:[#allocation2 + $0x30] sm:$0xf] }
  0x52   : > { %717 = vst.msk [vmem:[#allocation2 + $0x34] sm:$0xf] %vm276_vm0, %v433_v26  ;;  %720 = vst [vmem:[#allocation2 + $0x38] sm:$0x1] %v719_v28  ;;  %v1686_v11 = vshll.u32 %v4612_v16, 16  ;;  %v447_v38 = vshll.u32 %v341_v13, 16  ;;  %v1188_v36 = vsel %vm1140_vm6, %v1183_v18, %v1187_v62  ;;  %v1425_v45 = vsel %vm1413_vm2, %v1423_v24, %v1424_v14 }
  0x53   : > { %v453_v39 = vshrl.u32 %v342_v23, 16  ;;  %v456_v41 = vshll.u32 %v342_v23, 16  ;;  %v438_v42 = vrot.slane %v436_v32, 7  ;;  %v446_v43 = vrot.slane %v444_v34, 7  ;;  %v732_v34 = vld [vmem:[#allocation2 + $0x50] sm:$0x1] }
  0x54   : > { %1337 = vrot.lane.b32.xlu1 %v1176_v7, %s4303_s9  ;;  %v461_v44 = vshrl.u32 %v343_v30, 16  ;;  %v464_v49 = vshll.u32 %v343_v30, 16  ;;  %v470_v21 = vshrl.u32 %v344_v35, 16  ;;  %v1681_v29 = vshll.u32 %v4626_v31, 16 }
  0x55   : > { %2358 = vrot.lane.b32.xlu0 %v2177_v17, %s4309_s29  ;;  %v455_v48 = vrot.slane %v453_v39, 7  ;;  %v441_v50 = vor.u32 %v439_v33, %v438_v42  ;;  %v442_v52 = vrot.slane %v438_v42, 4  ;;  %v449_v37 = vor.u32 %v447_v38, %v446_v43  ;;  %v820_v17 = vld [vmem:[#allocation2 + $0x30] sm:$0xf] }
  0x56   : > { %v451_v57 = vrot.slane %v446_v43, 4  ;;  %v463_v59 = vrot.slane %v461_v44, 7  ;;  %v4640_v2 = vrot.slane %v470_v21, 7  ;;  %v473_v3 = vshll.u32 %v344_v35, 16  ;;  %v735_v35 = vld [vmem:[#allocation2 + $0x54] sm:$0xf] }
  0x57   : > { %v458_v58 = vor.u32 %v456_v41, %v455_v48  ;;  %v459_v40 = vrot.slane %v455_v48, 4  ;;  %v450_v0 = vsel %vm4471_vm8, %v442_v52, %v449_v37  ;;  %v722_v1 = vsel %vm4463_vm7, %v441_v50, %v721_v47 }
  0x58   : > { %1339 = vrot.lane.b32.xlu1 %v1188_v36, %s4303_s9  ;;  %v1679_v5 = vshrl.u32 %v4626_v31, 16  ;;  %723 = vst [vmem:[#allocation2 + $0x3c] sm:$0xf] %v722_v1  ;;  %724 = vst.msk [vmem:[#allocation2 + $0x40] sm:$0xf] %vm276_vm0, %v450_v0  ;;  %v726_v7 = vsel %vm4490_vm9, %v451_v57, %v725_v53  ;;  %v466_v9 = vor.u32 %v464_v49, %v463_v59  ;;  %v1683_v15 = vrot.slane %v1681_v29, 1 }
  0x59   : > { %2488 = vrot.lane.b32.xlu0 %v2443_v19, %s4307_s24  ;;  %v3555_v4 = vld [vmem:[#allocation2 + $0x34] sm:$0xf]  ;;  %v729_v13 = vsel %vm4463_vm7, %v458_v58, %v728_v54  ;;  %v1422_v62 = vsel %vm1413_vm2, %v1420_v20, %v1421_v25  ;;  %v4071_v8 = vld [vmem:[#allocation2 + $0x38] ss:$0 sps:$4 sm:$0x11]   ;;  %v468_v26 = vrot.slane %v463_v59, 4  ;;  %v475_v25 = vor.u32 %v473_v3, %v4640_v2 }
  0x5a   : > { %v3727_v14 = vcombine.low %v3554_v55, %v3555_v4  ;;  %727 = vst [vmem:[#allocation2 + $0x44] sm:$0x1] %v726_v7  ;;  %730 = vst [vmem:[#allocation2 + $0x48] sm:$0xf] %v729_v13  ;;  %v3759_v18 = vcombine.low %v3599_v60, %v3555_v4  ;;  %v4651_v19 = vld [vmem:[#allocation2 + $0x34] sm:$0xf]  ;;  %v467_v24 = vsel %vm4471_vm8, %v459_v40, %v466_v9 }
  0x5b   : > { %v4653_v23 = vld [vmem:[#allocation2 + $0x34] sm:$0xf]  ;;  %v1698_v20 = vshll.u32 %v4071_v8, 16  ;;  %731 = vst.msk [vmem:[#allocation2 + $0x4c] sm:$0xf] %vm276_vm0, %v467_v24  ;;  %v3758_v32 = vcombine.low %v3598_v61, %v4607_v12  ;;  %v1688_v33 = vrot.slane %v1686_v11, 1  ;;  %v1684_v41 = vor.u32 %v1683_v15, %v1679_v5 }
  0x5c   : > { %1468 = vrot.lane.b32.xlu1 %v1425_v45, %s4302_s8  ;;  %v1693_v28 = vshll.u32 %v3727_v14, 16  ;;  %v1691_v30 = vshrl.u32 %v3727_v14, 16  ;;  %v3774_v36 = vcombine.low %v3616_v6, %v4651_v19  ;;  %v1935_v42 = vrot.slane %v3759_v18, 1  ;;  %v4668_v12 = vld [vmem:[#allocation2 + $0x38] ss:$0 sps:$4 sm:$0x11]  }
  0x5d   : > { %1466 = vrot.lane.b32.xlu0 %v1422_v62, %s4302_s8  ;;  %v1700_v39 = vrot.slane %v1698_v20, 1  ;;  %v4664_v43 = vcombine.low %v820_v17, %v4653_v23  ;;  %v1936_v45 = vrot.slane %v4071_v8, 1  ;;  %v733_v11 = vsel %vm4490_vm9, %v468_v26, %v732_v34  ;;  %v4679_v52 = vld [vmem:[#allocation2 + $0x38] ss:$0 sps:$4 sm:$0x11]  }
  0x5e   : > { %v1695_v38 = vrot.slane %v1693_v28, 1  ;;  %v736_v49 = vsel %vm4463_vm7, %v475_v25, %v735_v35  ;;  %v1932_v21 = vrot.slane %v3758_v32, 1  ;;  %734 = vst [vmem:[#allocation2 + $0x50] sm:$0x1] %v733_v11  ;;  %v1689_v53 = vsel %vm1140_vm6, %v1684_v41, %v1688_v33  ;;  %v3662_v3 = vld [vmem:[#allocation2 + $0x30] sm:$0xe] }
  0x5f   : > { %v3618_v47 = vld [vmem:[#allocation2 + $0x3c] sm:$0xf]  ;;  %v4666_v48 = vld [vmem:[#allocation2 + $0x40] sm:$0xf]  ;;  %737 = vst [vmem:[#allocation2 + $0x54] sm:$0xf] %v736_v49  ;;  %v1937_v59 = vsel %vm1413_vm2, %v1935_v42, %v1936_v45  ;;  %v3806_v24 = vcombine.low %v3662_v3, %v4651_v19 }
  0x60   : > { %1580 = vrot.lane.b32.xlu1 %v3727_v14, %s4304_s10  ;;  %v1696_v44 = vor.u32 %v1695_v38, %v1691_v30  ;;  %v3775_v29 = vcombine.low %v3618_v47, %v4666_v48  ;;  %v1933_v54 = vrot.slane %v4612_v16, 1  ;;  %v2193_v55 = vshll.u32 %v3774_v36, 16  ;;  %v822_v57 = vld [vmem:[#allocation2 + $0x3c] sm:$0xf]  ;;  %v4684_v58 = vld [vmem:[#allocation2 + $0x40] sm:$0xf] }
  0x61   : > { %1578 = vrot.lane.b32.xlu0 %v4626_v31, %s4304_s10  ;;  %v4677_v50 = vld [vmem:[#allocation2 + $0x44] ss:$0 sps:$4 sm:$0x11]   ;;  %v1192_v40 = vshll.u32 %v4664_v43, 16  ;;  %v4691_v0 = vcombine.low %v822_v57, %v4684_v58  ;;  %v2191_v4 = vshrl.u32 %v3774_v36, 16  ;;  %v2198_v6 = vshll.u32 %v4668_v12, 16 }
  0x62   : > { %v1701_v37 = vsel %vm1140_vm6, %v1696_v44, %v1700_v39  ;;  %v2205_v31 = vshll.u32 %v3775_v29, 16  ;;  %v2203_v60 = vshrl.u32 %v3775_v29, 16  ;;  %v2210_v61 = vshll.u32 %v4677_v50, 16  ;;  %v345_v62 = vld [vmem:[%s4452_s7 + $0x34] sm:$0xf] }
  0x63   : > { %v1934_v1 = vsel %vm1413_vm2, %v1932_v21, %v1933_v54  ;;  %v2195_v5 = vrot.slane %v2193_v55, 1  ;;  %v1190_v7 = vshrl.u32 %v4664_v43, 16  ;;  %v1194_v9 = vrot.slane %v1192_v40, 1  ;;  %v4700_v15 = vld [vmem:[#allocation2 + $0x44] ss:$0 sps:$4 sm:$0x11]  }
  0x64   : > { %1852 = vrot.lane.b32.xlu1 %v1701_v37, %s4308_s26  ;;  %v2207_v16 = vrot.slane %v2205_v31, 1  ;;  %v1197_v13 = vshll.u32 %v4679_v52, 16  ;;  %v2212_v8 = vrot.slane %v2210_v61, 1  ;;  %v1204_v17 = vshll.u32 %v4691_v0, 16  ;;  %v3663_v18 = vld [vmem:[#allocation2 + $0x3c] sm:$0xe] }
  0x65   : > { %1850 = vrot.lane.b32.xlu0 %v1689_v53, %s4308_s26  ;;  %v2196_v26 = vor.u32 %v2195_v5, %v2191_v4  ;;  %v2200_v28 = vrot.slane %v2198_v6, 1  ;;  %v1195_v30 = vor.u32 %v1194_v9, %v1190_v7  ;;  %v478_v25 = vshrl.u32 %v345_v62, 16  ;;  %v865_v38 = vld [vmem:[#allocation2 + $0x3c] sm:$0xe]  ;;  %v3558_v19 = vld [vmem:[#allocation2 + $0x48] sm:$0xf] }
  0x66   : > { %v2208_v14 = vor.u32 %v2207_v16, %v2203_v60  ;;  %v1199_v20 = vrot.slane %v1197_v13, 1  ;;  %v1202_v33 = vshrl.u32 %v4691_v0, 16  ;;  %v1206_v34 = vrot.slane %v1204_v17, 1  ;;  %v4711_v41 = vld [vmem:[#allocation2 + $0x4c] sm:$0xf] }
  0x67   : > { %v1209_v35 = vshll.u32 %v4700_v15, 16  ;;  %v3807_v39 = vcombine.low %v3663_v18, %v4666_v48  ;;  %v2201_v42 = vsel %vm1140_vm6, %v2196_v26, %v2200_v28  ;;  %v2444_v44 = vrot.slane %v3806_v24, 1  ;;  %v864_v47 = vld [vmem:[#allocation2 + $0x30] sm:$0xe]  ;;  %v3556_v11 = vld [vmem:[#allocation2 + $0x3c] sm:$0xf] }
  0x68   : > { %1980 = vrot.lane.b32.xlu1 %v1937_v59, %s4306_s22  ;;  %v2213_v32 = vsel %vm1140_vm6, %v2208_v14, %v2212_v8  ;;  %v2445_v45 = vrot.slane %v4668_v12, 1  ;;  %v3713_v49 = vcombine.low %v865_v38, %v4684_v58  ;;  %v4717_v21 = vld [vmem:[#allocation2 + $0x40] sm:$0xf]  ;;  %v476_v48 = vrot.slane %v4640_v2, 4  ;;  %v739_v12 = vld [vmem:[#allocation2 + $0x5c] sm:$0x1] }
  0x69   : > { %1978 = vrot.lane.b32.xlu0 %v1934_v1, %s4306_s22  ;;  %v1200_v37 = vsel %vm1140_vm6, %v1195_v30, %v1199_v20  ;;  %v1207_v53 = vor.u32 %v1206_v34, %v1202_v33  ;;  %v1211_v54 = vrot.slane %v1209_v35, 1  ;;  %v4722_v55 = vcombine.low %v3558_v19, %v4711_v41  ;;  %v346_v59 = vld [vmem:[%s4452_s7 + $0x38] sm:$0xf]  ;;  %v4732_v16 = vld [vmem:[#allocation2 + $0x50] ss:$0 sps:$4 sm:$0x11]  }
  0x6a   : > { %v2447_v57 = vrot.slane %v3807_v39, 1  ;;  %v3712_v31 = vcombine.low %v864_v47, %v4653_v23  ;;  %v2446_v2 = vsel %vm1413_vm2, %v2444_v44, %v2445_v45  ;;  %v2448_v60 = vrot.slane %v4677_v50, 1  ;;  %v3601_v50 = vld [vmem:[#allocation2 + $0x48] sm:$0xe]  ;;  %v742_v28 = vld [vmem:[#allocation2 + $0x60] sm:$0xf] }
  0x6b   : > { %v4730_v61 = vcombine.low %v3556_v11, %v4717_v21  ;;  %v1430_v1 = vrot.slane %v4700_v15, 1  ;;  %v1212_v4 = vsel %vm1140_vm6, %v1207_v53, %v1211_v54  ;;  %v1429_v5 = vrot.slane %v3713_v49, 1  ;;  %v4749_v17 = vld [vmem:[#allocation2 + $0x44] ss:$0 sps:$4 sm:$0x11]  }
  0x6c   : > { %2092 = vrot.lane.b32.xlu1 %v3775_v29, %s4305_s11  ;;  %v481_v29 = vshll.u32 %v345_v62, 16  ;;  %v1717_v6 = vshll.u32 %v4722_v55, 16  ;;  %v487_v7 = vshrl.u32 %v346_v59, 16  ;;  %v1426_v9 = vrot.slane %v3712_v31, 1  ;;  %v347_v62 = vld [vmem:[%s4452_s7 + $0x3c] sm:$0xf] }
  0x6d   : > { %2090 = vrot.lane.b32.xlu0 %v3774_v36, %s4305_s11  ;;  %v480_v36 = vrot.slane %v478_v25, 7  ;;  %v1427_v13 = vrot.slane %v4679_v52, 1  ;;  %v2449_v14 = vsel %vm1413_vm2, %v2447_v57, %v2448_v60  ;;  %v1705_v8 = vshll.u32 %v4730_v61, 16  ;;  %v3600_v20 = vld [vmem:[#allocation2 + $0x3c] sm:$0xe] }
  0x6e   : > { %v1722_v15 = vshll.u32 %v4732_v16, 16  ;;  %v3761_v18 = vcombine.low %v3601_v50, %v4711_v41  ;;  %v489_v24 = vrot.slane %v487_v7, 7  ;;  %v490_v26 = vshll.u32 %v346_v59, 16  ;;  %v3622_v35 = vld [vmem:[#allocation2 + $0x54] sm:$0xf] }
  0x6f   : > { %v483_v58 = vor.u32 %v481_v29, %v480_v36  ;;  %v485_v40 = vrot.slane %v480_v36, 4  ;;  %v1431_v30 = vsel %vm1413_vm2, %v1429_v5, %v1430_v1  ;;  %v1715_v52 = vshrl.u32 %v4722_v55, 16  ;;  %v3620_v44 = vld [vmem:[#allocation2 + $0x48] sm:$0xf]  ;;  %v4763_v49 = vld [vmem:[#allocation2 + $0x4c] sm:$0xf] }
  0x70   : > { %2364 = vrot.lane.b32.xlu1 %v2213_v32, %s4309_s29  ;;  %v1719_v25 = vrot.slane %v1717_v6, 1  ;;  %v495_v32 = vshrl.u32 %v347_v62, 16  ;;  %v1428_v33 = vsel %vm1413_vm2, %v1426_v9, %v1427_v13  ;;  %v1703_v34 = vshrl.u32 %v4730_v61, 16  ;;  %v4770_v53 = vld [vmem:[#allocation2 + $0x4c] sm:$0xf] }
  0x71   : > { %2362 = vrot.lane.b32.xlu0 %v2201_v42, %s4309_s29  ;;  %v484_v23 = vsel %vm4471_vm8, %v476_v48, %v483_v58  ;;  %v740_v3 = vsel %vm4490_vm9, %v485_v40, %v739_v12  ;;  %v492_v38 = vor.u32 %v490_v26, %v489_v24  ;;  %v498_v39 = vshll.u32 %v347_v62, 16  ;;  %v348_v59 = vld [vmem:[%s4452_s7 + $0x40] sm:$0xf]  ;;  %v4781_v1 = vld [vmem:[#allocation2 + $0x50] ss:$0 sps:$4 sm:$0x11]  }
  0x72   : > { %738 = vst.msk [vmem:[#allocation2 + $0x58] sm:$0xf] %vm276_vm0, %v484_v23  ;;  %741 = vst [vmem:[#allocation2 + $0x5c] sm:$0x1] %v740_v3  ;;  %v1724_v19 = vrot.slane %v1722_v15, 1  ;;  %v1707_v41 = vrot.slane %v1705_v8, 1  ;;  %v3760_v47 = vcombine.low %v3600_v20, %v4717_v21  ;;  %v1720_v36 = vor.u32 %v1719_v25, %v1715_v52 }
  0x73   : > { %v1710_v42 = vshll.u32 %v4749_v17, 16  ;;  %v497_v45 = vrot.slane %v495_v32, 7  ;;  %v743_v48 = vsel %vm4463_vm7, %v492_v38, %v742_v28  ;;  %v1941_v54 = vrot.slane %v3761_v18, 1  ;;  %v746_v50 = vld [vmem:[#allocation2 + $0x68] sm:$0x1] }
  0x74   : > { %1341 = vrot.lane.b32.xlu1 %v1200_v37, %s4303_s9  ;;  %v824_v37 = vld [vmem:[#allocation2 + $0x48] sm:$0xf]  ;;  %744 = vst [vmem:[#allocation2 + $0x60] sm:$0xf] %v743_v48  ;;  %v493_v21 = vrot.slane %v489_v24, 4  ;;  %v1708_v57 = vor.u32 %v1707_v41, %v1703_v34  ;;  %v1942_v58 = vrot.slane %v4732_v16, 1  ;;  %v4775_v40 = vcombine.low %v3620_v44, %v4763_v49 }
  0x75   : > { %2490 = vrot.lane.b32.xlu0 %v2446_v2, %s4307_s24  ;;  %v500_v12 = vor.u32 %v498_v39, %v497_v45  ;;  %v1712_v31 = vrot.slane %v1710_v42, 1  ;;  %v1938_v2 = vrot.slane %v3760_v47, 1  ;;  %v1939_v60 = vrot.slane %v4749_v17, 1  ;;  %v4799_v8 = vld [vmem:[#allocation2 + $0x50] ss:$0 sps:$4 sm:$0x11]  }
  0x76   : > { %v4784_v23 = vcombine.low %v824_v37, %v4770_v53  ;;  %v502_v3 = vrot.slane %v497_v45, 4  ;;  %v504_v9 = vshrl.u32 %v348_v59, 16  ;;  %v1943_v62 = vsel %vm1413_vm2, %v1941_v54, %v1942_v58  ;;  %v349_v15 = vld [vmem:[%s4452_s7 + $0x44] sm:$0xf]  ;;  %v749_v34 = vld [vmem:[#allocation2 + $0x6c] sm:$0xf] }
  0x77   : > { %v501_v7 = vsel %vm4471_vm8, %v493_v21, %v500_v12  ;;  %v1713_v13 = vsel %vm1140_vm6, %v1708_v57, %v1712_v31  ;;  %v507_v24 = vshll.u32 %v348_v59, 16  ;;  %v2215_v52 = vshrl.u32 %v4775_v40, 16  ;;  %v753_v48 = vld [vmem:[#allocation2 + $0x74] sm:$0x1]  ;;  %v3665_v12 = vld [vmem:[#allocation2 + $0x54] sm:$0xe] }
  0x78   : > { %1343 = vrot.lane.b32.xlu1 %v1212_v4, %s4303_s9  ;;  %v1725_v4 = vsel %vm1140_vm6, %v1720_v36, %v1724_v19  ;;  %745 = vst.msk [vmem:[#allocation2 + $0x64] sm:$0xf] %vm276_vm0, %v501_v7  ;;  %v1216_v17 = vshll.u32 %v4784_v23, 16  ;;  %v747_v18 = vsel %vm4490_vm9, %v502_v3, %v746_v50  ;;  %v2222_v25 = vshll.u32 %v4781_v1, 16  ;;  %v867_v3 = vld [vmem:[#allocation2 + $0x54] sm:$0xe] }
  0x79   : > { %2492 = vrot.lane.b32.xlu0 %v2449_v14, %s4307_s24  ;;  %v4761_v11 = vld [vmem:[#allocation2 + $0x58] sm:$0xf]  ;;  %v4788_v5 = vld [vmem:[#allocation2 + $0x5c] ss:$0 sps:$4 sm:$0x11]   ;;  %v2217_v14 = vshll.u32 %v4775_v40, 16 }
  0x7a   : > { %v4768_v29 = vcombine.low %v3622_v35, %v4761_v11  ;;  %v4792_v6 = vld [vmem:[#allocation2 + $0x58] sm:$0xf]  ;;  %748 = vst [vmem:[#allocation2 + $0x68] sm:$0x1] %v747_v18  ;;  %v506_v32 = vrot.slane %v504_v9, 7  ;;  %v1214_v39 = vshrl.u32 %v4784_v23, 16  ;;  %v3809_v18 = vcombine.low %v3665_v12, %v4761_v11 }
  0x7b   : > { %v3664_v35 = vld [vmem:[#allocation2 + $0x48] sm:$0xe]  ;;  %v2219_v38 = vrot.slane %v2217_v14, 1  ;;  %v1221_v19 = vshll.u32 %v4799_v8, 16  ;;  %v515_v41 = vshll.u32 %v349_v15, 16  ;;  %v1218_v42 = vrot.slane %v1216_v17, 1 }
  0x7c   : > { %1472 = vrot.lane.b32.xlu1 %v1431_v30, %s4302_s8  ;;  %v2229_v16 = vshll.u32 %v4768_v29, 16  ;;  %v2227_v26 = vshrl.u32 %v4768_v29, 16  ;;  %v2234_v30 = vshll.u32 %v4788_v5, 16  ;;  %v509_v44 = vor.u32 %v507_v24, %v506_v32  ;;  %v4819_v54 = vld [vmem:[#allocation2 + $0x5c] ss:$0 sps:$4 sm:$0x11]  }
  0x7d   : > { %1470 = vrot.lane.b32.xlu0 %v1428_v33, %s4302_s8  ;;  %v512_v33 = vshrl.u32 %v349_v15, 16  ;;  %v510_v45 = vrot.slane %v506_v32, 4  ;;  %v3808_v57 = vcombine.low %v3664_v35, %v4763_v49  ;;  %v1223_v50 = vrot.slane %v1221_v19, 1  ;;  %v351_v19 = vld [vmem:[%s4452_s7 + $0x4c] sm:$0xf] }
  0x7e   : > { %v2231_v28 = vrot.slane %v2229_v16, 1  ;;  %v2236_v37 = vrot.slane %v2234_v30, 1  ;;  %v750_v58 = vsel %vm4463_vm7, %v509_v44, %v749_v34  ;;  %v1219_v16 = vor.u32 %v1218_v42, %v1214_v39  ;;  %v350_v30 = vld [vmem:[%s4452_s7 + $0x48] sm:$0xf]  ;;  %v3624_v12 = vld [vmem:[#allocation2 + $0x60] sm:$0xf] }
  0x7f   : > { %v514_v47 = vrot.slane %v512_v33, 7  ;;  %751 = vst [vmem:[#allocation2 + $0x6c] sm:$0xf] %v750_v58  ;;  %v1233_v14 = vshll.u32 %v4819_v54, 16  ;;  %v2451_v15 = vrot.slane %v4781_v1, 1  ;;  %v521_v33 = vshrl.u32 %v350_v30, 16 }
  0x80   : > { %1584 = vrot.lane.b32.xlu1 %v4722_v55, %s4304_s10  ;;  %v826_v55 = vld [vmem:[#allocation2 + $0x54] sm:$0xf]  ;;  %v2232_v36 = vor.u32 %v2231_v28, %v2227_v26  ;;  %v4841_v17 = vld [vmem:[#allocation2 + $0x64] sm:$0xf]  ;;  %v3715_v26 = vcombine.low %v867_v3, %v4792_v6  ;;  %v866_v28 = vld [vmem:[#allocation2 + $0x48] sm:$0xe] }
  0x81   : > { %1582 = vrot.lane.b32.xlu0 %v4730_v61, %s4304_s10  ;;  %v1940_v61 = vsel %vm1413_vm2, %v1938_v2, %v1939_v60  ;;  %v4811_v20 = vcombine.low %v826_v55, %v4792_v6  ;;  %v517_v31 = vor.u32 %v515_v41, %v514_v47  ;;  %v519_v59 = vrot.slane %v514_v47, 4  ;;  %v4828_v55 = vld [vmem:[#allocation2 + $0x58] sm:$0xf]  ;;  %v4863_v42 = vld [vmem:[#allocation2 + $0x5c] ss:$0 sps:$4 sm:$0x11]  }
  0x82   : > { %v2220_v2 = vor.u32 %v2219_v38, %v2215_v52  ;;  %v2224_v60 = vrot.slane %v2222_v25, 1  ;;  %v2237_v9 = vsel %vm1140_vm6, %v2232_v36, %v2236_v37  ;;  %v1235_v25 = vrot.slane %v1233_v14, 1  ;;  %v3602_v47 = vld [vmem:[#allocation2 + $0x54] sm:$0xe]  ;;  %v3603_v3 = vld [vmem:[#allocation2 + $0x60] sm:$0xe] }
  0x83   : > { %v1228_v21 = vshll.u32 %v4811_v20, 16  ;;  %v518_v49 = vsel %vm4471_vm8, %v510_v45, %v517_v31  ;;  %v754_v7 = vsel %vm4490_vm9, %v519_v59, %v753_v48  ;;  %v3714_v6 = vcombine.low %v866_v28, %v4770_v53  ;;  %v4867_v53 = vld [vmem:[#allocation2 + $0x68] ss:$0 sps:$4 sm:$0x11]   ;;  %v828_v14 = vld [vmem:[#allocation2 + $0x60] sm:$0xf] }
  0x84   : > { %1856 = vrot.lane.b32.xlu1 %v1725_v4, %s4308_s26  ;;  %v3560_v4 = vld [vmem:[#allocation2 + $0x54] sm:$0xf]  ;;  %752 = vst.msk [vmem:[#allocation2 + $0x70] sm:$0xf] %vm276_vm0, %v518_v49  ;;  %755 = vst [vmem:[#allocation2 + $0x74] sm:$0x1] %v754_v7  ;;  %v2225_v24 = vsel %vm1140_vm6, %v2220_v2, %v2224_v60  ;;  %v3762_v58 = vcombine.low %v3602_v47, %v4828_v55 }
  0x85   : > { %1854 = vrot.lane.b32.xlu0 %v1713_v13, %s4308_s26  ;;  %v1226_v13 = vshrl.u32 %v4811_v20, 16  ;;  %v4849_v52 = vcombine.low %v3560_v4, %v4828_v55  ;;  %v2453_v34 = vrot.slane %v3809_v18, 1  ;;  %v2454_v35 = vrot.slane %v4788_v5, 1  ;;  %v756_v60 = vld [vmem:[#allocation2 + $0x78] sm:$0xf] }
  0x86   : > { %v1435_v38 = vrot.slane %v3715_v26, 1  ;;  %v1436_v39 = vrot.slane %v4819_v54, 1  ;;  %v1433_v5 = vrot.slane %v4799_v8, 1  ;;  %v523_v48 = vrot.slane %v521_v33, 7  ;;  %v3626_v7 = vld [vmem:[#allocation2 + $0x6c] sm:$0xf] }
  0x87   : > { %v1729_v41 = vshll.u32 %v4849_v52, 16  ;;  %v524_v36 = vshll.u32 %v350_v30, 16  ;;  %v2455_v37 = vsel %vm1413_vm2, %v2453_v34, %v2454_v35  ;;  %v529_v31 = vshrl.u32 %v351_v19, 16  ;;  %v760_v33 = vld [vmem:[#allocation2 + $0x80] sm:$0x1] }
  0x88   : > { %1984 = vrot.lane.b32.xlu1 %v1943_v62, %s4306_s22  ;;  %v1230_v62 = vrot.slane %v1228_v21, 1  ;;  %v1437_v54 = vsel %vm1413_vm2, %v1435_v38, %v1436_v39  ;;  %v1432_v21 = vrot.slane %v3714_v6, 1  ;;  %v1727_v59 = vshrl.u32 %v4849_v52, 16  ;;  %v352_v34 = vld [vmem:[%s4452_s7 + $0x50] sm:$0xf] }
  0x89   : > { %1982 = vrot.lane.b32.xlu0 %v1940_v61, %s4306_s22  ;;  %v3562_v61 = vld [vmem:[#allocation2 + $0x60] sm:$0xf]  ;;  %v1731_v2 = vrot.slane %v1729_v41, 1  ;;  %v1734_v8 = vshll.u32 %v4863_v42, 16  ;;  %v532_v49 = vshll.u32 %v351_v19, 16  ;;  %v3763_v18 = vcombine.low %v3603_v3, %v4841_v17 }
  0x8a   : > { %v1231_v1 = vor.u32 %v1230_v62, %v1226_v13  ;;  %v4853_v32 = vcombine.low %v3562_v61, %v4841_v17  ;;  %v526_v13 = vor.u32 %v524_v36, %v523_v48  ;;  %v1434_v62 = vsel %vm1413_vm2, %v1432_v21, %v1433_v5  ;;  %v353_v41 = vld [vmem:[%s4452_s7 + $0x54] sm:$0xf] }
  0x8b   : > { %v531_v61 = vrot.slane %v529_v31, 7  ;;  %v1945_v26 = vrot.slane %v4863_v42, 1  ;;  %v1732_v35 = vor.u32 %v1731_v2, %v1727_v59  ;;  %v1736_v38 = vrot.slane %v1734_v8, 1  ;;  %v4911_v42 = vld [vmem:[%s4452_s7 + $0x58] sm:$0xf] }
  0x8c   : > { %2096 = vrot.lane.b32.xlu1 %v4768_v29, %s4305_s11  ;;  %v2450_v29 = vrot.slane %v3808_v57, 1  ;;  %v1236_v44 = vsel %vm1140_vm6, %v1231_v1, %v1235_v25  ;;  %v1741_v45 = vshll.u32 %v4853_v32, 16  ;;  %v4873_v57 = vld [vmem:[#allocation2 + $0x64] sm:$0xf]  ;;  %v1739_v4 = vshrl.u32 %v4853_v32, 16 }
  0x8d   : > { %2094 = vrot.lane.b32.xlu0 %v4775_v40, %s4305_s11  ;;  %v1224_v40 = vsel %vm1140_vm6, %v1219_v16, %v1223_v50  ;;  %v1746_v50 = vshll.u32 %v4867_v53, 16  ;;  %v4885_v55 = vcombine.low %v3624_v12, %v4873_v57  ;;  %v757_v28 = vsel %vm4463_vm7, %v526_v13, %v756_v60  ;;  %v4917_v5 = vld [vmem:[#allocation2 + $0x74] ss:$0 sps:$4 sm:$0x11]   ;;  %v4924_v21 = vld [vmem:[#allocation2 + $0x70] sm:$0xf] }
  0x8e   : > { %v2452_v11 = vsel %vm1413_vm2, %v2450_v29, %v2451_v15  ;;  %v1743_v16 = vrot.slane %v1741_v45, 1  ;;  %v4888_v29 = vld [vmem:[#allocation2 + $0x64] sm:$0xf]  ;;  %v527_v15 = vrot.slane %v523_v48, 4  ;;  %v534_v25 = vor.u32 %v532_v49, %v531_v61  ;;  %758 = vst [vmem:[#allocation2 + $0x78] sm:$0xf] %v757_v28 }
  0x8f   : > { %v2241_v17 = vshll.u32 %v4885_v55, 16  ;;  %v4904_v6 = vcombine.low %v828_v14, %v4888_v29  ;;  %v536_v19 = vrot.slane %v531_v61, 4  ;;  %v1948_v45 = vrot.slane %v4867_v53, 1  ;;  %v4919_v48 = vld [vmem:[#allocation2 + $0x68] ss:$0 sps:$4 sm:$0x11]  }
  0x90   : > { %2368 = vrot.lane.b32.xlu1 %v2237_v9, %s4309_s29  ;;  %v4882_v9 = vld [vmem:[#allocation2 + $0x70] sm:$0xf]  ;;  %v1744_v30 = vor.u32 %v1743_v16, %v1739_v4  ;;  %v535_v39 = vsel %vm4471_vm8, %v527_v15, %v534_v25  ;;  %v2239_v12 = vshrl.u32 %v4885_v55, 16  ;;  %v538_v59 = vshrl.u32 %v352_v34, 16  ;;  %v763_v15 = vld [vmem:[#allocation2 + $0x84] sm:$0xf] }
  0x91   : > { %2366 = vrot.lane.b32.xlu0 %v2225_v24, %s4309_s29  ;;  %v1944_v24 = vrot.slane %v3762_v58, 1  ;;  %v4896_v1 = vcombine.low %v3626_v7, %v4882_v9  ;;  %759 = vst.msk [vmem:[#allocation2 + $0x7c] sm:$0xf] %vm276_vm0, %v535_v39  ;;  %v2243_v31 = vrot.slane %v2241_v17, 1  ;;  %v1240_v58 = vshll.u32 %v4904_v6, 16 }
  0x92   : > { %v1737_v2 = vsel %vm1140_vm6, %v1732_v35, %v1736_v38  ;;  %v4933_v8 = vld [vmem:[#allocation2 + $0x68] ss:$0 sps:$4 sm:$0x11]   ;;  %v541_v60 = vshll.u32 %v352_v34, 16  ;;  %v546_v3 = vshrl.u32 %v353_v41, 16  ;;  %v549_v4 = vshll.u32 %v353_v41, 16 }
  0x93   : > { %v1946_v47 = vsel %vm1413_vm2, %v1944_v24, %v1945_v26  ;;  %v555_v49 = vshrl.u32 %v4911_v42, 16  ;;  %v2251_v7 = vshrl.u32 %v4896_v1, 16  ;;  %v1238_v24 = vshrl.u32 %v4904_v6, 16 }
  0x94   : > { %1345 = vrot.lane.b32.xlu1 %v1224_v40, %s4303_s9  ;;  %v1748_v40 = vrot.slane %v1746_v50, 1  ;;  %v540_v50 = vrot.slane %v538_v59, 7  ;;  %v548_v14 = vrot.slane %v546_v3, 7  ;;  %v1245_v25 = vshll.u32 %v4933_v8, 16  ;;  %v4968_v59 = vld [vmem:[%s4452_s7 + $0x5c] sm:$0xf] }
  0x95   : > { %2494 = vrot.lane.b32.xlu0 %v2452_v11, %s4307_s24  ;;  %v4129_v11 = vld [vmem:[%s5920_s1 + $0x10] ss:$0 sps:$4 sm:$0x33]   ;;  %v4953_v38 = vrot.slane %v555_v49, 7  ;;  %v558_v39 = vshll.u32 %v4911_v42, 16  ;;  %vm2617_vm14 = vcmask 130048  }
  0x96   : > { %v1749_v36 = vsel %vm1140_vm6, %v1744_v30, %v1748_v40  ;;  %3971 = vmatprep.subr.msk.bf16.mxu0 %vm2835_vm10, %v4129_v11  ;;  %v2837_v53 = vsel %vm2835_vm10, %v4129_v11, 0  ;;  %3972 = vmatprep.subr.msk.bf16.mxu1 %vm2835_vm10, %v4129_v11  ;;  %v543_v26 = vor.u32 %v541_v60, %v540_v50  ;;  %v544_v28 = vrot.slane %v540_v50, 4  ;;  %v767_v30 = vld [vmem:[#allocation2 + $0x8c] sm:$0x1]  ;;  %v3566_v49 = vld [vmem:[#allocation2 + $0x78] sm:$0xf] }
  0x97   : > { %3932 = vmatpush3.bf16.msra.mxu0 %v2837_v53  ;;  %3970 = vmatpush3.bf16.msra.mxu1 %v2837_v53  ;;  %v1242_v40 = vrot.slane %v1240_v58, 1  ;;  %v551_v11 = vor.u32 %v549_v4, %v548_v14  ;;  %v553_v17 = vrot.slane %v548_v14, 4  ;;  %v869_v58 = vld [vmem:[#allocation2 + $0x6c] sm:$0xe]  ;;  %v560_v4 = vor.u32 %v558_v39, %v4953_v38 }
  0x98   : > { %1347 = vrot.lane.b32.xlu1 %v1236_v44, %s4303_s9  ;;  %v1947_v44 = vrot.slane %v3763_v18, 1  ;;  %v2246_v18 = vshll.u32 %v4919_v48, 16  ;;  %v764_v35 = vsel %vm4463_vm7, %v543_v26, %v763_v15  ;;  %v5007_v39 = vld [vmem:[#allocation2 + $0x74] ss:$0 sps:$4 sm:$0x11]   ;;  %vm2650_vm15 = vcmask 162816  }
  0x99   : > { %2496 = vrot.lane.b32.xlu0 %v2455_v37, %s4307_s24  ;;  %v2253_v37 = vshll.u32 %v4896_v1, 16  ;;  %765 = vst [vmem:[#allocation2 + $0x84] sm:$0xf] %v764_v35  ;;  %v1243_v60 = vor.u32 %v1242_v40, %v1238_v24  ;;  %v563_v24 = vshrl.u32 %v4968_v59, 16  ;;  %vm2683_vm1 = vcmask 195584  }
  0x9a   : > { %v2248_v53 = vrot.slane %v2246_v18, 1  ;;  %v868_v18 = vld [vmem:[#allocation2 + $0x60] sm:$0xe]  ;;  %vm2749_vm3 = vcmask 261120   ;;  %vm2716_vm4 = vcmask 228352   ;;  %vm2802_vm5 = vcmask 293888  }
  0x9b   : > { %v2255_v13 = vrot.slane %v2253_v37, 1  ;;  %v3716_v35 = vcombine.low %v868_v18, %v4888_v29 }
  0x9c   : > { %1476 = vrot.lane.b32.xlu1 %v1437_v54, %s4302_s8  ;;  %v830_v54 = vld [vmem:[#allocation2 + $0x6c] sm:$0xf] }
  0x9d   : > { %1474 = vrot.lane.b32.xlu0 %v1434_v62, %s4302_s8  ;;  %v4938_v16 = vcombine.low %v830_v54, %v4924_v21  ;;  %v2258_v62 = vshll.u32 %v4917_v5, 16  ;;  %v3667_v54 = vld [vmem:[#allocation2 + $0x6c] sm:$0xe] }
  0x9e   : > { %v3811_v50 = vcombine.low %v3667_v54, %v4882_v9  ;;  %v2457_v9 = vrot.slane %v4919_v48, 1 }
  0x9f   : > { %v1252_v34 = vshll.u32 %v4938_v16, 16  ;;  %v2260_v41 = vrot.slane %v2258_v62, 1  ;;  %v1250_v3 = vshrl.u32 %v4938_v16, 16  ;;  %v4984_v62 = vld [vmem:[#allocation2 + $0x70] sm:$0xf] }
  0xa0   : > { %1588 = vrot.lane.b32.xlu1 %v4853_v32, %s4304_s10  ;;  %v761_v32 = vsel %vm4490_vm9, %v536_v19, %v760_v33  ;;  %v3666_v33 = vld [vmem:[#allocation2 + $0x60] sm:$0xe]  ;;  %v2256_v19 = vor.u32 %v2255_v13, %v2251_v7  ;;  %v4979_v7 = vld [vmem:[#allocation2 + $0x7c] sm:$0xf]  ;;  %v3564_v13 = vld [vmem:[#allocation2 + $0x6c] sm:$0xf] }
  0xa1   : > { %1586 = vrot.lane.b32.xlu0 %v4849_v52, %s4304_s10  ;;  %762 = vst [vmem:[#allocation2 + $0x80] sm:$0x1] %v761_v32  ;;  %v1949_v52 = vsel %vm1413_vm2, %v1947_v44, %v1948_v45  ;;  %v4956_v44 = vld [vmem:[#allocation2 + $0x74] ss:$0 sps:$4 sm:$0x11]   ;;  %v552_v45 = vsel %vm4471_vm8, %v544_v28, %v551_v11  ;;  %v3810_v42 = vcombine.low %v3666_v33, %v4873_v57 }
  0xa2   : > { %v4944_v61 = vpop.permute.xlu1 %1462  ;;  %766 = vst.msk [vmem:[#allocation2 + $0x88] sm:$0xf] %vm276_vm0, %v552_v45  ;;  %v2244_v32 = vor.u32 %v2243_v31, %v2239_v12  ;;  %v2261_v57 = vsel %vm1140_vm6, %v2256_v19, %v2260_v41  ;;  %v1254_v12 = vrot.slane %v1252_v34, 1  ;;  %v1257_v31 = vshll.u32 %v4956_v44, 16  ;;  %v3604_v41 = vld [vmem:[#allocation2 + $0x6c] sm:$0xe] }
  0xa3   : > { %v2456_v15 = vrot.slane %v3810_v42, 1  ;;  %v4999_v48 = vcombine.low %v3564_v13, %v4984_v62  ;;  %v1442_v34 = vrot.slane %v4956_v44, 1  ;;  %v565_v45 = vrot.slane %v563_v24, 7 }
  0xa4   : > { %1860 = vrot.lane.b32.xlu1 %v1749_v36, %s4308_s26  ;;  %v768_v36 = vsel %vm4490_vm9, %v553_v17, %v767_v30  ;;  %v4963_v37 = vpop.permute.xlu0 %1333  ;;  %v2249_v14 = vsel %vm1140_vm6, %v2244_v32, %v2248_v53  ;;  %v1255_v30 = vor.u32 %v1254_v12, %v1250_v3  ;;  %v1259_v40 = vrot.slane %v1257_v31, 1  ;;  %v3605_v12 = vld [vmem:[#allocation2 + $0x78] sm:$0xe] }
  0xa5   : > { %1858 = vrot.lane.b32.xlu0 %v1737_v2, %s4308_s26  ;;  %769 = vst [vmem:[#allocation2 + $0x8c] sm:$0x1] %v768_v36  ;;  %v2460_v17 = vrot.slane %v4917_v5, 1  ;;  %v2458_v19 = vsel %vm1413_vm2, %v2456_v15, %v2457_v9  ;;  %v566_v36 = vshll.u32 %v4968_v59, 16  ;;  %v1753_v29 = vshll.u32 %v4999_v48, 16 }
  0xa6   : > { %v1260_v44 = vsel %vm1140_vm6, %v1255_v30, %v1259_v40  ;;  %v561_v32 = vrot.slane %v4953_v38, 4  ;;  %v1439_v59 = vrot.slane %v4933_v8, 1  ;;  %v357_v15 = vld [vmem:[%s4452_s7 + $0x64] sm:$0xf] }
  0xa7   : > { %v568_v38 = vor.u32 %v566_v36, %v565_v45  ;;  %v1755_v13 = vrot.slane %v1753_v29, 1  ;;  %v580_v29 = vshrl.u32 %v357_v15, 16 }
  0xa8   : > { %1988 = vrot.lane.b32.xlu1 %v1949_v52, %s4306_s22  ;;  %v770_v52 = vld [vmem:[#allocation2 + $0x90] sm:$0xf]  ;;  %v5015_v42 = vld [vmem:[#allocation2 + $0x80] ss:$0 sps:$4 sm:$0x11]  }
  0xa9   : > { %1986 = vrot.lane.b32.xlu0 %v1946_v47, %s4306_s22  ;;  %v1247_v47 = vrot.slane %v1245_v25, 1  ;;  %v2459_v25 = vrot.slane %v3811_v50, 1  ;;  %v774_v50 = vld [vmem:[#allocation2 + $0x98] sm:$0x1]  ;;  %v5042_v30 = vld [vmem:[#allocation2 + $0x88] sm:$0xf] }
  0xab   : > { %v4972_v2 = vpop.permute.xlu1 %1576  ;;  %v1248_v28 = vsel %vm1140_vm6, %v1243_v60, %v1247_v47  ;;  %v3764_v60 = vcombine.low %v3604_v41, %v4984_v62  ;;  %v356_v47 = vld [vmem:[%s4452_s7 + $0x60] sm:$0xf]  ;;  %v2461_v3 = vsel %vm1413_vm2, %v2459_v25, %v2460_v17  ;;  %v569_v62 = vsel %vm4471_vm8, %v561_v32, %v568_v38  ;;  %v3628_v17 = vld [vmem:[#allocation2 + $0x78] sm:$0xf] }
  0xac   : > { %2100 = vrot.lane.b32.xlu1 %v4896_v1, %s4305_s11  ;;  %v3717_v1 = vcombine.low %v869_v58, %v4924_v21  ;;  %v771_v21 = vsel %vm4463_vm7, %v560_v4, %v770_v52  ;;  %v1438_v58 = vrot.slane %v3716_v35, 1  ;;  %v1751_v52 = vshrl.u32 %v4999_v48, 16  ;;  %773 = vst.msk [vmem:[#allocation2 + $0x94] sm:$0xf] %vm276_vm0, %v569_v62 }
  0xad   : > { %2098 = vrot.lane.b32.xlu0 %v4885_v55, %s4305_s11  ;;  %v4994_v55 = vcombine.low %v3566_v49, %v4979_v7  ;;  %772 = vst [vmem:[#allocation2 + $0x90] sm:$0xf] %v771_v21  ;;  %v1770_v49 = vshll.u32 %v5015_v42, 16  ;;  %v572_v9 = vshrl.u32 %v356_v47, 16  ;;  %v1950_v24 = vrot.slane %v3764_v60, 1 }
  0xae   : > { %v1441_v33 = vrot.slane %v3717_v1, 1  ;;  %v1758_v1 = vshll.u32 %v5007_v39, 16  ;;  %v3630_v21 = vld [vmem:[#allocation2 + $0x84] sm:$0xf]  ;;  %v1440_v40 = vsel %vm1413_vm2, %v1438_v58, %v1439_v59  ;;  %v3765_v25 = vcombine.low %v3605_v12, %v4979_v7  ;;  %v777_v58 = vld [vmem:[#allocation2 + $0x9c] sm:$0xf] }
  0xaf   : > { %v4989_v26 = vpop.permute.xlu0 %1574  ;;  %v1765_v5 = vshll.u32 %v4994_v55, 16  ;;  %v1763_v8 = vshrl.u32 %v4994_v55, 16  ;;  %v1772_v41 = vrot.slane %v1770_v49, 1  ;;  %v574_v36 = vrot.slane %v572_v9, 7  ;;  %v5083_v9 = vld [vmem:[#allocation2 + $0x88] sm:$0xf] }
  0xb0   : > { %2372 = vrot.lane.b32.xlu1 %v2261_v57, %s4309_s29  ;;  %v1443_v4 = vsel %vm1413_vm2, %v1441_v33, %v1442_v34  ;;  %v5047_v33 = vld [vmem:[#allocation2 + $0x7c] sm:$0xf]  ;;  %v832_v34 = vld [vmem:[#allocation2 + $0x78] sm:$0xf]  ;;  %v575_v7 = vshll.u32 %v356_v47, 16  ;;  %v583_v32 = vshll.u32 %v357_v15, 16  ;;  %v1756_v60 = vor.u32 %v1755_v13, %v1751_v52 }
  0xb1   : > { %2370 = vrot.lane.b32.xlu0 %v2249_v14, %s4309_s29  ;;  %v1767_v31 = vrot.slane %v1765_v5, 1  ;;  %v570_v14 = vrot.slane %v565_v45, 4  ;;  %v5054_v45 = vld [vmem:[#allocation2 + $0x7c] sm:$0xf]  ;;  %v1760_v5 = vrot.slane %v1758_v1, 1  ;;  %v2520_v47 = vsel %vm2518_vm11, %v4457_v10, %v4963_v37 }
  0xb2   : > { %v5002_v11 = vpop.permute.xlu1 %2088  ;;  %v577_v38 = vor.u32 %v575_v7, %v574_v36  ;;  %v578_v12 = vrot.slane %v574_v36, 4  ;;  %v1953_v1 = vrot.slane %v3765_v25, 1  ;;  %v1954_v13 = vrot.slane %v5015_v42, 1  ;;  %v5076_v62 = vld [vmem:[#allocation2 + $0x8c] ss:$0 sps:$4 sm:$0x11]  }
  0xb3   : > { %v5011_v54 = vpop.permute.xlu0 %2086  ;;  %v775_v35 = vsel %vm4490_vm9, %v570_v14, %v774_v50  ;;  %v5070_v50 = vcombine.low %v832_v34, %v5054_v45  ;;  %v834_v15 = vld [vmem:[#allocation2 + $0x84] sm:$0xf]  ;;  %v2553_v42 = vsel %vm2551_vm12, %v2520_v47, %v4944_v61  ;;  %v5093_v25 = vld [vmem:[#allocation2 + $0x80] ss:$0 sps:$4 sm:$0x11]  }
  0xb4   : > { %1349 = vrot.lane.b32.xlu1 %v1248_v28, %s4303_s9  ;;  %v1951_v28 = vrot.slane %v5007_v39, 1  ;;  %v1768_v39 = vor.u32 %v1767_v31, %v1763_v8  ;;  %776 = vst [vmem:[#allocation2 + $0x98] sm:$0x1] %v775_v35  ;;  %v582_v8 = vrot.slane %v580_v29, 7  ;;  %v781_v31 = vld [vmem:[#allocation2 + $0xa4] sm:$0x1]  ;;  %v778_v10 = vsel %vm4463_vm7, %v577_v38, %v777_v58 }
  0xb5   : > { %2498 = vrot.lane.b32.xlu0 %v2458_v19, %s4307_s24  ;;  %779 = vst [vmem:[#allocation2 + $0x9c] sm:$0xf] %v778_v10  ;;  %v5097_v34 = vld [vmem:[#allocation2 + $0x80] ss:$0 sps:$4 sm:$0x11]   ;;  %v1264_v61 = vshll.u32 %v5070_v50, 16  ;;  %v2586_v35 = vsel %vm2584_vm13, %v2553_v42, %v4989_v26  ;;  %v5110_v36 = vcombine.low %v834_v15, %v5083_v9 }
  0xb6   : > { %v5021_v53 = vpop.permute.xlu1 %1464  ;;  %v1773_v52 = vsel %vm1140_vm6, %v1768_v39, %v1772_v41  ;;  %v2270_v38 = vshll.u32 %v5093_v25, 16  ;;  %v358_v47 = vld [vmem:[%s4452_s7 + $0x68] sm:$0xf]  ;;  %v3669_v42 = vld [vmem:[#allocation2 + $0x84] sm:$0xe] }
  0xb7   : > { %v5029_v57 = vpop.permute.xlu0 %1974  ;;  %v1276_v10 = vshll.u32 %v5110_v36, 16  ;;  %v589_v15 = vshrl.u32 %v358_v47, 16 }
  0xb8   : > { %1351 = vrot.lane.b32.xlu1 %v1260_v44, %s4303_s9  ;;  %v5057_v44 = vcombine.low %v3630_v21, %v5042_v30 }
  0xb9   : > { %2500 = vrot.lane.b32.xlu0 %v2461_v3, %s4307_s24  ;;  %v5061_v3 = vsel %vm1413_vm2, %v1950_v24, %v1951_v28  ;;  %v587_v24 = vrot.slane %v582_v8, 4 }
  0xba   : > { %v5039_v18 = vpop.permute.xlu1 %1976  ;;  %v2277_v14 = vshll.u32 %v5057_v44, 16  ;;  %v2275_v26 = vshrl.u32 %v5057_v44, 16 }
  0xbb   : > { %v5051_v19 = vpop.permute.xlu0 %2486 }
  0xbc   : > { %1480 = vrot.lane.b32.xlu1 %v1443_v4, %s4302_s8  ;;  %v5064_v4 = vcombine.low %v3628_v17, %v5047_v33  ;;  %v2279_v29 = vrot.slane %v2277_v14, 1 }
  0xbd   : > { %1478 = vrot.lane.b32.xlu0 %v1440_v40, %s4302_s8 }
  0xbe   : > { %v1849_v59 = vpop.permute.xlu1 %1848  ;;  %v2265_v40 = vshll.u32 %v5064_v4, 16  ;;  %v2280_v14 = vor.u32 %v2279_v29, %v2275_v26  ;;  %v5156_v26 = vrot.slane %v589_v15, 7  ;;  %v3813_v29 = vcombine.low %v3669_v42, %v5042_v30 }
  0xbf   : > { %v1336_v49 = vpop.permute.xlu0 %1335 }
  0xc0   : > { %1592 = vrot.lane.b32.xlu1 %v4994_v55, %s4304_s10  ;;  %v2522_v37 = vsel %vm2518_vm11, %v4534_v51, %v1336_v49  ;;  %v585_v55 = vor.u32 %v583_v32, %v582_v8  ;;  %v1761_v51 = vsel %vm1140_vm6, %v1756_v60, %v1760_v5  ;;  %v1955_v5 = vsel %vm1413_vm2, %v1953_v1, %v1954_v13  ;;  %v3668_v8 = vld [vmem:[#allocation2 + $0x78] sm:$0xe]  ;;  %v5131_v13 = vld [vmem:[#allocation2 + $0x8c] ss:$0 sps:$4 sm:$0x11]  }
  0xc1   : > { %v2555_v28 = vsel %vm2551_vm12, %v2522_v37, %v5021_v53  ;;  %1590 = vrot.lane.b32.xlu0 %v4999_v48, %s4304_s10  ;;  %v782_v48 = vsel %vm4490_vm9, %v587_v24, %v781_v31  ;;  %v2263_v60 = vshrl.u32 %v5064_v4, 16  ;;  %v2267_v31 = vrot.slane %v2265_v40, 1 }
  0xc2   : > { %v2361_v21 = vpop.permute.xlu1 %2360  ;;  %v2588_v17 = vsel %vm2584_vm13, %v2555_v28, %v4972_v2  ;;  %v586_v53 = vsel %vm4471_vm8, %v578_v12, %v585_v55  ;;  %v2282_v2 = vshll.u32 %v5076_v62, 16  ;;  %783 = vst [vmem:[#allocation2 + $0xa4] sm:$0x1] %v782_v48  ;;  %v1262_v49 = vshrl.u32 %v5070_v50, 16 }
  0xc3   : > { %v2621_v39 = vsel %vm2617_vm14, %v2588_v17, %v1849_v59  ;;  %v1847_v41 = vpop.permute.xlu0 %1846  ;;  %780 = vst.msk [vmem:[#allocation2 + $0xa0] sm:$0xf] %vm276_vm0, %v586_v53  ;;  %v1266_v1 = vrot.slane %v1264_v61, 1  ;;  %v2272_v28 = vrot.slane %v2270_v38, 1  ;;  %v3812_v40 = vcombine.low %v3668_v8, %v5047_v33  ;;  %v3568_v53 = vld [vmem:[#allocation2 + $0x84] sm:$0xf] }
  0xc4   : > { %1864 = vrot.lane.b32.xlu1 %v1773_v52, %s4308_s26  ;;  %v2619_v7 = vsel %vm2617_vm14, %v2586_v35, %v1847_v41  ;;  %v2654_v32 = vsel %vm2650_vm15, %v2621_v39, %v5039_v18  ;;  %v1269_v18 = vshll.u32 %v5097_v34, 16  ;;  %v1274_v61 = vshrl.u32 %v5110_v36, 16  ;;  %v3570_v41 = vld [vmem:[#allocation2 + $0x90] sm:$0xf]  ;;  %v870_v8 = vld [vmem:[#allocation2 + $0x78] sm:$0xe] }
  0xc5   : > { %v2652_v58 = vsel %vm2650_vm15, %v2619_v7, %v5029_v57  ;;  %1862 = vrot.lane.b32.xlu0 %v1761_v51, %s4308_s26  ;;  %v2284_v57 = vrot.slane %v2282_v2, 1  ;;  %v2687_v37 = vsel %vm2683_vm1, %v2654_v32, %v5002_v11  ;;  %v871_v51 = vld [vmem:[#allocation2 + $0x84] sm:$0xe]  ;;  %v2268_v11 = vor.u32 %v2267_v31, %v2263_v60  ;;  %v5150_v2 = vld [vmem:[#allocation2 + $0x88] sm:$0xf] }
  0xc6   : > { %v5121_v59 = vpop.permute.xlu1 %1337  ;;  %v2685_v12 = vsel %vm2683_vm1, %v2652_v58, %v5011_v54  ;;  %v1271_v17 = vrot.slane %v1269_v18, 1  ;;  %v2720_v48 = vsel %vm2716_vm4, %v2687_v37, %v2361_v21  ;;  %v1278_v35 = vrot.slane %v1276_v10, 1  ;;  %v359_v32 = vld [vmem:[%s4452_s7 + $0x6c] sm:$0xf] }
  0xc7   : > { %v2359_v52 = vpop.permute.xlu0 %2358  ;;  %v1281_v39 = vshll.u32 %v5131_v13, 16  ;;  %v2285_v7 = vsel %vm1140_vm6, %v2280_v14, %v2284_v57  ;;  %v592_v21 = vshll.u32 %v358_v47, 16  ;;  %v2273_v58 = vsel %vm1140_vm6, %v2268_v11, %v2272_v28  ;;  %v5185_v14 = vld [vmem:[%s4452_s7 + $0x70] sm:$0xf] }
  0xc8   : > { %1992 = vrot.lane.b32.xlu1 %v1955_v5, %s4306_s22  ;;  %v2718_v54 = vsel %vm2716_vm4, %v2685_v12, %v2359_v52  ;;  %v5154_v5 = vld [vmem:[#allocation2 + $0x94] sm:$0xf]  ;;  %v2462_v60 = vrot.slane %v3812_v40, 1  ;;  %v2463_v38 = vrot.slane %v5093_v25, 1  ;;  %v3719_v12 = vcombine.low %v871_v51, %v5083_v9  ;;  %v3606_v52 = vld [vmem:[#allocation2 + $0x84] sm:$0xe] }
  0xc9   : > { %1990 = vrot.lane.b32.xlu0 %v5061_v3, %s4306_s22  ;;  %v2751_v55 = vsel %vm2749_vm3, %v2718_v54, %v5051_v19  ;;  %v1267_v19 = vor.u32 %v1266_v1, %v1262_v49  ;;  %v5176_v47 = vcombine.low %v3568_v53, %v5150_v2  ;;  %v1279_v49 = vor.u32 %v1278_v35, %v1274_v61  ;;  %v784_v54 = vld [vmem:[#allocation2 + $0xa8] sm:$0xf]  ;;  %v5189_v28 = vld [vmem:[#allocation2 + $0x8c] ss:$0 sps:$4 sm:$0x11]  }
  0xca   : > { %v5141_v24 = vpop.permute.xlu1 %1339  ;;  %3933 = vmatprep.mubr.msk.bf16.mxu0 %vm2802_vm5, %v2751_v55  ;;  %v1283_v18 = vrot.slane %v1281_v39, 1  ;;  %v594_v25 = vor.u32 %v592_v21, %v5156_v26  ;;  %v597_v9 = vshrl.u32 %v359_v32, 16  ;;  %v2465_v1 = vrot.slane %v3813_v29, 1 }
  0xcb   : > { %v2489_v3 = vpop.permute.xlu0 %2488  ;;  %v1272_v30 = vsel %vm1140_vm6, %v1267_v19, %v1271_v17  ;;  %v2466_v10 = vrot.slane %v5076_v62, 1  ;;  %v3718_v37 = vcombine.low %v870_v8, %v5054_v45  ;;  %v2464_v15 = vsel %vm1413_vm2, %v2462_v60, %v2463_v38  ;;  %v5197_v17 = vld [vmem:[#allocation2 + $0x98] ss:$0 sps:$4 sm:$0x11]  }
  0xcc   : > { %2104 = vrot.lane.b32.xlu1 %v5057_v44, %s4305_s11  ;;  %v2753_v33 = vsel %vm2749_vm3, %v2720_v48, %v2489_v3  ;;  %v1447_v55 = vrot.slane %v3719_v12, 1  ;;  %v1448_v42 = vrot.slane %v5131_v13, 1  ;;  %v600_v51 = vshll.u32 %v359_v32, 16  ;;  %v361_v32 = vld [vmem:[%s4452_s7 + $0x74] sm:$0xf] }
  0xcd   : > { %2102 = vrot.lane.b32.xlu0 %v5064_v4, %s4305_s11  ;;  %3934 = vmatmul.mubr.msk.bf16.vlgmr.msra.gmra.mrb[0].mxu0 %vm2802_vm5, %v2753_v33  ;;  %v5173_v4 = vcombine.low %v3570_v41, %v5154_v5  ;;  %v1777_v62 = vshll.u32 %v5176_v47, 16  ;;  %v3766_v45 = vcombine.low %v3606_v52, %v5150_v2  ;;  %v1284_v61 = vsel %vm1140_vm6, %v1279_v49, %v1283_v18  ;;  %v788_v41 = vld [vmem:[#allocation2 + $0xb0] sm:$0x1]  ;;  %v362_v8 = vld [vmem:[%s4452_s7 + $0x78] sm:$0xf] }
  0xce   : > { %v5162_v44 = vpop.permute.xlu1 %1468  ;;  %v595_v53 = vrot.slane %v5156_v26, 4  ;;  %v599_v13 = vrot.slane %v597_v9, 7  ;;  %v785_v48 = vsel %vm4463_vm7, %v594_v25, %v784_v54  ;;  %v2467_v19 = vsel %vm1413_vm2, %v2465_v1, %v2466_v10  ;;  %v3632_v18 = vld [vmem:[#allocation2 + $0x90] sm:$0xf]  ;;  %v5219_v52 = vld [vmem:[#allocation2 + $0x94] sm:$0xf] }
  0xcf   : > { %v5168_v31 = vpop.permute.xlu0 %1466  ;;  %v1789_v11 = vshll.u32 %v5173_v4, 16  ;;  %v1444_v35 = vrot.slane %v3718_v37, 1  ;;  %v1445_v39 = vrot.slane %v5097_v34, 1  ;;  %786 = vst [vmem:[#allocation2 + $0xa8] sm:$0xf] %v785_v48  ;;  %v606_v2 = vshrl.u32 %v5185_v14, 16 }
  0xd0   : > { %2376 = vrot.lane.b32.xlu1 %v2285_v7, %s4309_s29  ;;  %v1449_v33 = vsel %vm1413_vm2, %v1447_v55, %v1448_v42  ;;  %v3607_v7 = vld [vmem:[#allocation2 + $0x90] sm:$0xe]  ;;  %v1775_v26 = vshrl.u32 %v5176_v47, 16  ;;  %v602_v21 = vor.u32 %v600_v51, %v599_v13  ;;  %v604_v29 = vrot.slane %v599_v13, 4  ;;  %v3634_v54 = vld [vmem:[#allocation2 + $0x9c] sm:$0xf] }
  0xd1   : > { %2374 = vrot.lane.b32.xlu0 %v2273_v58, %s4309_s29  ;;  %v1787_v60 = vshrl.u32 %v5173_v4, 16  ;;  %v1791_v34 = vrot.slane %v1789_v11, 1  ;;  %v1794_v38 = vshll.u32 %v5197_v17, 16  ;;  %v1782_v12 = vshll.u32 %v5189_v28, 16 }
  0xd2   : > { %v5180_v57 = vpop.permute.xlu1 %1580  ;;  %v1956_v49 = vrot.slane %v3766_v45, 1  ;;  %v603_v25 = vsel %vm4471_vm8, %v595_v53, %v602_v21  ;;  %v789_v9 = vsel %vm4490_vm9, %v604_v29, %v788_v41  ;;  %v1446_v10 = vsel %vm1413_vm2, %v1444_v35, %v1445_v39  ;;  %v791_v45 = vld [vmem:[#allocation2 + $0xb4] sm:$0xf] }
  0xd3   : > { %v5191_v40 = vpop.permute.xlu0 %1578  ;;  %v3767_v37 = vcombine.low %v3607_v7, %v5154_v5  ;;  %787 = vst.msk [vmem:[#allocation2 + $0xac] sm:$0xf] %vm276_vm0, %v603_v25  ;;  %790 = vst [vmem:[#allocation2 + $0xb0] sm:$0x1] %v789_v9  ;;  %v608_v55 = vrot.slane %v606_v2, 7  ;;  %v609_v42 = vshll.u32 %v5185_v14, 16  ;;  %v1792_v5 = vor.u32 %v1791_v34, %v1787_v60 }
  0xd4   : > { %1353 = vrot.lane.b32.xlu1 %v1272_v30, %s4303_s9  ;;  %v1779_v30 = vrot.slane %v1777_v62, 1  ;;  %v1957_v51 = vrot.slane %v5189_v28, 1  ;;  %v614_v11 = vshrl.u32 %v361_v32, 16  ;;  %v617_v62 = vshll.u32 %v361_v32, 16  ;;  %v5244_v14 = vld [vmem:[#allocation2 + $0x94] sm:$0xf] }
  0xd5   : > { %2502 = vrot.lane.b32.xlu0 %v2464_v15, %s4307_s24  ;;  %v5230_v15 = vld [vmem:[#allocation2 + $0xa0] sm:$0xf]  ;;  %v1796_v13 = vrot.slane %v1794_v38, 1  ;;  %v5239_v48 = vcombine.low %v3632_v18, %v5219_v52  ;;  %v611_v35 = vor.u32 %v609_v42, %v608_v55  ;;  %v612_v28 = vrot.slane %v608_v55, 4  ;;  %v795_v60 = vld [vmem:[#allocation2 + $0xbc] sm:$0x1] }
  0xd6   : > { %v5204_v3 = vpop.permute.xlu1 %1852  ;;  %v5242_v39 = vcombine.low %v3634_v54, %v5230_v15  ;;  %v616_v41 = vrot.slane %v614_v11, 7  ;;  %v1784_v21 = vrot.slane %v1782_v12, 1  ;;  %v1959_v29 = vrot.slane %v3767_v37, 1  ;;  %v798_v9 = vld [vmem:[#allocation2 + $0xc0] sm:$0xf] }
  0xd7   : > { %v5212_v58 = vpop.permute.xlu0 %1850  ;;  %v792_v32 = vsel %vm4463_vm7, %v611_v35, %v791_v45  ;;  %v1960_v34 = vrot.slane %v5197_v17, 1  ;;  %v626_v25 = vshll.u32 %v362_v8, 16  ;;  %v2289_v12 = vshll.u32 %v5239_v48, 16  ;;  %v5266_v55 = vld [vmem:[#allocation2 + $0x98] ss:$0 sps:$4 sm:$0x11]  }
  0xd8   : > { %1355 = vrot.lane.b32.xlu1 %v1284_v61, %s4303_s9  ;;  %v623_v61 = vshrl.u32 %v362_v8, 16  ;;  %v619_v38 = vor.u32 %v617_v62, %v616_v41  ;;  %793 = vst [vmem:[#allocation2 + $0xb4] sm:$0xf] %v792_v32  ;;  %v621_v18 = vrot.slane %v616_v41, 4  ;;  %v2301_v17 = vshll.u32 %v5242_v39, 16 }
  0xd9   : > { %2504 = vrot.lane.b32.xlu0 %v2467_v19, %s4307_s24  ;;  %v836_v19 = vld [vmem:[#allocation2 + $0x90] sm:$0xf]  ;;  %v2524_v11 = vsel %vm2518_vm11, %v4544_v63, %v5121_v59  ;;  %v1961_v35 = vsel %vm1413_vm2, %v1959_v29, %v1960_v34  ;;  %v5288_v59 = vld [vmem:[#allocation2 + $0x98] ss:$0 sps:$4 sm:$0x11]   ;;  %v2299_v22 = vshrl.u32 %v5242_v39, 16 }
  0xda   : > { %v5226_v1 = vpop.permute.xlu1 %1980  ;;  %v5246_v2 = vrot.slane %v623_v61, 7  ;;  %v5263_v37 = vcombine.low %v836_v19, %v5244_v14  ;;  %v620_v8 = vsel %vm4471_vm8, %v612_v28, %v619_v38  ;;  %v1958_v61 = vsel %vm1413_vm2, %v1956_v49, %v1957_v51 }
  0xdb   : > { %v5235_v53 = vpop.permute.xlu0 %1978  ;;  %794 = vst.msk [vmem:[#allocation2 + $0xb8] sm:$0xf] %vm276_vm0, %v620_v8  ;;  %v2557_v19 = vsel %vm2551_vm12, %v2524_v11, %v5168_v31  ;;  %v2287_v31 = vshrl.u32 %v5239_v48, 16 }
  0xdc   : > { %1484 = vrot.lane.b32.xlu1 %v1449_v33, %s4302_s8  ;;  %v1780_v33 = vor.u32 %v1779_v30, %v1775_v26  ;;  %v5257_v26 = vld [vmem:[#allocation2 + $0x90] sm:$0xe]  ;;  %v5260_v30 = vld [vmem:[#allocation2 + $0xa4] ss:$0 sps:$4 sm:$0x11]   ;;  %v628_v42 = vor.u32 %v626_v25, %v5246_v2  ;;  %v2590_v49 = vsel %vm2584_vm13, %v2557_v19, %v5191_v40  ;;  %v1288_v41 = vshll.u32 %v5263_v37, 16 }
  0xdd   : > { %1482 = vrot.lane.b32.xlu0 %v1446_v10, %s4302_s8  ;;  %v1797_v10 = vsel %vm1140_vm6, %v1792_v5, %v1796_v13  ;;  %v838_v5 = vld [vmem:[#allocation2 + $0x9c] sm:$0xf]  ;;  %v5280_v13 = vld [vmem:[#allocation2 + $0xa0] sm:$0xf]  ;;  %v3814_v63 = vcombine.low %v5257_v26, %v5219_v52  ;;  %v2306_v28 = vshll.u32 %v5260_v30, 16  ;;  %v2623_v52 = vsel %vm2617_vm14, %v2590_v49, %v5212_v58 }
  0xde   : > { %v5249_v7 = vpop.permute.xlu1 %2092  ;;  %v1785_v45 = vsel %vm1140_vm6, %v1780_v33, %v1784_v21  ;;  %v2303_v33 = vrot.slane %v2301_v17, 1  ;;  %v5302_v21 = vcombine.low %v838_v5, %v5280_v13  ;;  %v2526_v40 = vsel %vm2518_vm11, %v4588_v46, %v5141_v24  ;;  %v363_v46 = vld [vmem:[%s4452_s7 + $0x7c] sm:$0xf]  ;;  %v5326_v17 = vld [vmem:[#allocation2 + $0xa4] ss:$0 sps:$4 sm:$0x11]  }
  0xdf   : > { %v2091_v54 = vpop.permute.xlu0 %2090  ;;  %v2656_v29 = vsel %vm2650_vm15, %v2623_v52, %v5235_v53  ;;  %v2294_v58 = vshll.u32 %v5266_v55, 16  ;;  %v2559_v34 = vsel %vm2551_vm12, %v2526_v40, %v5162_v44  ;;  %v1293_v25 = vshll.u32 %v5288_v59, 16  ;;  %v3671_v49 = vld [vmem:[#allocation2 + $0x9c] sm:$0xe]  ;;  %v3574_v52 = vld [vmem:[#allocation2 + $0xa8] sm:$0xf] }
  0xe0   : > { %1596 = vrot.lane.b32.xlu1 %v5173_v4, %s4304_s10  ;;  %v796_v4 = vsel %vm4490_vm9, %v621_v18, %v795_v60  ;;  %v2291_v60 = vrot.slane %v2289_v12, 1  ;;  %v2689_v38 = vsel %vm2683_vm1, %v2656_v29, %v2091_v54  ;;  %v1286_v18 = vshrl.u32 %v5263_v37, 16  ;;  %v872_v29 = vld [vmem:[#allocation2 + $0x90] sm:$0xe]  ;;  %s3547_s7 = sshll.u32 %s5940_s6, 2 }
  0xe1   : > { %1594 = vrot.lane.b32.xlu0 %v5176_v47, %s4304_s10  ;;  %797 = vst [vmem:[#allocation2 + $0xbc] sm:$0x1] %v796_v4  ;;  %v799_v47 = vsel %vm4463_vm7, %v628_v42, %v798_v9  ;;  %v2592_v24 = vsel %vm2584_vm13, %v2559_v34, %v5180_v57  ;;  %v1290_v26 = vrot.slane %v1288_v41, 1  ;;  %v2304_v12 = vor.u32 %v2303_v33, %v2299_v22  ;;  %v5358_v34 = vld [vmem:[#allocation2 + $0xa0] sm:$0xf] }
  0xe2   : > { %v2365_v62 = vpop.permute.xlu1 %2364  ;;  %800 = vst [vmem:[#allocation2 + $0xc0] sm:$0xf] %v799_v47  ;;  %v2625_v44 = vsel %vm2617_vm14, %v2592_v24, %v5204_v3  ;;  %v1300_v8 = vshll.u32 %v5302_v21, 16  ;;  %v2292_v42 = vor.u32 %v2291_v60, %v2287_v31  ;;  %v631_v11 = vshrl.u32 %v363_v46, 16 }
  0xe3   : > { %v2363_v51 = vpop.permute.xlu0 %2362  ;;  %v2658_v57 = vsel %vm2650_vm15, %v2625_v44, %v5226_v1  ;;  %v1295_v5 = vrot.slane %v1293_v25, 1  ;;  %v2468_v19 = vrot.slane %v3814_v63, 1  ;;  %v1291_v1 = vor.u32 %v1290_v26, %v1286_v18  ;;  %v873_v63 = vld [vmem:[#allocation2 + $0x9c] sm:$0xe]  ;;  %v802_v26 = vld [vmem:[#allocation2 + $0xc8] sm:$0x1] }
  0xe4   : > { %1868 = vrot.lane.b32.xlu1 %v1797_v10, %s4308_s26  ;;  %v2722_v53 = vsel %vm2716_vm4, %v2689_v38, %v2363_v51  ;;  %v2308_v10 = vrot.slane %v2306_v28, 1  ;;  %v2691_v3 = vsel %vm2683_vm1, %v2658_v57, %v5249_v7  ;;  %v1298_v51 = vshrl.u32 %v5302_v21, 16 }
  0xe5   : > { %1866 = vrot.lane.b32.xlu0 %v1785_v45, %s4308_s26  ;;  %v2296_v45 = vrot.slane %v2294_v58, 1  ;;  %v1302_v7 = vrot.slane %v1300_v8, 1  ;;  %v1305_v41 = vshll.u32 %v5326_v17, 16  ;;  %v634_v22 = vshll.u32 %v363_v46, 16 }
  0xe6   : > { %v5310_v32 = vpop.permute.xlu1 %1341  ;;  %v2309_v31 = vsel %vm1140_vm6, %v2304_v12, %v2308_v10  ;;  %v3815_v33 = vcombine.low %v3671_v49, %v5230_v15  ;;  %v1296_v58 = vsel %vm1140_vm6, %v1291_v1, %v1295_v5  ;;  %v629_v38 = vrot.slane %v5246_v2, 4  ;;  %v3608_v49 = vld [vmem:[#allocation2 + $0x9c] sm:$0xe] }
  0xe7   : > { %v2491_v9 = vpop.permute.xlu0 %2490  ;;  %v2297_v40 = vsel %vm1140_vm6, %v2292_v42, %v2296_v45  ;;  %v1303_v18 = vor.u32 %v1302_v7, %v1298_v51  ;;  %v1307_v25 = vrot.slane %v1305_v41, 1  ;;  %v3721_v46 = vcombine.low %v873_v63, %v5280_v13  ;;  %v5400_v41 = vld [vmem:[#allocation2 + $0xb8] sm:$0xf] }
  0xe8   : > { %1996 = vrot.lane.b32.xlu1 %v1961_v35, %s4306_s22  ;;  %v2755_v54 = vsel %vm2749_vm3, %v2722_v53, %v2491_v9  ;;  %v2724_v35 = vsel %vm2716_vm4, %v2691_v3, %v2365_v62  ;;  %v5350_v62 = vld [vmem:[#allocation2 + $0xac] sm:$0xf]  ;;  %v3720_v9 = vcombine.low %v872_v29, %v5244_v14  ;;  %v2471_v44 = vrot.slane %v3815_v33, 1  ;;  %v3636_v33 = vld [vmem:[#allocation2 + $0xa8] sm:$0xf] }
  0xe9   : > { %1994 = vrot.lane.b32.xlu0 %v1958_v61, %s4306_s22  ;;  %3937 = vmatprep.mubr.msk.bf16.mxu0 %vm2802_vm5, %v2755_v54  ;;  %v2469_v61 = vrot.slane %v5266_v55, 1  ;;  %v633_v55 = vrot.slane %v631_v11, 7  ;;  %v5363_v15 = vcombine.low %v3574_v52, %v5350_v62  ;;  %v2472_v2 = vrot.slane %v5260_v30, 1  ;;  %v5381_v11 = vld [vmem:[#allocation2 + $0xb0] ss:$0 sps:$4 sm:$0x11]  }
  0xea   : > { %v5333_v4 = vpop.permute.xlu1 %1343  ;;  %v1454_v8 = vrot.slane %v5326_v17, 1  ;;  %v1308_v14 = vsel %vm1140_vm6, %v1303_v18, %v1307_v25  ;;  %v1453_v42 = vrot.slane %v3721_v46, 1  ;;  %v4163_v17 = vld [vmem:[#allocation2 + $0xa4] ss:$0 sps:$4 sm:$0x11]   ;;  %v1450_v5 = vrot.slane %v3720_v9, 1 }
  0xeb   : > { %v2493_v47 = vpop.permute.xlu0 %2492  ;;  %v2470_v53 = vsel %vm1413_vm2, %v2468_v19, %v2469_v61  ;;  %v636_v10 = vor.u32 %v634_v22, %v633_v55  ;;  %v638_v13 = vrot.slane %v633_v55, 4  ;;  %v1813_v30 = vshll.u32 %v5363_v15, 16  ;;  %v5412_v46 = vld [vmem:[#allocation2 + $0xac] sm:$0xf] }
  0xec   : > { %2108 = vrot.lane.b32.xlu1 %v5242_v39, %s4305_s11  ;;  %v2757_v28 = vsel %vm2749_vm3, %v2724_v35, %v2493_v47  ;;  %v2473_v27 = vsel %vm1413_vm2, %v2471_v44, %v2472_v2  ;;  %v1451_v19 = vrot.slane %v5288_v59, 1  ;;  %v1455_v56 = vsel %vm1413_vm2, %v1453_v42, %v1454_v8  ;;  %v3638_v59 = vld [vmem:[#allocation2 + $0xb4] sm:$0xf]  ;;  %v5423_v8 = vld [vmem:[#allocation2 + $0xbc] ss:$0 sps:$4 sm:$0x11]  }
  0xed   : > { %2106 = vrot.lane.b32.xlu0 %v5239_v48, %s4305_s11  ;;  %3938 = vmatmul.mubr.msk.bf16.gmra.mrb[4].mxu0 %vm2802_vm5, %v2757_v28  ;;  %v3572_v48 = vld [vmem:[#allocation2 + $0x9c] sm:$0xf]  ;;  %v637_v57 = vsel %vm4471_vm8, %v629_v38, %v636_v10  ;;  %v803_v3 = vsel %vm4490_vm9, %v638_v13, %v802_v26  ;;  %v1811_v1 = vshrl.u32 %v5363_v15, 16  ;;  %v1815_v61 = vrot.slane %v1813_v30, 1  ;;  %v3609_v28 = vld [vmem:[#allocation2 + $0xa8] sm:$0xe] }
  0xee   : > { %v5348_v39 = vpop.permute.xlu1 %1472  ;;  %v5372_v54 = vcombine.low %v3572_v48, %v5358_v34  ;;  %801 = vst.msk [vmem:[#allocation2 + $0xc4] sm:$0xf] %vm276_vm0, %v637_v57  ;;  %804 = vst [vmem:[#allocation2 + $0xc8] sm:$0x1] %v803_v3  ;;  %v1818_v51 = vshll.u32 %v5381_v11, 16  ;;  %v1806_v7 = vshll.u32 %v4163_v17, 16  ;;  %v1452_v63 = vsel %vm1413_vm2, %v1450_v5, %v1451_v19 }
  0xef   : > { %v5354_v60 = vpop.permute.xlu0 %1470  ;;  %v3768_v22 = vcombine.low %v3608_v49, %v5358_v34  ;;  %v840_v48 = vld [vmem:[#allocation2 + $0xa8] sm:$0xf]  ;;  %v1816_v38 = vor.u32 %v1815_v61, %v1811_v1  ;;  %v5410_v25 = vcombine.low %v3638_v59, %v5400_v41  ;;  %v1963_v44 = vrot.slane %v4163_v17, 1  ;;  %v5430_v30 = vld [vmem:[#allocation2 + $0xb0] ss:$0 sps:$4 sm:$0x11]  }
  0xf0   : > { %2380 = vrot.lane.b32.xlu1 %v2309_v31, %s4309_s29  ;;  %v1801_v35 = vshll.u32 %v5372_v54, 16  ;;  %v1799_v52 = vshrl.u32 %v5372_v54, 16  ;;  %v1820_v18 = vrot.slane %v1818_v51, 1  ;;  %v1808_v10 = vrot.slane %v1806_v7, 1  ;;  %v842_v17 = vld [vmem:[#allocation2 + $0xb4] sm:$0xf] }
  0xf1   : > { %2378 = vrot.lane.b32.xlu0 %v2297_v40, %s4309_s29  ;;  %v5405_v40 = vld [vmem:[#allocation2 + $0xac] sm:$0xf]  ;;  %v1962_v26 = vrot.slane %v3768_v22, 1  ;;  %v1966_v13 = vrot.slane %v5381_v11, 1  ;;  %v5426_v57 = vcombine.low %v840_v48, %v5412_v46  ;;  %v2325_v42 = vshll.u32 %v5410_v25, 16 }
  0xf2   : > { %v5366_v24 = vpop.permute.xlu1 %1584  ;;  %v1803_v55 = vrot.slane %v1801_v35, 1  ;;  %v5418_v34 = vcombine.low %v3636_v33, %v5405_v40  ;;  %v2528_v3 = vsel %vm2518_vm11, %v4664_v43, %v5310_v32  ;;  %v2330_v1 = vshll.u32 %v5423_v8, 16  ;;  %v3672_v48 = vld [vmem:[#allocation2 + $0xa8] sm:$0xe] }
  0xf3   : > { %v5374_v12 = vpop.permute.xlu0 %1582  ;;  %v2561_v5 = vsel %vm2551_vm12, %v2528_v3, %v5354_v60  ;;  %v1964_v35 = vsel %vm1413_vm2, %v1962_v26, %v1963_v44  ;;  %v1312_v60 = vshll.u32 %v5426_v57, 16  ;;  %v2323_v51 = vshrl.u32 %v5410_v25, 16 }
  0xf4   : > { %1357 = vrot.lane.b32.xlu1 %v1296_v58, %s4303_s9  ;;  %v3769_v58 = vcombine.low %v3609_v28, %v5350_v62  ;;  %v1804_v9 = vor.u32 %v1803_v55, %v1799_v52  ;;  %v2313_v11 = vshll.u32 %v5418_v34, 16  ;;  %v2311_v49 = vshrl.u32 %v5418_v34, 16 }
  0xf5   : > { %2506 = vrot.lane.b32.xlu0 %v2470_v53, %s4307_s24  ;;  %v2594_v43 = vsel %vm2584_vm13, %v2561_v5, %v5374_v12  ;;  %v2327_v28 = vrot.slane %v2325_v42, 1  ;;  %v2530_v12 = vsel %vm2518_vm11, %v4691_v0, %v5333_v4  ;;  %v2318_v55 = vshll.u32 %v5430_v30, 16  ;;  %v3673_v5 = vld [vmem:[#allocation2 + $0xb4] sm:$0xe] }
  0xf6   : > { %v5388_v45 = vpop.permute.xlu1 %1856  ;;  %v1965_v2 = vrot.slane %v3769_v58, 1  ;;  %v1809_v19 = vsel %vm1140_vm6, %v1804_v9, %v1808_v10  ;;  %v2315_v52 = vrot.slane %v2313_v11, 1  ;;  %v1310_v33 = vshrl.u32 %v5426_v57, 16  ;;  %v5475_v9 = vld [vmem:[#allocation2 + $0xbc] ss:$0 sps:$4 sm:$0x11]  }
  0xf7   : > { %v1855_v47 = vpop.permute.xlu0 %1854  ;;  %v2328_v26 = vor.u32 %v2327_v28, %v2323_v51  ;;  %v3576_v28 = vld [vmem:[#allocation2 + $0xb4] sm:$0xf]  ;;  %vm3128_vm0 = vcmask 60416  }
  0xf8   : > { %1359 = vrot.lane.b32.xlu1 %v1308_v14, %s4303_s9  ;;  %v1821_v14 = vsel %vm1140_vm6, %v1816_v38, %v1820_v18  ;;  %v2627_v61 = vsel %vm2617_vm14, %v2594_v43, %v1855_v47  ;;  %v2563_v47 = vsel %vm2551_vm12, %v2530_v12, %v5348_v39  ;;  %v2332_v38 = vrot.slane %v2330_v1, 1  ;;  %v5502_v43 = vld [vmem:[#allocation2 + $0xc4] sm:$0xf]  ;;  %v5511_v12 = vld [vmem:[#allocation2 + $0xb8] sm:$0xf] }
  0xf9   : > { %2508 = vrot.lane.b32.xlu0 %v2473_v27, %s4307_s24  ;;  %v5438_v27 = vld [vmem:[#allocation2 + $0xb8] sm:$0xf]  ;;  %v2596_v0 = vsel %vm2584_vm13, %v2563_v47, %v5366_v24  ;;  %v1314_v18 = vrot.slane %v1312_v60, 1  ;;  %v2475_v1 = vrot.slane %v5430_v30, 1  ;;  %v3817_v60 = vcombine.low %v3673_v5, %v5400_v41 }
  0xfa   : > { %v5398_v31 = vpop.permute.xlu1 %1984  ;;  %v5456_v7 = vcombine.low %v842_v17, %v5438_v27  ;;  %v2629_v39 = vsel %vm2617_vm14, %v2596_v0, %v5388_v45  ;;  %v3816_v45 = vcombine.low %v3672_v48, %v5405_v40  ;;  %v1329_v17 = vshll.u32 %v5475_v9, 16 }
  0xfb   : > { %v1983_v29 = vpop.permute.xlu0 %1982  ;;  %v2662_v24 = vsel %vm2650_vm15, %v2629_v39, %v5398_v31  ;;  %v1315_v31 = vor.u32 %v1314_v18, %v1310_v33  ;;  %v2477_v33 = vrot.slane %v3817_v60, 1  ;;  %v3738_v48 = vcombine.low %v3576_v28, %v5511_v12 }
  0xfc   : > { %1488 = vrot.lane.b32.xlu1 %v1455_v56, %s4302_s8  ;;  %v5445_v56 = vld [vmem:[#allocation2 + $0xb0] ss:$0 sps:$4 sm:$0x11]   ;;  %v2660_v59 = vsel %vm2650_vm15, %v2627_v61, %v1983_v29  ;;  %v1324_v44 = vshll.u32 %v5456_v7, 16  ;;  %v874_v61 = vld [vmem:[#allocation2 + $0xa8] sm:$0xe] }
  0xfd   : > { %1486 = vrot.lane.b32.xlu0 %v1452_v63, %s4302_s8  ;;  %v1317_v58 = vshll.u32 %v5445_v56, 16  ;;  %v3722_v41 = vcombine.low %v874_v61, %v5412_v46 }
  0xfe   : > { %v5415_v53 = vpop.permute.xlu1 %2096 }
  0xff   : > { %v2095_v62 = vpop.permute.xlu0 %2094  ;;  %v1319_v11 = vrot.slane %v1317_v58, 1  ;;  %v2478_v58 = vrot.slane %v5423_v8, 1  ;;  %v1457_v8 = vrot.slane %v5445_v56, 1 }
 0x100   : > { %1600 = vrot.lane.b32.xlu1 %v5363_v15, %s4304_s10  ;;  %v2693_v22 = vsel %vm2683_vm1, %v2660_v59, %v2095_v62 }
 0x101   : > { %1598 = vrot.lane.b32.xlu0 %v5372_v54, %s4304_s10  ;;  %v1967_v54 = vsel %vm1413_vm2, %v1965_v2, %v1966_v13  ;;  %v2695_v2 = vsel %vm2683_vm1, %v2662_v24, %v5415_v53  ;;  %v2316_v13 = vor.u32 %v2315_v52, %v2311_v49  ;;  %v1322_v53 = vshrl.u32 %v5456_v7, 16 }
 0x102   : > { %v2369_v15 = vpop.permute.xlu1 %2368  ;;  %v1326_v49 = vrot.slane %v1324_v44, 1  ;;  %v1331_v52 = vrot.slane %v1329_v17, 1  ;;  %v2479_v39 = vsel %vm1413_vm2, %v2477_v33, %v2478_v58  ;;  %v1825_v44 = vshll.u32 %v3738_v48, 16 }
 0x103   : > { %v2367_v32 = vpop.permute.xlu0 %2366  ;;  %v2728_v42 = vsel %vm2716_vm4, %v2695_v2, %v2369_v15  ;;  %v3578_v15 = vld [vmem:[#allocation2 + $0xc0] sm:$0xf] }
 0x104   : > { %1872 = vrot.lane.b32.xlu1 %v1821_v14, %s4308_s26  ;;  %v2726_v4 = vsel %vm2716_vm4, %v2693_v22, %v2367_v32  ;;  %v2320_v14 = vrot.slane %v2318_v55, 1  ;;  %v1327_v59 = vor.u32 %v1326_v49, %v1322_v53  ;;  %v3739_v47 = vcombine.low %v3578_v15, %v5502_v43  ;;  %v3640_v53 = vld [vmem:[#allocation2 + $0xc0] sm:$0xf]  ;;  %v5542_v49 = vld [vmem:[#allocation2 + $0xc4] sm:$0xf] }
 0x105   : > { %1870 = vrot.lane.b32.xlu0 %v1809_v19, %s4308_s26  ;;  %v1827_v17 = vrot.slane %v1825_v44, 1  ;;  %v3786_v28 = vcombine.low %v3640_v53, %v5542_v49 }
 0x106   : > { %v5463_v63 = vpop.permute.xlu1 %1345  ;;  %v2321_v32 = vsel %vm1140_vm6, %v2316_v13, %v2320_v14  ;;  %v1837_v18 = vshll.u32 %v3739_v47, 16 }
 0x107   : > { %v2495_v29 = vpop.permute.xlu0 %2494  ;;  %v2532_v33 = vsel %vm2518_vm11, %v4784_v23, %v5463_v63 }
 0x108   : > { %2000 = vrot.lane.b32.xlu1 %v1967_v54, %s4306_s22  ;;  %v2759_v10 = vsel %vm2749_vm3, %v2726_v4, %v2495_v29  ;;  %v2474_v54 = vrot.slane %v3816_v45, 1  ;;  %v1460_v29 = vrot.slane %v5475_v9, 1  ;;  %v1835_v9 = vshrl.u32 %v3739_v47, 16 }
 0x109   : > { %1998 = vrot.lane.b32.xlu0 %v1964_v35, %s4306_s22  ;;  %3941 = vmatprep.mubr.msk.bf16.mxu0 %vm2802_vm5, %v2759_v10  ;;  %v2333_v35 = vsel %vm1140_vm6, %v2328_v26, %v2332_v38  ;;  %v4179_v38 = vld [vmem:[#allocation2 + $0xc8] ss:$0 sps:$4 sm:$0x11]   ;;  %v1456_v10 = vrot.slane %v3722_v41, 1  ;;  %v1839_v13 = vrot.slane %v1837_v18, 1 }
 0x10a   : > { %v5485_v62 = vpop.permute.xlu1 %1347  ;;  %v2476_v22 = vsel %vm1413_vm2, %v2474_v54, %v2475_v1  ;;  %v5530_v26 = vld [vmem:[#allocation2 + $0xbc] ss:$0 sps:$4 sm:$0x11]   ;;  %v1842_v14 = vshll.u32 %v4179_v38, 16  ;;  %v1972_v41 = vrot.slane %v4179_v38, 1  ;;  %v2337_v38 = vshll.u32 %v3786_v28, 16 }
 0x10b   : > { %v2497_v3 = vpop.permute.xlu0 %2496  ;;  %v1458_v56 = vsel %vm1413_vm2, %v1456_v10, %v1457_v8  ;;  %v1830_v5 = vshll.u32 %v5530_v26, 16 }
 0x10c   : > { %2112 = vrot.lane.b32.xlu1 %v5410_v25, %s4305_s11  ;;  %v2761_v19 = vsel %vm2749_vm3, %v2728_v42, %v2497_v3  ;;  %v875_v25 = vld [vmem:[#allocation2 + $0xb4] sm:$0xe]  ;;  %v3611_v42 = vld [vmem:[#allocation2 + $0xc0] sm:$0xe]  ;;  %v3642_v3 = vld [vmem:[#allocation2 + $0xcc] sm:$0xf] }
 0x10d   : > { %2110 = vrot.lane.b32.xlu0 %v5418_v34, %s4305_s11  ;;  %3942 = vmatmul.mubr.msk.bf16.gmra.mrb[8].mxu0 %vm2802_vm5, %v2761_v19  ;;  %v1320_v34 = vsel %vm1140_vm6, %v1315_v31, %v1319_v11  ;;  %v3723_v55 = vcombine.low %v875_v25, %v5438_v27  ;;  %v1332_v27 = vsel %vm1140_vm6, %v1327_v59, %v1331_v52  ;;  %v5537_v31 = vld [vmem:[#allocation2 + $0xd0] sm:$0xf]  ;;  %v1823_v11 = vshrl.u32 %v3738_v48, 16  ;;  %v3610_v19 = vld [vmem:[#allocation2 + $0xb4] sm:$0xe] }
 0x10e   : > { %v5500_v40 = vpop.permute.xlu1 %1476  ;;  %v1840_v25 = vor.u32 %v1839_v13, %v1835_v9  ;;  %v1844_v15 = vrot.slane %v1842_v14, 1  ;;  %v3787_v54 = vcombine.low %v3642_v3, %v5537_v31  ;;  %v3770_v60 = vcombine.low %v3610_v19, %v5511_v12 }
 0x10f   : > { %v5507_v51 = vpop.permute.xlu0 %1474  ;;  %v1459_v4 = vrot.slane %v3723_v55, 1  ;;  %v1828_v61 = vor.u32 %v1827_v17, %v1823_v11  ;;  %v2335_v9 = vshrl.u32 %v3786_v28, 16  ;;  %v2339_v14 = vrot.slane %v2337_v38, 1  ;;  %v3674_v11 = vld [vmem:[#allocation2 + $0xc0] sm:$0xe] }
 0x110   : > { %2384 = vrot.lane.b32.xlu1 %v2333_v35, %s4309_s29  ;;  %v1845_v52 = vsel %vm1140_vm6, %v1840_v25, %v1844_v15  ;;  %v1968_v58 = vrot.slane %v3770_v60, 1  ;;  %v2347_v10 = vshrl.u32 %v3787_v54, 16  ;;  %v3818_v15 = vcombine.low %v3674_v11, %v5542_v49 }
 0x111   : > { %2382 = vrot.lane.b32.xlu0 %v2321_v32, %s4309_s29  ;;  %v1461_v2 = vsel %vm1413_vm2, %v1459_v4, %v1460_v29  ;;  %v3771_v32 = vcombine.low %v3611_v42, %v5502_v43  ;;  %v2349_v43 = vshll.u32 %v3787_v54, 16  ;;  %v4186_v29 = vld [vmem:[#allocation2 + $0xc8] ss:$0 sps:$4 sm:$0x11]   ;;  %v2340_v25 = vor.u32 %v2339_v14, %v2335_v9 }
 0x112   : > { %v5516_v30 = vpop.permute.xlu1 %1588  ;;  %v2342_v42 = vshll.u32 %v4186_v29, 16  ;;  %v2480_v49 = vrot.slane %v3818_v15, 1 }
 0x113   : > { %v1587_v0 = vpop.permute.xlu0 %1586  ;;  %v1971_v55 = vrot.slane %v3771_v32, 1 }
 0x114   : > { %1361 = vrot.lane.b32.xlu1 %v1320_v34, %s4303_s9  ;;  %v1832_v34 = vrot.slane %v1830_v5, 1 }
 0x115   : > { %2510 = vrot.lane.b32.xlu0 %v2476_v22, %s4307_s24  ;;  %v5551_v22 = vld [vmem:[#allocation2 + $0xd4] ss:$0 sps:$4 sm:$0x11]   ;;  %v1973_v63 = vsel %vm1413_vm2, %v1971_v55, %v1972_v41 }
 0x116   : > { %v5526_v46 = vpop.permute.xlu1 %1860  ;;  %v1833_v4 = vsel %vm1140_vm6, %v1828_v61, %v1832_v34  ;;  %v2354_v8 = vshll.u32 %v5551_v22, 16  ;;  %v2484_v34 = vrot.slane %v5551_v22, 1 }
 0x117   : > { %v1859_v24 = vpop.permute.xlu0 %1858 }
 0x118   : > { %1363 = vrot.lane.b32.xlu1 %v1332_v27, %s4303_s9  ;;  %v1969_v27 = vrot.slane %v5530_v26, 1  ;;  %v3675_v26 = vld [vmem:[#allocation2 + $0xcc] sm:$0xe]  ;;  %v2356_v19 = vrot.slane %v2354_v8, 1 }
 0x119   : > { %2512 = vrot.lane.b32.xlu0 %v2479_v39, %s4307_s24 }
 0x11a   : > { %v5535_v45 = vpop.permute.xlu1 %1988 }
 0x11b   : > { %v1987_v35 = vpop.permute.xlu0 %1986 }
 0x11c   : > { %1492 = vrot.lane.b32.xlu1 %v1461_v2, %s4302_s8  ;;  %v1970_v2 = vsel %vm1413_vm2, %v1968_v58, %v1969_v27 }
 0x11d   : > { %1490 = vrot.lane.b32.xlu0 %v1458_v56, %s4302_s8  ;;  %v3819_v56 = vcombine.low %v3675_v26, %v5537_v31  ;;  %v2344_v31 = vrot.slane %v2342_v42, 1  ;;  %s4311_s8 = smov [#allocation3]  }
 0x11e   : > { %v2101_v1 = vpop.permute.xlu1 %2100  ;;  %s4193_s9 = sshll.u32 %s4311_s8, 4  ;;  %s4194_s9 = int_to_ptr.vmem [resolvable:$false] %s4193_s9 }
 0x11f   : > { %v2099_v59 = vpop.permute.xlu0 %2098  ;;  %v2483_v61 = vrot.slane %v3819_v56, 1 }
 0x120   : > { %1604 = vrot.lane.b32.xlu1 %v3739_v47, %s4304_s10  ;;  %v2565_v47 = vsel %vm2551_vm12, %v2532_v33, %v5507_v51  ;;  %v2534_v51 = vsel %vm2518_vm11, %v4811_v20, %v5485_v62 }
 0x121   : > { %1602 = vrot.lane.b32.xlu0 %v3738_v48, %s4304_s10  ;;  %v2598_v18 = vsel %vm2584_vm13, %v2565_v47, %v1587_v0  ;;  %v2351_v48 = vrot.slane %v2349_v43, 1  ;;  %s5673_s10 = scalar_lea.vmem %s5921_s2, %s3547_s7 }
 0x122   : > { %v2373_v12 = vpop.permute.xlu1 %2372  ;;  %v2631_v23 = vsel %vm2617_vm14, %v2598_v18, %v1859_v24  ;;  %v2567_v24 = vsel %vm2551_vm12, %v2534_v51, %v5500_v40 }
 0x123   : > { %v2371_v39 = vpop.permute.xlu0 %2370  ;;  %v2664_v44 = vsel %vm2650_vm15, %v2631_v23, %v1987_v35  ;;  %v2600_v3 = vsel %vm2584_vm13, %v2567_v24, %v5516_v30  ;;  %v2352_v5 = vor.u32 %v2351_v48, %v2347_v10 }
 0x124   : > { %1876 = vrot.lane.b32.xlu1 %v1845_v52, %s4308_s26  ;;  %v2697_v13 = vsel %vm2683_vm1, %v2664_v44, %v2099_v59  ;;  %v2633_v17 = vsel %vm2617_vm14, %v2600_v3, %v5526_v46  ;;  %v2345_v59 = vsel %vm1140_vm6, %v2340_v25, %v2344_v31  ;;  %v2481_v52 = vrot.slane %v4186_v29, 1 }
 0x125   : > { %1874 = vrot.lane.b32.xlu0 %v1833_v4, %s4308_s26  ;;  %v2730_v20 = vsel %vm2716_vm4, %v2697_v13, %v2371_v39  ;;  %v2666_v35 = vsel %vm2650_vm15, %v2633_v17, %v5535_v45  ;;  %v2357_v45 = vsel %vm1140_vm6, %v2352_v5, %v2356_v19 }
 0x126   : > { %v1350_v0 = vpop.permute.xlu1 %1349  ;;  %v2699_v53 = vsel %vm2683_vm1, %v2666_v35, %v2101_v1  ;;  %v2482_v43 = vsel %vm1413_vm2, %v2480_v49, %v2481_v52 }
 0x127   : > { %v2499_v62 = vpop.permute.xlu0 %2498  ;;  %v2732_v46 = vsel %vm2716_vm4, %v2699_v53, %v2373_v12  ;;  %v2536_v4 = vsel %vm2518_vm11, %v4904_v6, %v1350_v0 }
 0x128   : > { %2004 = vrot.lane.b32.xlu1 %v1973_v63, %s4306_s22  ;;  %v2763_v40 = vsel %vm2749_vm3, %v2730_v20, %v2499_v62 }
 0x129   : > { %2002 = vrot.lane.b32.xlu0 %v1970_v2, %s4306_s22  ;;  %3945 = vmatprep.mubr.msk.bf16.mxu0 %vm2802_vm5, %v2763_v40 }
 0x12a   : > { %v1352_v30 = vpop.permute.xlu1 %1351 }
 0x12b   : > { %v2501_v32 = vpop.permute.xlu0 %2500  ;;  %v2538_v23 = vsel %vm2518_vm11, %v4938_v16, %v1352_v30 }
 0x12c   : > { %2116 = vrot.lane.b32.xlu1 %v3787_v54, %s4305_s11  ;;  %v2765_v60 = vsel %vm2749_vm3, %v2732_v46, %v2501_v32  ;;  %v2485_v54 = vsel %vm1413_vm2, %v2483_v61, %v2484_v34  ;;  %vm805_vm2 = vcmask 57344  }
 0x12d   : > { %2114 = vrot.lane.b32.xlu0 %v3786_v28, %s4305_s11  ;;  %3946 = vmatmul.mubr.msk.bf16.gmra.mrb[12].mxu0 %vm2802_vm5, %v2765_v60  ;;  %s5754_s11 = sand.u32 1, %s4283_s16  }
 0x12e   : > { %v1481_v1 = vpop.permute.xlu1 %1480  ;;  %s5757_s12 = scalar_lea.vmem [#allocation3], %s5754_s11  ;;  %s5762_s13 = scalar_lea.vmem [#allocation5], %s5754_s11 }
 0x12f   : > { %v1479_v55 = vpop.permute.xlu0 %1478  ;;  %v2571_v8 = vsel %vm2551_vm12, %v2538_v23, %v1481_v1  ;;  %s3370_s21 = sshll.u32 %s5757_s12, 4  ;;  %s3384_s22 = sshll.u32 %s5762_s13, 4  ;;  %s5839_s21 = int_to_ptr.vmem [resolvable:$true] %s3370_s21  ;;  %s5849_s22 = int_to_ptr.vmem [resolvable:$true] %s3384_s22 }
 0x130   : > { %2388 = vrot.lane.b32.xlu1 %v2357_v45, %s4309_s29  ;;  %v2569_v38 = vsel %vm2551_vm12, %v2536_v4, %v1479_v55  ;;  %s3348_s6 = scalar_lea.sflag [#allocation4], %s5754_s11  ;;  %s4189_s7 = scalar_lea.vmem %s5839_s21, 16 }
 0x131   : > { %2386 = vrot.lane.b32.xlu0 %v2345_v59, %s4309_s29  ;;  %s5837_s29 = scalar_lea.hbm %s5922_s3, %s3871_s14  ;;  %p4190_p13 = scmp.ne.s32.totalorder %s5839_s21, %s4189_s7 }
 0x132   : > { %v1593_v41 = vpop.permute.xlu1 %1592  ;;  %p4196_p2 = scmp.lt.s32.totalorder %s5839_s21, %s4194_s9 }
 0x133   : > { %v1591_v22 = vpop.permute.xlu0 %1590  ;;  %v2604_v6 = vsel %vm2584_vm13, %v2571_v8, %v1593_v41  ;;  %p4191_p0 = pnand %p4190_p13, %p4378_p4 }
 0x134   : > { %2516 = vrot.lane.b32.xlu1 %v2485_v54, %s4307_s24  ;;  %v2602_v18 = vsel %vm2584_vm13, %v2569_v38, %v1591_v22 }
 0x135   : > { %2514 = vrot.lane.b32.xlu0 %v2482_v43, %s4307_s24  ;;  %p4192_p1 = pneg %p4191_p0 }
 0x136   : > { %v1865_v28 = vpop.permute.xlu1 %1864 }
 0x137   : > { %v1863_v33 = vpop.permute.xlu0 %1862  ;;  %v2637_v0 = vsel %vm2617_vm14, %v2604_v6, %v1865_v28 }
 0x138   : > { %v2635_v10 = vsel %vm2617_vm14, %v2602_v18, %v1863_v33 }
 0x13a   : > { %v1993_v12 = vpop.permute.xlu1 %1992 }
 0x13b   : > { %v1991_v58 = vpop.permute.xlu0 %1990  ;;  %v2670_v9 = vsel %vm2650_vm15, %v2637_v0, %v1993_v12 }
 0x13c   : > { %v2668_v63 = vsel %vm2650_vm15, %v2635_v10, %v1991_v58 }
 0x13e   : > { %v2105_v27 = vpop.permute.xlu1 %2104 }
 0x13f   : > { %v2103_v47 = vpop.permute.xlu0 %2102  ;;  %v2703_v24 = vsel %vm2683_vm1, %v2670_v9, %v2105_v27 }
 0x140   : > { %v2701_v26 = vsel %vm2683_vm1, %v2668_v63, %v2103_v47 }
 0x142   : > { %v2377_v29 = vpop.permute.xlu1 %2376 }
 0x143   : > { %v2375_v39 = vpop.permute.xlu0 %2374  ;;  %v2736_v13 = vsel %vm2716_vm4, %v2703_v24, %v2377_v29 }
 0x144   : > { %v2734_v51 = vsel %vm2716_vm4, %v2701_v26, %v2375_v39 }
 0x146   : > { %v1354_v48 = vpop.permute.xlu1 %1353 }
 0x147   : > { %v2503_v44 = vpop.permute.xlu0 %2502  ;;  %v2540_v30 = vsel %vm2518_vm11, %v5070_v50, %v1354_v48 }
 0x148   : > { %v2767_v2 = vsel %vm2749_vm3, %v2734_v51, %v2503_v44 }
 0x149   : > { %3949 = vmatprep.mubr.msk.bf16.mxu1 %vm2802_vm5, %v2767_v2 }
 0x14a   : > { %v1356_v16 = vpop.permute.xlu1 %1355 }
 0x14b   : > { %v2505_v14 = vpop.permute.xlu0 %2504  ;;  %v2542_v32 = vsel %vm2518_vm11, %v5110_v36, %v1356_v16 }
 0x14c   : > { %v2769_v42 = vsel %vm2749_vm3, %v2736_v13, %v2505_v14 }
 0x14d   : > { %3950 = vmatmul.mubr.msk.bf16.vlgmr.msra.gmra.mrb[0].mxu1 %vm2802_vm5, %v2769_v42 }
 0x14e   : > { %v1485_v3 = vpop.permute.xlu1 %1484 }
 0x14f   : > { %v1483_v20 = vpop.permute.xlu0 %1482  ;;  %v2575_v61 = vsel %vm2551_vm12, %v2542_v32, %v1485_v3 }
 0x150   : > { %v2573_v25 = vsel %vm2551_vm12, %v2540_v30, %v1483_v20 }
 0x152   : > { %v1597_v62 = vpop.permute.xlu1 %1596 }
 0x153   : > { %v1595_v56 = vpop.permute.xlu0 %1594  ;;  %v2608_v50 = vsel %vm2584_vm13, %v2575_v61, %v1597_v62 }
 0x154   : > { %v2606_v31 = vsel %vm2584_vm13, %v2573_v25, %v1595_v56 }
 0x156   : > { %v1869_v11 = vpop.permute.xlu1 %1868 }
 0x157   : > { %v1867_v17 = vpop.permute.xlu0 %1866  ;;  %v2641_v49 = vsel %vm2617_vm14, %v2608_v50, %v1869_v11 }
 0x158   : > { %v2639_v46 = vsel %vm2617_vm14, %v2606_v31, %v1867_v17 }
 0x15a   : > { %v1997_v40 = vpop.permute.xlu1 %1996 }
 0x15b   : > { %v1995_v5 = vpop.permute.xlu0 %1994  ;;  %v2674_v55 = vsel %vm2650_vm15, %v2641_v49, %v1997_v40 }
 0x15c   : > { %v2672_v60 = vsel %vm2650_vm15, %v2639_v46, %v1995_v5 }
 0x15e   : > { %v2109_v19 = vpop.permute.xlu1 %2108 }
 0x15f   : > { %v2107_v35 = vpop.permute.xlu0 %2106  ;;  %v2707_v54 = vsel %vm2683_vm1, %v2674_v55, %v2109_v19 }
 0x160   : > { %v2705_v34 = vsel %vm2683_vm1, %v2672_v60, %v2107_v35 }
 0x162   : > { %v2381_v53 = vpop.permute.xlu1 %2380 }
 0x163   : > { %v2379_v15 = vpop.permute.xlu0 %2378  ;;  %v2740_v41 = vsel %vm2716_vm4, %v2707_v54, %v2381_v53 }
 0x164   : > { %v2738_v1 = vsel %vm2716_vm4, %v2705_v34, %v2379_v15 }
 0x166   : > { %v1358_v45 = vpop.permute.xlu1 %1357 }
 0x167   : > { %v2507_v59 = vpop.permute.xlu0 %2506  ;;  %v2544_v39 = vsel %vm2518_vm11, %v5263_v37, %v1358_v45 }
 0x168   : > { %v2771_v52 = vsel %vm2749_vm3, %v2738_v1, %v2507_v59 }
 0x169   : > { %3953 = vmatprep.mubr.msk.bf16.mxu1 %vm2802_vm5, %v2771_v52 }
 0x16a   : > { %v1360_v36 = vpop.permute.xlu1 %1359 }
 0x16b   : > { %v2509_v43 = vpop.permute.xlu0 %2508  ;;  %v2546_v26 = vsel %vm2518_vm11, %v5302_v21, %v1360_v36 }
 0x16c   : > { %v2773_v22 = vsel %vm2749_vm3, %v2740_v41, %v2509_v43 }
 0x16d   : > { %3954 = vmatmul.mubr.msk.bf16.gmra.mrb[4].mxu1 %vm2802_vm5, %v2773_v22 }
 0x16e   : > { %v1489_v28 = vpop.permute.xlu1 %1488 }
 0x16f   : > { %v1487_v33 = vpop.permute.xlu0 %1486  ;;  %v2579_v44 = vsel %vm2551_vm12, %v2546_v26, %v1489_v28 }
 0x170   : > { %v2577_v23 = vsel %vm2551_vm12, %v2544_v39, %v1487_v33 }
 0x172   : > { %v1601_v12 = vpop.permute.xlu1 %1600 }
 0x173   : > { %v1599_v58 = vpop.permute.xlu0 %1598  ;;  %v2612_v37 = vsel %vm2584_vm13, %v2579_v44, %v1601_v12 }
 0x174   : > { %v2610_v63 = vsel %vm2584_vm13, %v2577_v23, %v1599_v58 }
 0x176   : > { %v1873_v27 = vpop.permute.xlu1 %1872 }
 0x177   : > { %v1871_v47 = vpop.permute.xlu0 %1870  ;;  %v2645_v16 = vsel %vm2617_vm14, %v2612_v37, %v1873_v27 }
 0x178   : > { %v2643_v8 = vsel %vm2617_vm14, %v2610_v63, %v1871_v47 }
 0x17a   : > { %v2001_v4 = vpop.permute.xlu1 %2000 }
 0x17b   : > { %v1999_v29 = vpop.permute.xlu0 %1998  ;;  %v2678_v13 = vsel %vm2650_vm15, %v2645_v16, %v2001_v4 }
 0x17c   : > { %v2676_v6 = vsel %vm2650_vm15, %v2643_v8, %v1999_v29 }
 0x17e   : > { %v2113_v38 = vpop.permute.xlu1 %2112 }
 0x17f   : > { %v2111_v18 = vpop.permute.xlu0 %2110  ;;  %v2711_v14 = vsel %vm2683_vm1, %v2678_v13, %v2113_v38 }
 0x180   : > { %v2709_v0 = vsel %vm2683_vm1, %v2676_v6, %v2111_v18 }
 0x182   : > { %v2385_v10 = vpop.permute.xlu1 %2384 }
 0x183   : > { %v2383_v48 = vpop.permute.xlu0 %2382  ;;  %v2744_v42 = vsel %vm2716_vm4, %v2711_v14, %v2385_v10 }
 0x184   : > { %v2742_v2 = vsel %vm2716_vm4, %v2709_v0, %v2383_v48 }
 0x186   : > { %v1362_v51 = vpop.permute.xlu1 %1361 }
 0x187   : > { %v2511_v9 = vpop.permute.xlu0 %2510  ;;  %v2548_v53 = vsel %vm2518_vm11, %v5426_v57, %v1362_v51 }
 0x188   : > { %v2775_v24 = vsel %vm2749_vm3, %v2742_v2, %v2511_v9 }
 0x189   : > { %3957 = vmatprep.mubr.msk.bf16.mxu1 %vm2802_vm5, %v2775_v24 }
 0x18a   : > { %v1364_v21 = vpop.permute.xlu1 %1363 }
 0x18b   : > { %v2513_v3 = vpop.permute.xlu0 %2512  ;;  %v2550_v25 = vsel %vm2518_vm11, %v5456_v7, %v1364_v21 }
 0x18c   : > { %v2777_v20 = vsel %vm2749_vm3, %v2744_v42, %v2513_v3 }
 0x18d   : > { %3958 = vmatmul.mubr.msk.bf16.gmra.mrb[8].mxu1 %vm2802_vm5, %v2777_v20 }
 0x18e   : > { %v1493_v62 = vpop.permute.xlu1 %1492 }
 0x18f   : > { %v1491_v56 = vpop.permute.xlu0 %1490  ;;  %v2583_v15 = vsel %vm2551_vm12, %v2550_v25, %v1493_v62 }
 0x190   : > { %v2581_v46 = vsel %vm2551_vm12, %v2548_v53, %v1491_v56 }
 0x192   : > { %v1605_v11 = vpop.permute.xlu1 %1604 }
 0x193   : > { %v1603_v17 = vpop.permute.xlu0 %1602  ;;  %v2616_v60 = vsel %vm2584_vm13, %v2583_v15, %v1605_v11 }
 0x194   : > { %v2614_v57 = vsel %vm2584_vm13, %v2581_v46, %v1603_v17 }
 0x196   : > { %v1877_v40 = vpop.permute.xlu1 %1876 }
 0x197   : > { %v1875_v5 = vpop.permute.xlu0 %1874  ;;  %v2649_v34 = vsel %vm2617_vm14, %v2616_v60, %v1877_v40 }
 0x198   : > { %v2647_v50 = vsel %vm2617_vm14, %v2614_v57, %v1875_v5 }
 0x19a   : > { %v2005_v19 = vpop.permute.xlu1 %2004 }
 0x19b   : > { %v2003_v35 = vpop.permute.xlu0 %2002  ;;  %v2682_v52 = vsel %vm2650_vm15, %v2649_v34, %v2005_v19 }
 0x19c   : > { %v2680_v55 = vsel %vm2650_vm15, %v2647_v50, %v2003_v35 }
 0x19e   : > { %v2117_v30 = vpop.permute.xlu1 %2116 }
 0x19f   : > { %v2115_v31 = vpop.permute.xlu0 %2114  ;;  %v2715_v58 = vsel %vm2683_vm1, %v2682_v52, %v2117_v30 }
 0x1a0   : > { %v3935_v32 = vpop.f32.mrb[0].mxu0  ;;  %v2713_v27 = vsel %vm2683_vm1, %v2680_v55, %v2115_v31 }
 0x1a1   : > { %v3878_v45 = vpack.c.bf16 %v3935_v32, %v3935_v32  ;;  %v2873_v7 = vpop.f32.mrb[1].mxu0  ;;  %v3237_v36 = vmul.f32 %v3935_v32, %v3935_v32  ;;  %v3165_v47 = vsel %vm2551_vm12, %v3935_v32, 0.0 }
 0x1a2   : > { %v2389_v61 = vpop.permute.xlu1 %2388  ;;  %v3876_v1 = vpack.c.bf16 %v2873_v7, %v2873_v7  ;;  %v3235_v59 = vmul.f32 %v2873_v7, %v2873_v7  ;;  %v3936_v49 = vpop.f32.mrb[2].mxu0  ;;  %v3162_v22 = vsel %vm2551_vm12, %v2873_v7, 0.0 }
 0x1a3   : > { %3131 = vst.msk [vmem:[%s5673_s10 + $0x8] sm:$0xf] %vm3128_vm0, %v3878_v45  ;;  %v3879_v54 = vpack.c.bf16 %v3936_v49, %v3936_v49  ;;  %v2876_v41 = vpop.f32.mrb[3].mxu0  ;;  %v2387_v43 = vpop.permute.xlu0 %2386  ;;  %v3238_v18 = vmul.f32 %v3936_v49, %v3936_v49  ;;  %v2748_v39 = vsel %vm2716_vm4, %v2715_v58, %v2389_v61  ;;  %v3270_v6 = vsel %vm2551_vm12, %v3237_v36, 0.0 }
 0x1a4   : > { %3129 = vst.msk [vmem:[%s5673_s10] sm:$0xf] %vm3128_vm0, %v3876_v1  ;;  %v3877_v28 = vpack.c.bf16 %v2876_v41, %v2876_v41  ;;  %v3163_v33 = vsel %vm2551_vm12, %v2876_v41, 0.0  ;;  %v3236_v12 = vmul.f32 %v2876_v41, %v2876_v41  ;;  %v3267_v38 = vsel %vm2551_vm12, %v3235_v59, 0.0 }
 0x1a5   : > { %3132 = vst.msk [vmem:[%s5673_s10 + $0xc] sm:$0xf] %vm3128_vm0, %v3879_v54  ;;  %v3164_v4 = vadd.f32 %v3163_v33, %v3162_v22  ;;  %v2746_v48 = vsel %vm2716_vm4, %v2713_v27, %v2387_v43  ;;  %v3167_v51 = vsel %vm2551_vm12, %v3936_v49, 0.0  ;;  %v3272_v2 = vsel %vm2551_vm12, %v3238_v18, 0.0 }
 0x1a6   : > { %v2517_v29 = vpop.permute.xlu1 %2516  ;;  %3130 = vst.msk [vmem:[%s5673_s10 + $0x4] sm:$0xf] %vm3128_vm0, %v3877_v28  ;;  %v3268_v10 = vsel %vm2551_vm12, %v3236_v12, 0.0 }
 0x1a7   : > { %v3166_v23 = vadd.f32 %v3165_v47, %v3164_v4  ;;  %v3269_v63 = vadd.f32 %v3268_v10, %v3267_v38  ;;  %v2781_v8 = vsel %vm2749_vm3, %v2748_v39, %v2517_v29  ;;  %v2515_v26 = vpop.permute.xlu0 %2514 }
 0x1a8   : > { %v2779_v44 = vsel %vm2749_vm3, %v2746_v48, %v2515_v26 }
 0x1a9   : > { %v3271_v0 = vadd.f32 %v3270_v6, %v3269_v63  ;;  %3961 = vmatprep.mubr.msk.bf16.mxu1 %vm2802_vm5, %v2779_v44  ;;  %v3168_v37 = vadd.f32 %v3167_v51, %v3166_v23 }
 0x1aa   : > { %3962 = vmatmul.mubr.msk.bf16.gmra.mrb[12].mxu1 %vm2802_vm5, %v2781_v8 }
 0x1ab   : > { %v3273_v9 = vadd.f32 %v3272_v2, %v3271_v0 }
 0x1c0   : > { %v3939_v16 = vpop.f32.mrb[4].mxu0 }
 0x1c1   : > { %v3882_v24 = vpack.c.bf16 %v3939_v16, %v3939_v16  ;;  %v2889_v13 = vpop.f32.mrb[5].mxu0  ;;  %v3241_v5 = vmul.f32 %v3939_v16, %v3939_v16  ;;  %v3173_v53 = vsel %vm2551_vm12, %v3939_v16, 0.0 }
 0x1c2   : > { %v3880_v21 = vpack.c.bf16 %v2889_v13, %v2889_v13  ;;  %v3169_v14 = vsel %vm2551_vm12, %v2889_v13, 0.0  ;;  %v3239_v42 = vmul.f32 %v2889_v13, %v2889_v13  ;;  %v3940_v3 = vpop.f32.mrb[6].mxu0 }
 0x1c3   : > { %3135 = vst.msk [vmem:[%s5673_s10 + $0x18] sm:$0xf] %vm3128_vm0, %v3882_v24  ;;  %v3170_v20 = vadd.f32 %v3169_v14, %v3168_v37  ;;  %v3883_v62 = vpack.c.bf16 %v3940_v3, %v3940_v3  ;;  %v2892_v56 = vpop.f32.mrb[7].mxu0  ;;  %v3242_v25 = vmul.f32 %v3940_v3, %v3940_v3  ;;  %v3175_v46 = vsel %vm2551_vm12, %v3940_v3, 0.0 }
 0x1c4   : > { %3133 = vst.msk [vmem:[%s5673_s10 + $0x10] sm:$0xf] %vm3128_vm0, %v3880_v21  ;;  %v3274_v11 = vsel %vm2551_vm12, %v3239_v42, 0.0  ;;  %v3881_v17 = vpack.c.bf16 %v2892_v56, %v2892_v56  ;;  %v3171_v40 = vsel %vm2551_vm12, %v2892_v56, 0.0  ;;  %v3240_v30 = vmul.f32 %v2892_v56, %v2892_v56 }
 0x1c5   : > { %v3275_v19 = vadd.f32 %v3274_v11, %v3273_v9  ;;  %3136 = vst.msk [vmem:[%s5673_s10 + $0x1c] sm:$0xf] %vm3128_vm0, %v3883_v62  ;;  %v3172_v35 = vadd.f32 %v3171_v40, %v3170_v20  ;;  %v3278_v60 = vsel %vm2551_vm12, %v3241_v5, 0.0  ;;  %v3280_v7 = vsel %vm2551_vm12, %v3242_v25, 0.0 }
 0x1c6   : > { %3134 = vst.msk [vmem:[%s5673_s10 + $0x14] sm:$0xf] %vm3128_vm0, %v3881_v17  ;;  %v3276_v15 = vsel %vm2551_vm12, %v3240_v30, 0.0 }
 0x1c7   : > { %v3174_v31 = vadd.f32 %v3173_v53, %v3172_v35  ;;  %v3277_v32 = vadd.f32 %v3276_v15, %v3275_v19  ;;  %v4310_v15 = vmov 0.0  }
 0x1c8   : > { %806 = vst.msk [vmem:[%s5757_s12] sm:$0x1] %vm805_vm2, %v4310_v15  ;;  %807 = vst.msk [vmem:[%s5762_s13] sm:$0x1] %vm805_vm2, %v4310_v15 }
 0x1c9   : > { %v3176_v57 = vadd.f32 %v3175_v46, %v3174_v31  ;;  %v3279_v45 = vadd.f32 %v3278_v60, %v3277_v32 }
 0x1cb   : > { %v3281_v61 = vadd.f32 %v3280_v7, %v3279_v45 }
 0x1e0   : > { %v3943_v34 = vpop.f32.mrb[8].mxu0 }
 0x1e1   : > { %v3886_v50 = vpack.c.bf16 %v3943_v34, %v3943_v34  ;;  %v2905_v1 = vpop.f32.mrb[9].mxu0  ;;  %v3245_v33 = vmul.f32 %v3943_v34, %v3943_v34  ;;  %v3181_v47 = vsel %vm2551_vm12, %v3943_v34, 0.0 }
 0x1e2   : > { %v3884_v59 = vpack.c.bf16 %v2905_v1, %v2905_v1  ;;  %v3177_v49 = vsel %vm2551_vm12, %v2905_v1, 0.0  ;;  %v3243_v52 = vmul.f32 %v2905_v1, %v2905_v1  ;;  %v3944_v55 = vpop.f32.mrb[10].mxu0 }
 0x1e3   : > { %3139 = vst.msk [vmem:[%s5673_s10 + $0x28] sm:$0xf] %vm3128_vm0, %v3886_v50  ;;  %v3178_v36 = vadd.f32 %v3177_v49, %v3176_v57  ;;  %v3887_v54 = vpack.c.bf16 %v3944_v55, %v3944_v55  ;;  %v2908_v41 = vpop.f32.mrb[11].mxu0  ;;  %v3246_v4 = vmul.f32 %v3944_v55, %v3944_v55  ;;  %v3183_v18 = vsel %vm2551_vm12, %v3944_v55, 0.0 }
 0x1e4   : > { %3137 = vst.msk [vmem:[%s5673_s10 + $0x20] sm:$0xf] %vm3128_vm0, %v3884_v59  ;;  %v3282_v43 = vsel %vm2551_vm12, %v3243_v52, 0.0  ;;  %v3885_v22 = vpack.c.bf16 %v2908_v41, %v2908_v41  ;;  %v3179_v28 = vsel %vm2551_vm12, %v2908_v41, 0.0  ;;  %v3244_v27 = vmul.f32 %v2908_v41, %v2908_v41 }
 0x1e5   : > { %v3283_v12 = vadd.f32 %v3282_v43, %v3281_v61  ;;  %3140 = vst.msk [vmem:[%s5673_s10 + $0x2c] sm:$0xf] %vm3128_vm0, %v3887_v54  ;;  %v3180_v58 = vadd.f32 %v3179_v28, %v3178_v36  ;;  %v3286_v10 = vsel %vm2551_vm12, %v3245_v33, 0.0  ;;  %v3288_v48 = vsel %vm2551_vm12, %v3246_v4, 0.0 }
 0x1e6   : > { %3138 = vst.msk [vmem:[%s5673_s10 + $0x24] sm:$0xf] %vm3128_vm0, %v3885_v22  ;;  %v3284_v38 = vsel %vm2551_vm12, %v3244_v27, 0.0 }
 0x1e7   : > { %v3182_v29 = vadd.f32 %v3181_v47, %v3180_v58  ;;  %v3285_v39 = vadd.f32 %v3284_v38, %v3283_v12 }
 0x1e9   : > { %v3184_v23 = vadd.f32 %v3183_v18, %v3182_v29  ;;  %v3287_v63 = vadd.f32 %v3286_v10, %v3285_v39 }
 0x1eb   : > { %v3289_v8 = vadd.f32 %v3288_v48, %v3287_v63 }
 0x200   : > { %v3947_v26 = vpop.f32.mrb[12].mxu0 }
 0x201   : > { %v3890_v6 = vpack.c.bf16 %v3947_v26, %v3947_v26  ;;  %v2921_v51 = vpop.f32.mrb[13].mxu0  ;;  %v3249_v42 = vmul.f32 %v3947_v26, %v3947_v26  ;;  %v3189_v56 = vsel %vm2551_vm12, %v3947_v26, 0.0 }
 0x202   : > { %v3888_v44 = vpack.c.bf16 %v2921_v51, %v2921_v51  ;;  %v3185_v0 = vsel %vm2551_vm12, %v2921_v51, 0.0  ;;  %v3247_v37 = vmul.f32 %v2921_v51, %v2921_v51  ;;  %v3948_v2 = vpop.f32.mrb[14].mxu0 }
 0x203   : > { %3143 = vst.msk [vmem:[%s5673_s10 + $0x38] sm:$0xf] %vm3128_vm0, %v3890_v6  ;;  %v3186_v9 = vadd.f32 %v3185_v0, %v3184_v23  ;;  %v3891_v16 = vpack.c.bf16 %v3948_v2, %v3948_v2  ;;  %v2924_v24 = vpop.f32.mrb[15].mxu0  ;;  %v3250_v11 = vmul.f32 %v3948_v2, %v3948_v2  ;;  %v3191_v5 = vsel %vm2551_vm12, %v3948_v2, 0.0 }
 0x204   : > { %3141 = vst.msk [vmem:[%s5673_s10 + $0x30] sm:$0xf] %vm3128_vm0, %v3888_v44  ;;  %v3290_v13 = vsel %vm2551_vm12, %v3247_v37, 0.0  ;;  %v3889_v21 = vpack.c.bf16 %v2924_v24, %v2924_v24  ;;  %v3187_v14 = vsel %vm2551_vm12, %v2924_v24, 0.0  ;;  %v3248_v62 = vmul.f32 %v2924_v24, %v2924_v24 }
 0x205   : > { %v3291_v3 = vadd.f32 %v3290_v13, %v3289_v8  ;;  %3144 = vst.msk [vmem:[%s5673_s10 + $0x3c] sm:$0xf] %vm3128_vm0, %v3891_v16  ;;  %v3188_v20 = vadd.f32 %v3187_v14, %v3186_v9  ;;  %v3294_v35 = vsel %vm2551_vm12, %v3249_v42, 0.0  ;;  %v3296_v25 = vsel %vm2551_vm12, %v3250_v11, 0.0 }
 0x206   : > { %3142 = vst.msk [vmem:[%s5673_s10 + $0x34] sm:$0xf] %vm3128_vm0, %v3889_v21  ;;  %v3292_v40 = vsel %vm2551_vm12, %v3248_v62, 0.0 }
 0x207   : > { %v3190_v17 = vadd.f32 %v3189_v56, %v3188_v20  ;;  %v3293_v19 = vadd.f32 %v3292_v40, %v3291_v3 }
 0x209   : > { %v3192_v30 = vadd.f32 %v3191_v5, %v3190_v17  ;;  %v3295_v53 = vadd.f32 %v3294_v35, %v3293_v19 }
 0x20b   : > { %v3297_v31 = vadd.f32 %v3296_v25, %v3295_v53 }
 0x220   : > { %v3951_v46 = vpop.f32.mrb[0].mxu1 }
 0x221   : > { %v3894_v32 = vpack.c.bf16 %v3951_v46, %v3951_v46  ;;  %v2937_v60 = vpop.f32.mrb[1].mxu1  ;;  %v3253_v55 = vmul.f32 %v3951_v46, %v3951_v46  ;;  %v3197_v43 = vsel %vm2551_vm12, %v3951_v46, 0.0 }
 0x222   : > { %v3892_v57 = vpack.c.bf16 %v2937_v60, %v2937_v60  ;;  %v3193_v45 = vsel %vm2551_vm12, %v2937_v60, 0.0  ;;  %v3251_v7 = vmul.f32 %v2937_v60, %v2937_v60  ;;  %v3952_v61 = vpop.f32.mrb[2].mxu1 }
 0x223   : > { %3147 = vst.msk [vmem:[%s5673_s10 + $0x48] sm:$0xf] %vm3128_vm0, %v3894_v32  ;;  %v3194_v34 = vadd.f32 %v3193_v45, %v3192_v30  ;;  %v3895_v50 = vpack.c.bf16 %v3952_v61, %v3952_v61  ;;  %v2940_v1 = vpop.f32.mrb[3].mxu1  ;;  %v3254_v22 = vmul.f32 %v3952_v61, %v3952_v61  ;;  %v3199_v12 = vsel %vm2551_vm12, %v3952_v61, 0.0 }
 0x224   : > { %3145 = vst.msk [vmem:[%s5673_s10 + $0x40] sm:$0xf] %vm3128_vm0, %v3892_v57  ;;  %v3298_v59 = vsel %vm2551_vm12, %v3251_v7, 0.0  ;;  %v3893_v49 = vpack.c.bf16 %v2940_v1, %v2940_v1  ;;  %v3195_v52 = vsel %vm2551_vm12, %v2940_v1, 0.0  ;;  %v3252_v41 = vmul.f32 %v2940_v1, %v2940_v1 }
 0x225   : > { %v3299_v36 = vadd.f32 %v3298_v59, %v3297_v31  ;;  %3148 = vst.msk [vmem:[%s5673_s10 + $0x4c] sm:$0xf] %vm3128_vm0, %v3895_v50  ;;  %v3196_v54 = vadd.f32 %v3195_v52, %v3194_v34  ;;  %v3302_v27 = vsel %vm2551_vm12, %v3253_v55, 0.0  ;;  %v3304_v29 = vsel %vm2551_vm12, %v3254_v22, 0.0 }
 0x226   : > { %3146 = vst.msk [vmem:[%s5673_s10 + $0x44] sm:$0xf] %vm3128_vm0, %v3893_v49  ;;  %v3300_v33 = vsel %vm2551_vm12, %v3252_v41, 0.0 }
 0x227   : > { %v3198_v28 = vadd.f32 %v3197_v43, %v3196_v54  ;;  %v3301_v58 = vadd.f32 %v3300_v33, %v3299_v36 }
 0x229   : > { %v3200_v47 = vadd.f32 %v3199_v12, %v3198_v28  ;;  %v3303_v4 = vadd.f32 %v3302_v27, %v3301_v58 }
 0x22b   : > { %v3305_v38 = vadd.f32 %v3304_v29, %v3303_v4 }
 0x240   : > { %v3955_v18 = vpop.f32.mrb[4].mxu1 }
 0x241   : > { %v3898_v39 = vpack.c.bf16 %v3955_v18, %v3955_v18  ;;  %v2953_v10 = vpop.f32.mrb[5].mxu1  ;;  %v3257_v2 = vmul.f32 %v3955_v18, %v3955_v18  ;;  %v3205_v13 = vsel %vm2551_vm12, %v3955_v18, 0.0 }
 0x242   : > { %v3896_v23 = vpack.c.bf16 %v2953_v10, %v2953_v10  ;;  %v3201_v63 = vsel %vm2551_vm12, %v2953_v10, 0.0  ;;  %v3255_v48 = vmul.f32 %v2953_v10, %v2953_v10  ;;  %v3956_v8 = vpop.f32.mrb[6].mxu1 }
 0x243   : > { %3151 = vst.msk [vmem:[%s5673_s10 + $0x58] sm:$0xf] %vm3128_vm0, %v3898_v39  ;;  %v3202_v26 = vadd.f32 %v3201_v63, %v3200_v47  ;;  %v3899_v6 = vpack.c.bf16 %v3956_v8, %v3956_v8  ;;  %v2956_v51 = vpop.f32.mrb[7].mxu1  ;;  %v3258_v21 = vmul.f32 %v3956_v8, %v3956_v8  ;;  %v3207_v3 = vsel %vm2551_vm12, %v3956_v8, 0.0 }
 0x244   : > { %3149 = vst.msk [vmem:[%s5673_s10 + $0x50] sm:$0xf] %vm3128_vm0, %v3896_v23  ;;  %v3306_v44 = vsel %vm2551_vm12, %v3255_v48, 0.0  ;;  %v3897_v0 = vpack.c.bf16 %v2956_v51, %v2956_v51  ;;  %v3203_v37 = vsel %vm2551_vm12, %v2956_v51, 0.0  ;;  %v3256_v24 = vmul.f32 %v2956_v51, %v2956_v51 }
 0x245   : > { %v3307_v9 = vadd.f32 %v3306_v44, %v3305_v38  ;;  %3152 = vst.msk [vmem:[%s5673_s10 + $0x5c] sm:$0xf] %vm3128_vm0, %v3899_v6  ;;  %v3204_v16 = vadd.f32 %v3203_v37, %v3202_v26  ;;  %v3310_v62 = vsel %vm2551_vm12, %v3257_v2, 0.0  ;;  %v3312_v17 = vsel %vm2551_vm12, %v3258_v21, 0.0 }
 0x246   : > { %3150 = vst.msk [vmem:[%s5673_s10 + $0x54] sm:$0xf] %vm3128_vm0, %v3897_v0  ;;  %v3308_v42 = vsel %vm2551_vm12, %v3256_v24, 0.0 }
 0x247   : > { %v3206_v14 = vadd.f32 %v3205_v13, %v3204_v16  ;;  %v3309_v20 = vadd.f32 %v3308_v42, %v3307_v9 }
 0x249   : > { %v3208_v56 = vadd.f32 %v3207_v3, %v3206_v14  ;;  %v3311_v11 = vadd.f32 %v3310_v62, %v3309_v20 }
 0x24b   : > { %v3313_v40 = vadd.f32 %v3312_v17, %v3311_v11 }
 0x260   : > { %v3959_v5 = vpop.f32.mrb[8].mxu1 }
 0x261   : > { %v3902_v19 = vpack.c.bf16 %v3959_v5, %v3959_v5  ;;  %v2969_v35 = vpop.f32.mrb[9].mxu1  ;;  %v3261_v7 = vmul.f32 %v3959_v5, %v3959_v5  ;;  %v3213_v1 = vsel %vm2551_vm12, %v3959_v5, 0.0 }
 0x262   : > { %v3900_v30 = vpack.c.bf16 %v2969_v35, %v2969_v35  ;;  %v3209_v53 = vsel %vm2551_vm12, %v2969_v35, 0.0  ;;  %v3259_v25 = vmul.f32 %v2969_v35, %v2969_v35  ;;  %v3960_v31 = vpop.f32.mrb[10].mxu1 }
 0x263   : > { %3155 = vst.msk [vmem:[%s5673_s10 + $0x68] sm:$0xf] %vm3128_vm0, %v3902_v19  ;;  %v3210_v15 = vadd.f32 %v3209_v53, %v3208_v56  ;;  %v3903_v46 = vpack.c.bf16 %v3960_v31, %v3960_v31  ;;  %v2972_v32 = vpop.f32.mrb[11].mxu1  ;;  %v3262_v59 = vmul.f32 %v3960_v31, %v3960_v31  ;;  %v3215_v55 = vsel %vm2551_vm12, %v3960_v31, 0.0  ;;  %v3161_v19 = vld [vmem:[%s5757_s12] sm:$0x1] }
 0x264   : > { %3153 = vst.msk [vmem:[%s5673_s10 + $0x60] sm:$0xf] %vm3128_vm0, %v3900_v30  ;;  %v3314_v60 = vsel %vm2551_vm12, %v3259_v25, 0.0  ;;  %v3901_v57 = vpack.c.bf16 %v2972_v32, %v2972_v32  ;;  %v3211_v45 = vsel %vm2551_vm12, %v2972_v32, 0.0  ;;  %v3260_v50 = vmul.f32 %v2972_v32, %v2972_v32  ;;  %v3234_v25 = vld [vmem:[%s5762_s13] sm:$0x1] }
 0x265   : > { %v3315_v61 = vadd.f32 %v3314_v60, %v3313_v40  ;;  %3156 = vst.msk [vmem:[%s5673_s10 + $0x6c] sm:$0xf] %vm3128_vm0, %v3903_v46  ;;  %v3212_v34 = vadd.f32 %v3211_v45, %v3210_v15  ;;  %v3318_v54 = vsel %vm2551_vm12, %v3261_v7, 0.0  ;;  %v3320_v22 = vsel %vm2551_vm12, %v3262_v59, 0.0 }
 0x266   : > { %3154 = vst.msk [vmem:[%s5673_s10 + $0x64] sm:$0xf] %vm3128_vm0, %v3901_v57  ;;  %v3316_v52 = vsel %vm2551_vm12, %v3260_v50, 0.0 }
 0x267   : > { %v3214_v49 = vadd.f32 %v3213_v1, %v3212_v34  ;;  %v3317_v36 = vadd.f32 %v3316_v52, %v3315_v61 }
 0x269   : > { %v3216_v41 = vadd.f32 %v3215_v55, %v3214_v49  ;;  %v3319_v43 = vadd.f32 %v3318_v54, %v3317_v36 }
 0x26b   : > { %v3321_v28 = vadd.f32 %v3320_v22, %v3319_v43 }
 0x27d   : > { %v3963_v33 = vpop.f32.mrb[12].mxu1 }
 0x27e   : > { %v3906_v12 = vpack.c.bf16 %v3963_v33, %v3963_v33  ;;  %v2985_v58 = vpop.f32.mrb[13].mxu1  ;;  %v3265_v48 = vmul.f32 %v3963_v33, %v3963_v33  ;;  %v3221_v51 = vsel %vm2551_vm12, %v3963_v33, 0.0 }
 0x27f   : > { %v3904_v27 = vpack.c.bf16 %v2985_v58, %v2985_v58  ;;  %v3217_v47 = vsel %vm2551_vm12, %v2985_v58, 0.0  ;;  %v3263_v4 = vmul.f32 %v2985_v58, %v2985_v58  ;;  %v3964_v29 = vpop.f32.mrb[14].mxu1 }
 0x280   : > { %3159 = vst.msk [vmem:[%s5673_s10 + $0x78] sm:$0xf] %vm3128_vm0, %v3906_v12  ;;  %v3218_v38 = vadd.f32 %v3217_v47, %v3216_v41  ;;  %v3907_v18 = vpack.c.bf16 %v3964_v29, %v3964_v29  ;;  %v2988_v39 = vpop.f32.mrb[15].mxu1  ;;  %v3266_v44 = vmul.f32 %v3964_v29, %v3964_v29  ;;  %v3223_v2 = vsel %vm2551_vm12, %v3964_v29, 0.0 }
 0x281   : > { %3157 = vst.msk [vmem:[%s5673_s10 + $0x70] sm:$0xf] %vm3128_vm0, %v3904_v27  ;;  %v3322_v10 = vsel %vm2551_vm12, %v3263_v4, 0.0  ;;  %v3905_v23 = vpack.c.bf16 %v2988_v39, %v2988_v39  ;;  %v3219_v63 = vsel %vm2551_vm12, %v2988_v39, 0.0  ;;  %v3264_v6 = vmul.f32 %v2988_v39, %v2988_v39 }
 0x282   : > { %v3323_v8 = vadd.f32 %v3322_v10, %v3321_v28  ;;  %3160 = vst.msk [vmem:[%s5673_s10 + $0x7c] sm:$0xf] %vm3128_vm0, %v3907_v18  ;;  %v3220_v26 = vadd.f32 %v3219_v63, %v3218_v38  ;;  %v3326_v16 = vsel %vm2551_vm12, %v3265_v48, 0.0  ;;  %v3328_v21 = vsel %vm2551_vm12, %v3266_v44, 0.0 }
 0x283   : > { %3158 = vst.msk [vmem:[%s5673_s10 + $0x74] sm:$0xf] %vm3128_vm0, %v3905_v23  ;;  %v3324_v37 = vsel %vm2551_vm12, %v3264_v6, 0.0  ;;  %s4195_s10 = scalar_lea.vmem %s4194_s9, 32 }
 0x284   : > { %v3222_v0 = vadd.f32 %v3221_v51, %v3220_v26  ;;  %v3325_v9 = vadd.f32 %v3324_v37, %v3323_v8  ;;  %p4197_p3 = scmp.lt.s32.totalorder %s4195_s10, %s4189_s7 }
 0x286   : > { %v3224_v24 = vadd.f32 %v3223_v2, %v3222_v0  ;;  %v3327_v13 = vadd.f32 %v3326_v16, %v3325_v9  ;;  %p4198_p5 = por %p4197_p3, %p4196_p2 }
 0x288   : > { %v3225_v14 = vrot.slane %v3224_v24, 4  ;;  %v3329_v42 = vadd.f32 %v3328_v21, %v3327_v13  ;;  %p4199_p6 = pnand %p4198_p5, %p4192_p1 }
 0x28a   : > { %v3226_v3 = vadd.f32 %v3225_v14, %v3224_v24  ;;  %v3330_v20 = vrot.slane %v3329_v42, 4 }
 0x28c   : > { %v3227_v62 = vrot.slane %v3226_v3, 2  ;;  %v3331_v56 = vadd.f32 %v3330_v20, %v3329_v42 }
 0x28e   : > { %v3228_v11 = vadd.f32 %v3227_v62, %v3226_v3  ;;  %v3332_v17 = vrot.slane %v3331_v56, 2 }
 0x290   : > { %v3229_v40 = vrot.slane %v3228_v11, 1  ;;  %v3333_v5 = vadd.f32 %v3332_v17, %v3331_v56 }
 0x292   : > { %v3230_v35 = vadd.f32 %v3229_v40, %v3228_v11  ;;  %v3334_v30 = vrot.slane %v3333_v5, 1 }
 0x294   : > { %v3231_v53 = vadd.f32 %v3230_v35, %v3161_v19  ;;  %v3335_v31 = vadd.f32 %v3334_v30, %v3333_v5 }
 0x296   : > { %3233 = vst.msk [vmem:[%s5757_s12] sm:$0x1] %vm805_vm2, %v3231_v53 }
 0x297   : > { %4202 = shalt.err (!%p4199_p6)
}
 0x298   : > { %s4203_s12 = scalar_lea.hbm %s5837_s29, 16  ;;  %s4207_s26 = scalar_lea.hbm %s5922_s3, 32 }
 0x299   : > { %p4204_p7 = scmp.ne.s32.totalorder %s5837_s29, %s4203_s12  ;;  %p4208_p11 = scmp.lt.u32.totalorder %s5837_s29, %s5922_s3 }
 0x29a   : > { %p4209_p12 = scmp.lt.u32.totalorder %s4207_s26, %s4203_s12  ;;  %p4211_p0 = scmp.lt.u32.totalorder %s4203_s12, %s5837_s29 }
 0x29b   : > { %p4205_p9 = pnand %p4204_p7, %p4378_p4 }
 0x29c   : > { %p4210_p13 = por %p4209_p12, %p4208_p11 }
 0x29d   : > { %p4206_p10 = pneg %p4205_p9 }
 0x29e   : > { %p4212_p1 = por %p4211_p0, %p4210_p13 }
 0x2a0   : > { %p4213_p2 = pnand %p4212_p1, %p4206_p10 }
 0x2a2   : > { %4216 = shalt.err (!%p4213_p2)
}
 0x2a3   : > { %3973 = dma.vmem_to_hbm [thread:$0]  (%p4378_p4), %s5839_s21, 16, %s5837_s29, %s3348_s6   ;;  %v3336_v15 = vadd.f32 %v3335_v31, %v3234_v25 }
 0x2a4   : > { %s3352_s7 = scalar_lea.sflag [#allocation6], %s5754_s11  ;;  %s4217_s8 = scalar_lea.vmem %s5849_s22, 16 }
 0x2a5   : > { %3337 = vst.msk [vmem:[%s5762_s13] sm:$0x1] %vm805_vm2, %v3336_v15  ;;  %p4218_p3 = scmp.ne.s32.totalorder %s5849_s22, %s4217_s8  ;;  %s4312_s9 = smov [#allocation5]  }
 0x2a6   : > { %s4221_s10 = sshll.u32 %s4312_s9, 4  ;;  %s4222_s10 = int_to_ptr.vmem [resolvable:$false] %s4221_s10 }
 0x2a7   : > { %p4219_p5 = pnand %p4218_p3, %p4378_p4  ;;  %s4223_s12 = scalar_lea.vmem %s4222_s10, 32 }
 0x2a8   : > { %p4224_p7 = scmp.lt.s32.totalorder %s5849_s22, %s4222_s10  ;;  %p4225_p9 = scmp.lt.s32.totalorder %s4223_s12, %s4217_s8 }
 0x2a9   : > { %p4220_p6 = pneg %p4219_p5 }
 0x2aa   : > { %p4226_p10 = por %p4225_p9, %p4224_p7 }
 0x2ac   : > { %p4227_p11 = pnand %p4226_p10, %p4220_p6 }
 0x2ae   : > { %4230 = shalt.err (!%p4227_p11)
}
 0x2af   : > { %s4231_s11 = scalar_lea.hbm %s5847_s5, 16  ;;  %s4235_s29 = scalar_lea.hbm %s5923_s4, 32 }
 0x2b0   : > { %p4232_p12 = scmp.ne.s32.totalorder %s5847_s5, %s4231_s11  ;;  %p4236_p1 = scmp.lt.u32.totalorder %s5847_s5, %s5923_s4 }
 0x2b1   : > { %p4237_p2 = scmp.lt.u32.totalorder %s4235_s29, %s4231_s11  ;;  %p4239_p5 = scmp.lt.u32.totalorder %s4231_s11, %s5847_s5 }
 0x2b2   : > { %p4233_p13 = pnand %p4232_p12, %p4378_p4 }
 0x2b3   : > { %p4238_p3 = por %p4237_p2, %p4236_p1 }
 0x2b4   : > { %p4234_p0 = pneg %p4233_p13 }
 0x2b5   : > { %p4240_p6 = por %p4239_p5, %p4238_p3 }
 0x2b7   : > { %p4241_p7 = pnand %p4240_p6, %p4234_p0 }
 0x2b9   : > { %4244 = shalt.err (!%p4241_p7)
}
 0x2ba   : > { %3974 = dma.vmem_to_hbm [thread:$0]  (%p4378_p4), %s5849_s22, 16, %s5847_s5, %s3352_s7  }
 0x2bb PF: > { %p3984_p9 = scmp.ge.s32.totalorder %s4299_s20, 2  ;;  %s3408_s24 = sand.u32 1, %s4279_s15  }
 0x2bc   : > { %s3409_s26 = scalar_lea.sflag [#allocation4], %s3408_s24 }
 0x2bd   : > { %p3978_p10 = pnand %p3984_p9, %p4385_p8 }
 0x2bf   : > { %4270 = dma.done.wait (!%p3978_p10), %s3409_s26, 16  }
 0x2c0   : > { %4272 = vsyncadd (!%p3978_p10), %s3409_s26, 4294967280  ;;  %s3417_s18 = scalar_lea.sflag [#allocation6], %s3408_s24 }
 0x2c1   : > { %4274 = dma.done.wait (!%p3978_p10), %s3417_s18, 16  }
 0x2c2   : > { %4276 = vsyncadd (!%p3978_p10), %s3417_s18, 4294967280  ;;  %s21_s20 = sadd.s32 1, %s4299_s20   ;;  %s5932_s15 = smov %s4283_s16 }
 0x2c3   : > { %p18_p11 = scmp.ge.s32.totalorder %s21_s20, 4   ;;  %s5933_s16 = smov %s4287_s17 }
 0x2c4   : > { %s5934_s17 = smov %s4391_s28  ;;  %s5935_s18 = smov %s4295_s19 }
 0x2c5   : > { %s5936_s19 = smov %s5938_s23  ;;  %20 = sbr.rel (!%p18_p11) target bundleno = 6 (0x6), region = 103 }
 0x2cc   :  { %3421 = vsyncpa [#allocation4], 1 }
 0x2cd   :  { %3423 = vsyncpa [#allocation4 + $0x1], 1 }
 0x2ce   :  { %3424 = vsyncpa [#allocation6], 1 }
 0x2cf   :  { %3426 = vsyncpa [#allocation6 + $0x1], 1 }

</bundles_post_ra>
